<compile_context>
chip_gen: v7x
topology: tpu7x:2x2x1
jax: 0.10.0
libtpu: 0.0.40
codegen_flags: <defaults>
</compile_context>

<pallas_src>
import numpy as np

import jax
import jax.numpy as jnp
from jax.experimental import pallas as pl
from jax.experimental.pallas import tpu as pltpu

LATENT = 10
SPATIAL = [1, 4, 10, 13, 16]          # H=W before layer 1 and after layers 1..4
EPS = 1e-5

# BatchNorm'd activation widths (lanes) and channel counts for layers 1..3.
BN_P = (256, 800, 676)                # H*W*C after layers 1, 2, 3
BN_C = (16, 8, 4)
SEL_ROW = (0, 256, 1056)              # sublane offsets of stacked [P, C] blocks
SELT_COL = (0, 256, 1152)             # 128-aligned lane offsets of [C, P] blocks
SEL_ROWS_TOT = 1736                   # 256 + 800 + 676 = 1732, padded to 8-mult
SELT_COLS_TOT = 1920                  # 256 + 896 + 768 (each block lane-aligned)


# ----------------------------- Pallas kernel ------------------------------ #
def _bn_lane_interleaved(y, sel, selt, gamma, beta, count):
    """Training-mode BatchNorm on [N, P] activations whose lanes interleave
    channels with period C.  Per-channel reduce and broadcast-back each use ONE
    fused 2-row matmul against 0/1 channel-selection tables (halves the BN
    RHS-push count vs. four separate dots).  Single-pass biased variance with
    a >=0 clamp; all math in f32."""
    inv = 1.0 / count
    col = jnp.sum(y, axis=0, keepdims=True)                      # [1, P]
    col2 = jnp.sum(y * y, axis=0, keepdims=True)                 # [1, P]
    stats = jnp.concatenate([col, col2], axis=0)                 # [2, P]
    red = jnp.dot(stats, sel, preferred_element_type=jnp.float32)    # [2, C]
    mean_c = red[0:1] * inv                                      # [1, C]
    var_c = jnp.maximum(red[1:2] * inv - mean_c * mean_c, 0.0)   # biased, clamped
    scale_c = gamma * jax.lax.rsqrt(var_c + EPS)                 # [1, C]
    shift_c = beta - mean_c * scale_c                            # [1, C]
    coef = jnp.concatenate([scale_c, shift_c], axis=0)           # [2, C]
    coef_p = jnp.dot(coef, selt, preferred_element_type=jnp.float32)  # [2, P]
    return y * coef_p[0:1] + coef_p[1:2]


def generator_kernel(z_ref, a1_ref, a2_ref, a3_hbm, a4_hbm,
                     sel_ref, selt_ref, bn_ref, o_ref,
                     a3_buf, a4_buf, dma_sem):
    n = z_ref.shape[0]

    # Start the big layer-3/4 weight DMAs immediately; they overlap with the
    # layer-1/2 matmuls + BN instead of blocking the gridless prologue.
    cp3 = pltpu.make_async_copy(a3_hbm, a3_buf, dma_sem.at[0])
    cp4 = pltpu.make_async_copy(a4_hbm, a4_buf, dma_sem.at[1])
    cp3.start()
    cp4.start()

    def conv(x, a):
        # Lane-dense bf16 MXU matmul; f32 accumulation.
        return jnp.dot(x.astype(jnp.bfloat16), a,
                       preferred_element_type=jnp.float32)

    # Layer 1: ConvT(10->16, k4) + BN(16) + ReLU            -> [N, 4*4*16]
    h = conv(z_ref[...], a1_ref[...])
    h = _bn_lane_interleaved(
        h,
        sel_ref[SEL_ROW[0]:SEL_ROW[0] + BN_P[0], 0:BN_C[0]],
        selt_ref[0:BN_C[0], SELT_COL[0]:SELT_COL[0] + BN_P[0]],
        bn_ref[0:1, 0:16], bn_ref[1:2, 0:16], n * 16.0)
    h = jnp.maximum(h, 0.0)

    # Layer 2: ConvT(16->8, k7) + BN(8) + ReLU              -> [N, 10*10*8]
    h = conv(h, a2_ref[...])
    h = _bn_lane_interleaved(
        h,
        sel_ref[SEL_ROW[1]:SEL_ROW[1] + BN_P[1], 0:BN_C[1]],
        selt_ref[0:BN_C[1], SELT_COL[1]:SELT_COL[1] + BN_P[1]],
        bn_ref[2:3, 0:8], bn_ref[3:4, 0:8], n * 100.0)
    h = jnp.maximum(h, 0.0)

    # Layer 3: ConvT(8->4, k4) + BN(4)   (no ReLU here)     -> [N, 13*13*4]
    cp3.wait()
    h = conv(h, a3_buf[...])
    h = _bn_lane_interleaved(
        h,
        sel_ref[SEL_ROW[2]:SEL_ROW[2] + BN_P[2], 0:BN_C[2]],
        selt_ref[0:BN_C[2], SELT_COL[2]:SELT_COL[2] + BN_P[2]],
        bn_ref[4:5, 0:4], bn_ref[5:6, 0:4], n * 169.0)

    # Layer 4: ConvT(4->1, k4) + ReLU + Tanh                -> [N, 16*16]
    cp4.wait()
    h = conv(h, a4_buf[...])
    o_ref[...] = jnp.tanh(jnp.maximum(h, 0.0))


# ---------------------- one-time parameter repacking ----------------------- #
def _conv_matrix(w_pt, hin):
    """Dense matrix A with  flat_out = flat_in @ A  implementing
    ConvTranspose2d(stride=1, padding=0, bias=False) for a PyTorch weight
    [Cin, Cout, K, K].  Flattening order is (h, w, c) with c fastest."""
    cin, cout, k, _ = w_pt.shape
    ho = hin + k - 1
    a = np.zeros((hin * hin * cin, ho * ho * cout), np.float32)
    w = np.asarray(w_pt, np.float32)
    for yi in range(hin):
        for xi in range(hin):
            r0 = (yi * hin + xi) * cin
            for ky in range(k):
                for kx in range(k):
                    c0 = ((yi + ky) * ho + (xi + kx)) * cout
                    a[r0:r0 + cin, c0:c0 + cout] += w[:, :, ky, kx]
    return a


def _channel_select(h, c):
    """S[p, j] = 1 iff lane p of the (h, w, c)-flattened activation belongs to
    channel j.  Used to reduce/broadcast per-channel BN stats via the MXU."""
    p = h * h * c
    s = np.zeros((p, c), np.float32)
    s[np.arange(p), np.arange(p) % c] = 1.0
    return s


def prepare_params(params):
    """Repack PyTorch-layout weights into kernel operands (done once)."""
    prep = {}
    for i, wk in enumerate(("w1", "w2", "w3", "w4")):
        a = _conv_matrix(np.asarray(params[wk]), SPATIAL[i])
        prep[f"a{i + 1}"] = jnp.asarray(a, jnp.bfloat16)       # MXU-native

    # Pack the six channel-selection tables into two aligned operands:
    #   sel_all  [1736, 16]: [P_l, C_l] blocks stacked along sublanes
    #   selt_all [16, 1920]: [C_l, P_l] blocks stacked along lanes (128-aligned)
    sel_all = np.zeros((SEL_ROWS_TOT, 16), np.float32)
    selt_all = np.zeros((16, SELT_COLS_TOT), np.float32)
    for i, c in enumerate(BN_C):
        s = _channel_select(SPATIAL[i + 1], c)                 # [P_l, c]
        p = s.shape[0]
        sel_all[SEL_ROW[i]:SEL_ROW[i] + p, :c] = s
        selt_all[:c, SELT_COL[i]:SELT_COL[i] + p] = s.T
    prep["sel"] = jnp.asarray(sel_all)
    prep["selt"] = jnp.asarray(selt_all)

    bn = np.zeros((6, 16), np.float32)                          # packed gammas/betas
    for i, (gk, bk, c) in enumerate((("g1", "b1", 16), ("g2", "b2", 8),
                                     ("g3", "b3", 4))):
        bn[2 * i, :c] = np.asarray(params[gk])
        bn[2 * i + 1, :c] = np.asarray(params[bk])
    prep["bn"] = jnp.asarray(bn)
    return prep


# ------------------------------- forward ----------------------------------- #
def generator_forward(z_nchw, prep):
    n = z_nchw.shape[0]
    z2d = z_nchw.reshape(n, LATENT).astype(jnp.bfloat16)        # pre-cast (review)
    args = (z2d, prep["a1"], prep["a2"], prep["a3"], prep["a4"],
            prep["sel"], prep["selt"], prep["bn"])

    flops = (2 * n * (10 * 256 + 256 * 800 + 800 * 676 + 676 * 256)
             + 8 * (256 * 16 + 800 * 8 + 676 * 4))
    bytes_accessed = (sum(int(a.size) * a.dtype.itemsize for a in args)
                      + n * 256 * 4)

    vmem = pl.BlockSpec(memory_space=pltpu.MemorySpace.VMEM)
    hbm = pl.BlockSpec(memory_space=pl.ANY)                     # manual DMA inside

    out_flat = pl.pallas_call(
        generator_kernel,
        out_shape=jax.ShapeDtypeStruct((n, 16 * 16), jnp.float32),
        in_specs=[vmem, vmem, vmem, hbm, hbm, vmem, vmem, vmem],
        out_specs=vmem,
        scratch_shapes=[
            pltpu.VMEM((800, 676), jnp.bfloat16),               # A3 landing buffer
            pltpu.VMEM((676, 256), jnp.bfloat16),               # A4 landing buffer
            pltpu.SemaphoreType.DMA((2,)),
        ],
        cost_estimate=pl.CostEstimate(flops=flops,
                                      transcendentals=n * 256 + 32,
                                      bytes_accessed=bytes_accessed),
    )(*args)
    # Cout == 1, so the (h, w)-flattened output reshapes directly to NCHW.
    return out_flat.reshape(n, 1, 16, 16)


# -------------------- pure-JAX f32 reference (independent) ----------------- #
def _im2col_full(x_nhwc, k):
    x = jnp.pad(x_nhwc, ((0, 0), (k - 1, k - 1), (k - 1, k - 1), (0, 0)))
    n, h, w, c = x.shape
    ho, wo = h - k + 1, w - k + 1
    cols = []
    for ky in range(k):
        for kx in range(k):
            cols.append(x[:, ky:ky + ho, kx:kx + wo, :])
    patches = jnp.stack(cols, axis=3)
    return patches.reshape(n * ho * wo, k * k * c), (n, ho, wo)


def _convt_weight_full(w_t):
    cin, cout, k, _ = w_t.shape
    w = jnp.flip(w_t, axis=(2, 3))
    w = jnp.transpose(w, (2, 3, 0, 1))
    return w.reshape(k * k * cin, cout)


def generator_forward_ref(z_nchw, params):
    """f32 reference using an independent lowering (full conv with spatially
    flipped kernel via im2col); cross-checks the conv-matrix formulation."""
    x = jnp.transpose(z_nchw, (0, 2, 3, 1)).astype(jnp.float32)
    cfg = [("w1", "g1", "b1", True, True, False),
           ("w2", "g2", "b2", True, True, False),
           ("w3", "g3", "b3", True, False, False),
           ("w4", None, None, False, True, True)]
    for wk, gk, bk, do_bn, do_relu, do_tanh in cfg:
        w_t = params[wk]
        cout, k = w_t.shape[1], w_t.shape[2]
        patches, (n, ho, wo) = _im2col_full(x, k)
        y = patches @ _convt_weight_full(w_t)
        if do_bn:
            mean = jnp.mean(y, axis=0, keepdims=True)
            var = jnp.mean(jnp.square(y - mean), axis=0, keepdims=True)
            y = (y - mean) * jax.lax.rsqrt(var + EPS)
            y = y * params[gk].reshape(1, -1) + params[bk].reshape(1, -1)
        if do_relu:
            y = jnp.maximum(y, 0.0)
        if do_tanh:
            y = jnp.tanh(y)
        x = y.reshape(n, ho, wo, cout)
    return jnp.transpose(x, (0, 3, 1, 2))


def init_params(key):
    m1, m2, m3 = 4, 8, 16
    k = jax.random.split(key, 10)
    return {
        # ConvTranspose2d weights, PyTorch layout [Cin, Cout, K, K]
        "w1": 0.05 * jax.random.normal(k[0], (LATENT, m3, 4, 4), jnp.float32),
        "w2": 0.05 * jax.random.normal(k[1], (m3, m2, 7, 7), jnp.float32),
        "w3": 0.05 * jax.random.normal(k[2], (m2, m1, 4, 4), jnp.float32),
        "w4": 0.05 * jax.random.normal(k[3], (m1, 1, 4, 4), jnp.float32),
        # BatchNorm affine params (randomized so the affine path is exercised;
        # PyTorch default init would be weight=1 / bias=0).
        "g1": 1.0 + 0.2 * jax.random.normal(k[4], (m3,), jnp.float32),
        "b1": 0.1 * jax.random.normal(k[5], (m3,), jnp.float32),
        "g2": 1.0 + 0.2 * jax.random.normal(k[6], (m2,), jnp.float32),
        "b2": 0.1 * jax.random.normal(k[7], (m2,), jnp.float32),
        "g3": 1.0 + 0.2 * jax.random.normal(k[8], (m1,), jnp.float32),
        "b3": 0.1 * jax.random.normal(k[9], (m1,), jnp.float32),
    }


if __name__ == "__main__":
    key = jax.random.PRNGKey(0)
    pkey, zkey = jax.random.split(key)
    params = init_params(pkey)
    prep = prepare_params(params)                 # one-time weight repack

    batch = 2
    z = jax.random.normal(zkey, (batch, LATENT, 1, 1), jnp.float32)  # NCHW latent

    fwd = jax.jit(generator_forward)
    out = jax.block_until_ready(fwd(z, prep))
    assert out.shape == (batch, 1, 16, 16), out.shape

    ref = generator_forward_ref(z, params)        # f32 reference
    err = float(jnp.max(jnp.abs(out - ref)))
    if err > 5e-2:                                # tolerance for bf16 MXU operands
        raise AssertionError(f"mismatch vs reference: max abs err {err}")
    print("KERNEL_OK")
</pallas_src>

<mosaic_0001>
module attributes {stable_mosaic.version = 11 : i64} {
  func.func @generator_kernel(%arg0: memref<2x10xbf16, #tpu.memory_space<vmem>>, %arg1: memref<10x256xbf16, #tpu.memory_space<vmem>>, %arg2: memref<256x800xbf16, #tpu.memory_space<vmem>>, %arg3: memref<800x676xbf16, #tpu.memory_space<any>>, %arg4: memref<676x256xbf16, #tpu.memory_space<any>>, %arg5: memref<1736x16xf32, #tpu.memory_space<vmem>>, %arg6: memref<16x1920xf32, #tpu.memory_space<vmem>>, %arg7: memref<6x16xf32, #tpu.memory_space<vmem>>, %arg8: memref<2x256xf32, #tpu.memory_space<vmem>>, %arg9: memref<800x676xbf16, #tpu.memory_space<vmem>>, %arg10: memref<676x256xbf16, #tpu.memory_space<vmem>>, %arg11: memref<2x!tpu.dma_semaphore, #tpu.memory_space<semaphore_mem>>) attributes {dimension_semantics = [], scalar_prefetch = 0 : i64, scratch_operands = 3 : i64, tpu.core_type = #tpu.core_type<tc>} {
    %c0_i32 = arith.constant 0 : i32
    %0 = tpu.memref_slice %arg11[%c0_i32] : memref<2x!tpu.dma_semaphore, #tpu.memory_space<semaphore_mem>> -> memref<1x!tpu.dma_semaphore, #tpu.memory_space<semaphore_mem>>
    %1 = tpu.memref_squeeze %0 : memref<1x!tpu.dma_semaphore, #tpu.memory_space<semaphore_mem>> -> memref<!tpu.dma_semaphore, #tpu.memory_space<semaphore_mem>>
    tpu.enqueue_dma source(%arg3 : memref<800x676xbf16, #tpu.memory_space<any>>) target(%arg9 : memref<800x676xbf16, #tpu.memory_space<vmem>>) target_semaphore(%1 : memref<!tpu.dma_semaphore, #tpu.memory_space<semaphore_mem>>)
    %c1_i32 = arith.constant 1 : i32
    %2 = tpu.memref_slice %arg11[%c1_i32] : memref<2x!tpu.dma_semaphore, #tpu.memory_space<semaphore_mem>> -> memref<1x!tpu.dma_semaphore, #tpu.memory_space<semaphore_mem>>
    %3 = tpu.memref_squeeze %2 : memref<1x!tpu.dma_semaphore, #tpu.memory_space<semaphore_mem>> -> memref<!tpu.dma_semaphore, #tpu.memory_space<semaphore_mem>>
    tpu.enqueue_dma source(%arg4 : memref<676x256xbf16, #tpu.memory_space<any>>) target(%arg10 : memref<676x256xbf16, #tpu.memory_space<vmem>>) target_semaphore(%3 : memref<!tpu.dma_semaphore, #tpu.memory_space<semaphore_mem>>)
    %c0 = arith.constant 0 : index
    %c0_0 = arith.constant 0 : index
    %4 = vector.load %arg0[%c0, %c0_0] : memref<2x10xbf16, #tpu.memory_space<vmem>>, vector<2x10xbf16>
    %c0_1 = arith.constant 0 : index
    %c0_2 = arith.constant 0 : index
    %5 = vector.load %arg1[%c0_1, %c0_2] : memref<10x256xbf16, #tpu.memory_space<vmem>>, vector<10x256xbf16>
    %cst = arith.constant dense<0.000000e+00> : vector<2x256xf32>
    %6 = tpu.matmul %4, %5, %cst {dimension_numbers = #tpu.dot_dimension_numbers<[1], [0], [0], [1], [0, 0, 1, 1], [], []>} : vector<2x10xbf16>, vector<10x256xbf16>, vector<2x256xf32> -> vector<2x256xf32>
    %c0_3 = arith.constant 0 : index
    %c0_4 = arith.constant 0 : index
    %7 = vector.load %arg5[%c0_3, %c0_4] : memref<1736x16xf32, #tpu.memory_space<vmem>>, vector<256x16xf32>
    %c0_5 = arith.constant 0 : index
    %c0_6 = arith.constant 0 : index
    %8 = vector.load %arg6[%c0_5, %c0_6] : memref<16x1920xf32, #tpu.memory_space<vmem>>, vector<16x256xf32>
    %c0_7 = arith.constant 0 : index
    %c0_8 = arith.constant 0 : index
    %9 = vector.load %arg7[%c0_7, %c0_8] : memref<6x16xf32, #tpu.memory_space<vmem>>, vector<1x16xf32>
    %c1 = arith.constant 1 : index
    %c0_9 = arith.constant 0 : index
    %10 = vector.load %arg7[%c1, %c0_9] : memref<6x16xf32, #tpu.memory_space<vmem>>, vector<1x16xf32>
    %cst_10 = arith.constant dense<0.000000e+00> : vector<256xf32>
    %11 = vector.multi_reduction <add>, %6, %cst_10 [0] : vector<2x256xf32> to vector<256xf32>
    %12 = vector.shape_cast %11 : vector<256xf32> to vector<1x256xf32>
    %13 = arith.mulf %6, %6 : vector<2x256xf32>
    %cst_11 = arith.constant dense<0.000000e+00> : vector<256xf32>
    %14 = vector.multi_reduction <add>, %13, %cst_11 [0] : vector<2x256xf32> to vector<256xf32>
    %15 = vector.shape_cast %14 : vector<256xf32> to vector<1x256xf32>
    %16 = tpu.concatenate %12, %15 in 0 : vector<1x256xf32>, vector<1x256xf32> -> vector<2x256xf32>
    %cst_12 = arith.constant dense<0.000000e+00> : vector<2x16xf32>
    %17 = tpu.matmul %16, %7, %cst_12 {dimension_numbers = #tpu.dot_dimension_numbers<[1], [0], [0], [1], [0, 0, 1, 1], [], []>} : vector<2x256xf32>, vector<256x16xf32>, vector<2x16xf32> -> vector<2x16xf32>
    %18 = vector.extract_strided_slice %17 {offsets = [0, 0], sizes = [1, 16], strides = [1, 1]} : vector<2x16xf32> to vector<1x16xf32>
    %cst_13 = arith.constant 3.125000e-02 : f32
    %19 = vector.broadcast %cst_13 : f32 to vector<1x16xf32>
    %20 = arith.mulf %18, %19 : vector<1x16xf32>
    %21 = vector.extract_strided_slice %17 {offsets = [1, 0], sizes = [1, 16], strides = [1, 1]} : vector<2x16xf32> to vector<1x16xf32>
    %cst_14 = arith.constant 3.125000e-02 : f32
    %22 = vector.broadcast %cst_14 : f32 to vector<1x16xf32>
    %23 = arith.mulf %21, %22 : vector<1x16xf32>
    %24 = arith.mulf %20, %20 : vector<1x16xf32>
    %25 = arith.subf %23, %24 : vector<1x16xf32>
    %cst_15 = arith.constant 0.000000e+00 : f32
    %26 = vector.broadcast %cst_15 : f32 to vector<1x16xf32>
    %27 = arith.maximumf %25, %26 : vector<1x16xf32>
    %cst_16 = arith.constant 9.99999974E-6 : f32
    %28 = vector.broadcast %cst_16 : f32 to vector<1x16xf32>
    %29 = arith.addf %27, %28 : vector<1x16xf32>
    %30 = math.rsqrt %29 : vector<1x16xf32>
    %31 = arith.mulf %9, %30 : vector<1x16xf32>
    %32 = arith.mulf %20, %31 : vector<1x16xf32>
    %33 = arith.subf %10, %32 : vector<1x16xf32>
    %34 = tpu.concatenate %31, %33 in 0 : vector<1x16xf32>, vector<1x16xf32> -> vector<2x16xf32>
    %cst_17 = arith.constant dense<0.000000e+00> : vector<2x256xf32>
    %35 = tpu.matmul %34, %8, %cst_17 {dimension_numbers = #tpu.dot_dimension_numbers<[1], [0], [0], [1], [0, 0, 1, 1], [], []>} : vector<2x16xf32>, vector<16x256xf32>, vector<2x256xf32> -> vector<2x256xf32>
    %36 = vector.extract_strided_slice %35 {offsets = [0, 0], sizes = [1, 256], strides = [1, 1]} : vector<2x256xf32> to vector<1x256xf32>
    %37 = vector.broadcast %36 : vector<1x256xf32> to vector<2x256xf32>
    %38 = arith.mulf %6, %37 : vector<2x256xf32>
    %39 = vector.extract_strided_slice %35 {offsets = [1, 0], sizes = [1, 256], strides = [1, 1]} : vector<2x256xf32> to vector<1x256xf32>
    %40 = vector.broadcast %39 : vector<1x256xf32> to vector<2x256xf32>
    %41 = arith.addf %38, %40 : vector<2x256xf32>
    %cst_18 = arith.constant 0.000000e+00 : f32
    %42 = vector.broadcast %cst_18 : f32 to vector<2x256xf32>
    %43 = arith.maximumf %41, %42 : vector<2x256xf32>
    %c0_19 = arith.constant 0 : index
    %c0_20 = arith.constant 0 : index
    %44 = vector.load %arg2[%c0_19, %c0_20] : memref<256x800xbf16, #tpu.memory_space<vmem>>, vector<256x800xbf16>
    %45 = arith.truncf %43 : vector<2x256xf32> to vector<2x256xbf16>
    %cst_21 = arith.constant dense<0.000000e+00> : vector<2x800xf32>
    %46 = tpu.matmul %45, %44, %cst_21 {dimension_numbers = #tpu.dot_dimension_numbers<[1], [0], [0], [1], [0, 0, 1, 1], [], []>} : vector<2x256xbf16>, vector<256x800xbf16>, vector<2x800xf32> -> vector<2x800xf32>
    %c256 = arith.constant 256 : index
    %c0_22 = arith.constant 0 : index
    %47 = vector.load %arg5[%c256, %c0_22] : memref<1736x16xf32, #tpu.memory_space<vmem>>, vector<800x8xf32>
    %c0_23 = arith.constant 0 : index
    %c256_24 = arith.constant 256 : index
    %48 = vector.load %arg6[%c0_23, %c256_24] : memref<16x1920xf32, #tpu.memory_space<vmem>>, vector<8x800xf32>
    %c2 = arith.constant 2 : index
    %c0_25 = arith.constant 0 : index
    %49 = vector.load %arg7[%c2, %c0_25] : memref<6x16xf32, #tpu.memory_space<vmem>>, vector<1x8xf32>
    %c3 = arith.constant 3 : index
    %c0_26 = arith.constant 0 : index
    %50 = vector.load %arg7[%c3, %c0_26] : memref<6x16xf32, #tpu.memory_space<vmem>>, vector<1x8xf32>
    %cst_27 = arith.constant dense<0.000000e+00> : vector<800xf32>
    %51 = vector.multi_reduction <add>, %46, %cst_27 [0] : vector<2x800xf32> to vector<800xf32>
    %52 = vector.shape_cast %51 : vector<800xf32> to vector<1x800xf32>
    %53 = arith.mulf %46, %46 : vector<2x800xf32>
    %cst_28 = arith.constant dense<0.000000e+00> : vector<800xf32>
    %54 = vector.multi_reduction <add>, %53, %cst_28 [0] : vector<2x800xf32> to vector<800xf32>
    %55 = vector.shape_cast %54 : vector<800xf32> to vector<1x800xf32>
    %56 = tpu.concatenate %52, %55 in 0 : vector<1x800xf32>, vector<1x800xf32> -> vector<2x800xf32>
    %cst_29 = arith.constant dense<0.000000e+00> : vector<2x8xf32>
    %57 = tpu.matmul %56, %47, %cst_29 {dimension_numbers = #tpu.dot_dimension_numbers<[1], [0], [0], [1], [0, 0, 1, 1], [], []>} : vector<2x800xf32>, vector<800x8xf32>, vector<2x8xf32> -> vector<2x8xf32>
    %58 = vector.extract_strided_slice %57 {offsets = [0, 0], sizes = [1, 8], strides = [1, 1]} : vector<2x8xf32> to vector<1x8xf32>
    %cst_30 = arith.constant 5.000000e-03 : f32
    %59 = vector.broadcast %cst_30 : f32 to vector<1x8xf32>
    %60 = arith.mulf %58, %59 : vector<1x8xf32>
    %61 = vector.extract_strided_slice %57 {offsets = [1, 0], sizes = [1, 8], strides = [1, 1]} : vector<2x8xf32> to vector<1x8xf32>
    %cst_31 = arith.constant 5.000000e-03 : f32
    %62 = vector.broadcast %cst_31 : f32 to vector<1x8xf32>
    %63 = arith.mulf %61, %62 : vector<1x8xf32>
    %64 = arith.mulf %60, %60 : vector<1x8xf32>
    %65 = arith.subf %63, %64 : vector<1x8xf32>
    %cst_32 = arith.constant 0.000000e+00 : f32
    %66 = vector.broadcast %cst_32 : f32 to vector<1x8xf32>
    %67 = arith.maximumf %65, %66 : vector<1x8xf32>
    %cst_33 = arith.constant 9.99999974E-6 : f32
    %68 = vector.broadcast %cst_33 : f32 to vector<1x8xf32>
    %69 = arith.addf %67, %68 : vector<1x8xf32>
    %70 = math.rsqrt %69 : vector<1x8xf32>
    %71 = arith.mulf %49, %70 : vector<1x8xf32>
    %72 = arith.mulf %60, %71 : vector<1x8xf32>
    %73 = arith.subf %50, %72 : vector<1x8xf32>
    %74 = tpu.concatenate %71, %73 in 0 : vector<1x8xf32>, vector<1x8xf32> -> vector<2x8xf32>
    %cst_34 = arith.constant dense<0.000000e+00> : vector<2x800xf32>
    %75 = tpu.matmul %74, %48, %cst_34 {dimension_numbers = #tpu.dot_dimension_numbers<[1], [0], [0], [1], [0, 0, 1, 1], [], []>} : vector<2x8xf32>, vector<8x800xf32>, vector<2x800xf32> -> vector<2x800xf32>
    %76 = vector.extract_strided_slice %75 {offsets = [0, 0], sizes = [1, 800], strides = [1, 1]} : vector<2x800xf32> to vector<1x800xf32>
    %77 = vector.broadcast %76 : vector<1x800xf32> to vector<2x800xf32>
    %78 = arith.mulf %46, %77 : vector<2x800xf32>
    %79 = vector.extract_strided_slice %75 {offsets = [1, 0], sizes = [1, 800], strides = [1, 1]} : vector<2x800xf32> to vector<1x800xf32>
    %80 = vector.broadcast %79 : vector<1x800xf32> to vector<2x800xf32>
    %81 = arith.addf %78, %80 : vector<2x800xf32>
    %cst_35 = arith.constant 0.000000e+00 : f32
    %82 = vector.broadcast %cst_35 : f32 to vector<2x800xf32>
    %83 = arith.maximumf %81, %82 : vector<2x800xf32>
    %c0_i32_36 = arith.constant 0 : i32
    %84 = tpu.memref_slice %arg11[%c0_i32_36] : memref<2x!tpu.dma_semaphore, #tpu.memory_space<semaphore_mem>> -> memref<1x!tpu.dma_semaphore, #tpu.memory_space<semaphore_mem>>
    %85 = tpu.memref_squeeze %84 : memref<1x!tpu.dma_semaphore, #tpu.memory_space<semaphore_mem>> -> memref<!tpu.dma_semaphore, #tpu.memory_space<semaphore_mem>>
    tpu.wait_dma2 semaphore(%85 : memref<!tpu.dma_semaphore, #tpu.memory_space<semaphore_mem>>) src(%arg3 : memref<800x676xbf16, #tpu.memory_space<any>>) dst(%arg9 : memref<800x676xbf16, #tpu.memory_space<vmem>>)
    %c0_37 = arith.constant 0 : index
    %c0_38 = arith.constant 0 : index
    %86 = vector.load %arg9[%c0_37, %c0_38] : memref<800x676xbf16, #tpu.memory_space<vmem>>, vector<800x676xbf16>
    %87 = arith.truncf %83 : vector<2x800xf32> to vector<2x800xbf16>
    %cst_39 = arith.constant dense<0.000000e+00> : vector<2x676xf32>
    %88 = tpu.matmul %87, %86, %cst_39 {dimension_numbers = #tpu.dot_dimension_numbers<[1], [0], [0], [1], [0, 0, 1, 1], [], []>} : vector<2x800xbf16>, vector<800x676xbf16>, vector<2x676xf32> -> vector<2x676xf32>
    %c1056 = arith.constant 1056 : index
    %c0_40 = arith.constant 0 : index
    %89 = vector.load %arg5[%c1056, %c0_40] : memref<1736x16xf32, #tpu.memory_space<vmem>>, vector<676x4xf32>
    %c0_41 = arith.constant 0 : index
    %c1152 = arith.constant 1152 : index
    %90 = vector.load %arg6[%c0_41, %c1152] : memref<16x1920xf32, #tpu.memory_space<vmem>>, vector<4x676xf32>
    %c4 = arith.constant 4 : index
    %c0_42 = arith.constant 0 : index
    %91 = vector.load %arg7[%c4, %c0_42] : memref<6x16xf32, #tpu.memory_space<vmem>>, vector<1x4xf32>
    %c5 = arith.constant 5 : index
    %c0_43 = arith.constant 0 : index
    %92 = vector.load %arg7[%c5, %c0_43] : memref<6x16xf32, #tpu.memory_space<vmem>>, vector<1x4xf32>
    %cst_44 = arith.constant dense<0.000000e+00> : vector<676xf32>
    %93 = vector.multi_reduction <add>, %88, %cst_44 [0] : vector<2x676xf32> to vector<676xf32>
    %94 = vector.shape_cast %93 : vector<676xf32> to vector<1x676xf32>
    %95 = arith.mulf %88, %88 : vector<2x676xf32>
    %cst_45 = arith.constant dense<0.000000e+00> : vector<676xf32>
    %96 = vector.multi_reduction <add>, %95, %cst_45 [0] : vector<2x676xf32> to vector<676xf32>
    %97 = vector.shape_cast %96 : vector<676xf32> to vector<1x676xf32>
    %98 = tpu.concatenate %94, %97 in 0 : vector<1x676xf32>, vector<1x676xf32> -> vector<2x676xf32>
    %cst_46 = arith.constant dense<0.000000e+00> : vector<2x4xf32>
    %99 = tpu.matmul %98, %89, %cst_46 {dimension_numbers = #tpu.dot_dimension_numbers<[1], [0], [0], [1], [0, 0, 1, 1], [], []>} : vector<2x676xf32>, vector<676x4xf32>, vector<2x4xf32> -> vector<2x4xf32>
    %100 = vector.extract_strided_slice %99 {offsets = [0, 0], sizes = [1, 4], strides = [1, 1]} : vector<2x4xf32> to vector<1x4xf32>
    %cst_47 = arith.constant 2.958580e-03 : f32
    %101 = vector.broadcast %cst_47 : f32 to vector<1x4xf32>
    %102 = arith.mulf %100, %101 : vector<1x4xf32>
    %103 = vector.extract_strided_slice %99 {offsets = [1, 0], sizes = [1, 4], strides = [1, 1]} : vector<2x4xf32> to vector<1x4xf32>
    %cst_48 = arith.constant 2.958580e-03 : f32
    %104 = vector.broadcast %cst_48 : f32 to vector<1x4xf32>
    %105 = arith.mulf %103, %104 : vector<1x4xf32>
    %106 = arith.mulf %102, %102 : vector<1x4xf32>
    %107 = arith.subf %105, %106 : vector<1x4xf32>
    %cst_49 = arith.constant 0.000000e+00 : f32
    %108 = vector.broadcast %cst_49 : f32 to vector<1x4xf32>
    %109 = arith.maximumf %107, %108 : vector<1x4xf32>
    %cst_50 = arith.constant 9.99999974E-6 : f32
    %110 = vector.broadcast %cst_50 : f32 to vector<1x4xf32>
    %111 = arith.addf %109, %110 : vector<1x4xf32>
    %112 = math.rsqrt %111 : vector<1x4xf32>
    %113 = arith.mulf %91, %112 : vector<1x4xf32>
    %114 = arith.mulf %102, %113 : vector<1x4xf32>
    %115 = arith.subf %92, %114 : vector<1x4xf32>
    %116 = tpu.concatenate %113, %115 in 0 : vector<1x4xf32>, vector<1x4xf32> -> vector<2x4xf32>
    %cst_51 = arith.constant dense<0.000000e+00> : vector<2x676xf32>
    %117 = tpu.matmul %116, %90, %cst_51 {dimension_numbers = #tpu.dot_dimension_numbers<[1], [0], [0], [1], [0, 0, 1, 1], [], []>} : vector<2x4xf32>, vector<4x676xf32>, vector<2x676xf32> -> vector<2x676xf32>
    %118 = vector.extract_strided_slice %117 {offsets = [0, 0], sizes = [1, 676], strides = [1, 1]} : vector<2x676xf32> to vector<1x676xf32>
    %119 = vector.broadcast %118 : vector<1x676xf32> to vector<2x676xf32>
    %120 = arith.mulf %88, %119 : vector<2x676xf32>
    %121 = vector.extract_strided_slice %117 {offsets = [1, 0], sizes = [1, 676], strides = [1, 1]} : vector<2x676xf32> to vector<1x676xf32>
    %122 = vector.broadcast %121 : vector<1x676xf32> to vector<2x676xf32>
    %123 = arith.addf %120, %122 : vector<2x676xf32>
    %c1_i32_52 = arith.constant 1 : i32
    %124 = tpu.memref_slice %arg11[%c1_i32_52] : memref<2x!tpu.dma_semaphore, #tpu.memory_space<semaphore_mem>> -> memref<1x!tpu.dma_semaphore, #tpu.memory_space<semaphore_mem>>
    %125 = tpu.memref_squeeze %124 : memref<1x!tpu.dma_semaphore, #tpu.memory_space<semaphore_mem>> -> memref<!tpu.dma_semaphore, #tpu.memory_space<semaphore_mem>>
    tpu.wait_dma2 semaphore(%125 : memref<!tpu.dma_semaphore, #tpu.memory_space<semaphore_mem>>) src(%arg4 : memref<676x256xbf16, #tpu.memory_space<any>>) dst(%arg10 : memref<676x256xbf16, #tpu.memory_space<vmem>>)
    %c0_53 = arith.constant 0 : index
    %c0_54 = arith.constant 0 : index
    %126 = vector.load %arg10[%c0_53, %c0_54] : memref<676x256xbf16, #tpu.memory_space<vmem>>, vector<676x256xbf16>
    %127 = arith.truncf %123 : vector<2x676xf32> to vector<2x676xbf16>
    %cst_55 = arith.constant dense<0.000000e+00> : vector<2x256xf32>
    %128 = tpu.matmul %127, %126, %cst_55 {dimension_numbers = #tpu.dot_dimension_numbers<[1], [0], [0], [1], [0, 0, 1, 1], [], []>} : vector<2x676xbf16>, vector<676x256xbf16>, vector<2x256xf32> -> vector<2x256xf32>
    %cst_56 = arith.constant 0.000000e+00 : f32
    %129 = vector.broadcast %cst_56 : f32 to vector<2x256xf32>
    %130 = arith.maximumf %128, %129 : vector<2x256xf32>
    %131 = math.tanh %130 : vector<2x256xf32>
    %c0_57 = arith.constant 0 : index
    %c0_58 = arith.constant 0 : index
    %132 = vector.load %arg8[%c0_57, %c0_58] : memref<2x256xf32, #tpu.memory_space<vmem>>, vector<2x256xf32>
    tpu.vector_store %arg8[%c0_57, %c0_58], %131 {strides = array<i32>} : memref<2x256xf32, #tpu.memory_space<vmem>>, vector<2x256xf32>,
    return
  }
}

</mosaic_0001>

<bundles_post_ra>
// kernel: generator_forward.1
= control target key start
LH: loop header
LB: loop body
LE: loop exit
PB: predicated region body
PF: predicated region fallthrough
CT: control target
= control target key end

     0   :  { %s13867_s0 = inlined_call_operand.vmem [shape: bf16[2,10], index: 0, kind: input, shape index: {}]   ;;  %s13868_s1 = inlined_call_operand.vmem [shape: bf16[10,256], index: 1, kind: input, shape index: {}]   ;;  %s13869_s2 = inlined_call_operand.vmem [shape: bf16[256,800], index: 2, kind: input, shape index: {}]   ;;  %s13870_s3 = inlined_call_operand.vmem [shape: bf16[800,676], index: 3, kind: input, shape index: {}]   ;;  %s13871_s4 = inlined_call_operand.vmem [shape: bf16[676,256], index: 4, kind: input, shape index: {}]   ;;  %s13872_s5 = inlined_call_operand.vmem [shape: f32[1736,16], index: 5, kind: input, shape index: {}]   ;;  %s13873_s6 = inlined_call_operand.vmem [shape: f32[16,1920], index: 6, kind: input, shape index: {}]   ;;  %s13874_s7 = inlined_call_operand.vmem [shape: f32[6,16], index: 7, kind: input, shape index: {}]   ;;  %s13875_s8 = inlined_call_operand.vmem [shape: f32[2,256], index: 8, kind: output, shape index: {}]  }
   0x1   :  { %v43_v0 = vld [vmem:[%s13870_s3] sm:$0xf]  ;;  %v45_v1 = vld [vmem:[%s13870_s3 + $0x18] sm:$0xf]  ;;  %v47_v2 = vld [vmem:[%s13870_s3 + $0x4] sm:$0xf] }
   0x2   :  { %44 = vst [vmem:[#allocation2] sm:$0xf] %v43_v0  ;;  %46 = vst [vmem:[#allocation2 + $0x4] sm:$0xf] %v45_v1  ;;  %v49_v3 = vld [vmem:[%s13870_s3 + $0x1c] sm:$0xf] }
   0x3   :  { %48 = vst [vmem:[#allocation2 + $0x8] sm:$0xf] %v47_v2  ;;  %v51_v4 = vld [vmem:[%s13870_s3 + $0x8] sm:$0xf]  ;;  %v53_v5 = vld [vmem:[%s13870_s3 + $0x20] sm:$0xf] }
   0x4   :  { %50 = vst [vmem:[#allocation2 + $0xc] sm:$0xf] %v49_v3  ;;  %52 = vst [vmem:[#allocation2 + $0x10] sm:$0xf] %v51_v4  ;;  %v55_v6 = vld [vmem:[%s13870_s3 + $0xc] sm:$0xf] }
   0x5   :  { %54 = vst [vmem:[#allocation2 + $0x14] sm:$0xf] %v53_v5  ;;  %v57_v7 = vld [vmem:[%s13870_s3 + $0x24] sm:$0xf]  ;;  %v59_v8 = vld [vmem:[%s13870_s3 + $0x10] sm:$0xf] }
   0x6   :  { %56 = vst [vmem:[#allocation2 + $0x18] sm:$0xf] %v55_v6  ;;  %58 = vst [vmem:[#allocation2 + $0x1c] sm:$0xf] %v57_v7  ;;  %v61_v9 = vld [vmem:[%s13870_s3 + $0x28] sm:$0xf] }
   0x7   :  { %60 = vst [vmem:[#allocation2 + $0x20] sm:$0xf] %v59_v8  ;;  %v63_v10 = vld [vmem:[%s13870_s3 + $0x14] sm:$0xf]  ;;  %v65_v11 = vld [vmem:[%s13870_s3 + $0x2c] sm:$0xff]   ;;  %v89_v22 = vld [vmem:[%s13870_s3 + $0x5c] sm:$0xff]  }
   0x8   :  { %62 = vst [vmem:[#allocation2 + $0x24] sm:$0xf] %v61_v9  ;;  %64 = vst [vmem:[#allocation2 + $0x28] sm:$0xf] %v63_v10  ;;  %v69_v12 = vld [vmem:[%s13870_s3 + $0x48] sm:$0xf] }
   0x9   :  { %66 = vst [vmem:[#allocation2 + $0x2c] sm:$0xff] %v65_v11   ;;  %v71_v13 = vld [vmem:[%s13870_s3 + $0x34] sm:$0xf]  ;;  %v73_v14 = vld [vmem:[%s13870_s3 + $0x4c] sm:$0xf]  ;;  %90 = vst [vmem:[#allocation2 + $0x5c] sm:$0xff] %v89_v22  }
   0xa   :  { %70 = vst [vmem:[#allocation2 + $0x34] sm:$0xf] %v69_v12  ;;  %72 = vst [vmem:[#allocation2 + $0x38] sm:$0xf] %v71_v13  ;;  %v75_v15 = vld [vmem:[%s13870_s3 + $0x38] sm:$0xf] }
   0xb   :  { %74 = vst [vmem:[#allocation2 + $0x3c] sm:$0xf] %v73_v14  ;;  %v77_v16 = vld [vmem:[%s13870_s3 + $0x50] sm:$0xf]  ;;  %v79_v17 = vld [vmem:[%s13870_s3 + $0x3c] sm:$0xf] }
   0xc   :  { %76 = vst [vmem:[#allocation2 + $0x40] sm:$0xf] %v75_v15  ;;  %78 = vst [vmem:[#allocation2 + $0x44] sm:$0xf] %v77_v16  ;;  %v81_v18 = vld [vmem:[%s13870_s3 + $0x54] sm:$0xf] }
   0xd   :  { %80 = vst [vmem:[#allocation2 + $0x48] sm:$0xf] %v79_v17  ;;  %v83_v19 = vld [vmem:[%s13870_s3 + $0x40] sm:$0xf]  ;;  %v85_v20 = vld [vmem:[%s13870_s3 + $0x58] sm:$0xf] }
   0xe   :  { %82 = vst [vmem:[#allocation2 + $0x4c] sm:$0xf] %v81_v18  ;;  %84 = vst [vmem:[#allocation2 + $0x50] sm:$0xf] %v83_v19  ;;  %v87_v21 = vld [vmem:[%s13870_s3 + $0x44] sm:$0xf] }
   0xf   :  { %86 = vst [vmem:[#allocation2 + $0x54] sm:$0xf] %v85_v20  ;;  %v93_v23 = vld [vmem:[%s13870_s3 + $0x78] sm:$0xf]  ;;  %88 = vst [vmem:[#allocation2 + $0x58] sm:$0xf] %v87_v21 }
  0x10   :  { %94 = vst [vmem:[#allocation2 + $0x64] sm:$0xf] %v93_v23  ;;  %v95_v24 = vld [vmem:[%s13870_s3 + $0x64] sm:$0xf]  ;;  %v97_v25 = vld [vmem:[%s13870_s3 + $0x7c] sm:$0xf] }
  0x11   :  { %v99_v26 = vld [vmem:[%s13870_s3 + $0x68] sm:$0xf]  ;;  %96 = vst [vmem:[#allocation2 + $0x68] sm:$0xf] %v95_v24  ;;  %98 = vst [vmem:[#allocation2 + $0x6c] sm:$0xf] %v97_v25 }
  0x12   :  { %100 = vst [vmem:[#allocation2 + $0x70] sm:$0xf] %v99_v26  ;;  %v101_v27 = vld [vmem:[%s13870_s3 + $0x80] sm:$0xf]  ;;  %v103_v28 = vld [vmem:[%s13870_s3 + $0x6c] sm:$0xf] }
  0x13   :  { %v105_v29 = vld [vmem:[%s13870_s3 + $0x84] sm:$0xf]  ;;  %102 = vst [vmem:[#allocation2 + $0x74] sm:$0xf] %v101_v27  ;;  %104 = vst [vmem:[#allocation2 + $0x78] sm:$0xf] %v103_v28 }
  0x14   :  { %106 = vst [vmem:[#allocation2 + $0x7c] sm:$0xf] %v105_v29  ;;  %v107_v30 = vld [vmem:[%s13870_s3 + $0x70] sm:$0xf]  ;;  %v109_v31 = vld [vmem:[%s13870_s3 + $0x88] sm:$0xf] }
  0x15   :  { %v111_v32 = vld [vmem:[%s13870_s3 + $0x74] sm:$0xf]  ;;  %108 = vst [vmem:[#allocation2 + $0x80] sm:$0xf] %v107_v30  ;;  %110 = vst [vmem:[#allocation2 + $0x84] sm:$0xf] %v109_v31 }
  0x16   :  { %112 = vst [vmem:[#allocation2 + $0x88] sm:$0xf] %v111_v32  ;;  %v113_v33 = vld [vmem:[%s13870_s3 + $0x8c] sm:$0xff]   ;;  %v117_v34 = vld [vmem:[%s13870_s3 + $0xa8] sm:$0xf]  ;;  %v137_v44 = vld [vmem:[%s13870_s3 + $0xbc] sm:$0xff]  }
  0x17   :  { %v119_v35 = vld [vmem:[%s13870_s3 + $0x94] sm:$0xf]  ;;  %114 = vst [vmem:[#allocation2 + $0x8c] sm:$0xff] %v113_v33   ;;  %118 = vst [vmem:[#allocation2 + $0x94] sm:$0xf] %v117_v34  ;;  %v161_v55 = vld [vmem:[%s13870_s3 + $0xec] sm:$0xff]  }
  0x18   :  { %120 = vst [vmem:[#allocation2 + $0x98] sm:$0xf] %v119_v35  ;;  %v121_v36 = vld [vmem:[%s13870_s3 + $0xac] sm:$0xf]  ;;  %v123_v37 = vld [vmem:[%s13870_s3 + $0x98] sm:$0xf] }
  0x19   :  { %v125_v38 = vld [vmem:[%s13870_s3 + $0xb0] sm:$0xf]  ;;  %122 = vst [vmem:[#allocation2 + $0x9c] sm:$0xf] %v121_v36  ;;  %124 = vst [vmem:[#allocation2 + $0xa0] sm:$0xf] %v123_v37 }
  0x1a   :  { %126 = vst [vmem:[#allocation2 + $0xa4] sm:$0xf] %v125_v38  ;;  %v127_v39 = vld [vmem:[%s13870_s3 + $0x9c] sm:$0xf]  ;;  %v129_v40 = vld [vmem:[%s13870_s3 + $0xb4] sm:$0xf] }
  0x1b   :  { %v131_v41 = vld [vmem:[%s13870_s3 + $0xa0] sm:$0xf]  ;;  %128 = vst [vmem:[#allocation2 + $0xa8] sm:$0xf] %v127_v39  ;;  %130 = vst [vmem:[#allocation2 + $0xac] sm:$0xf] %v129_v40 }
  0x1c   :  { %132 = vst [vmem:[#allocation2 + $0xb0] sm:$0xf] %v131_v41  ;;  %v133_v42 = vld [vmem:[%s13870_s3 + $0xb8] sm:$0xf]  ;;  %v135_v43 = vld [vmem:[%s13870_s3 + $0xa4] sm:$0xf] }
  0x1d   :  { %134 = vst [vmem:[#allocation2 + $0xb4] sm:$0xf] %v133_v42  ;;  %136 = vst [vmem:[#allocation2 + $0xb8] sm:$0xf] %v135_v43  ;;  %v141_v45 = vld [vmem:[%s13870_s3 + $0xd8] sm:$0xf] }
  0x1e   :  { %138 = vst [vmem:[#allocation2 + $0xbc] sm:$0xff] %v137_v44   ;;  %v143_v46 = vld [vmem:[%s13870_s3 + $0xc4] sm:$0xf]  ;;  %v145_v47 = vld [vmem:[%s13870_s3 + $0xdc] sm:$0xf]  ;;  %162 = vst [vmem:[#allocation2 + $0xec] sm:$0xff] %v161_v55  }
  0x1f   :  { %142 = vst [vmem:[#allocation2 + $0xc4] sm:$0xf] %v141_v45  ;;  %144 = vst [vmem:[#allocation2 + $0xc8] sm:$0xf] %v143_v46  ;;  %v147_v48 = vld [vmem:[%s13870_s3 + $0xc8] sm:$0xf] }
  0x20   :  { %146 = vst [vmem:[#allocation2 + $0xcc] sm:$0xf] %v145_v47  ;;  %v149_v49 = vld [vmem:[%s13870_s3 + $0xe0] sm:$0xf]  ;;  %v151_v50 = vld [vmem:[%s13870_s3 + $0xcc] sm:$0xf] }
  0x21   :  { %148 = vst [vmem:[#allocation2 + $0xd0] sm:$0xf] %v147_v48  ;;  %150 = vst [vmem:[#allocation2 + $0xd4] sm:$0xf] %v149_v49  ;;  %v153_v51 = vld [vmem:[%s13870_s3 + $0xe4] sm:$0xf] }
  0x22   :  { %152 = vst [vmem:[#allocation2 + $0xd8] sm:$0xf] %v151_v50  ;;  %v155_v52 = vld [vmem:[%s13870_s3 + $0xd0] sm:$0xf]  ;;  %v157_v53 = vld [vmem:[%s13870_s3 + $0xe8] sm:$0xf] }
  0x23   :  { %154 = vst [vmem:[#allocation2 + $0xdc] sm:$0xf] %v153_v51  ;;  %156 = vst [vmem:[#allocation2 + $0xe0] sm:$0xf] %v155_v52  ;;  %v159_v54 = vld [vmem:[%s13870_s3 + $0xd4] sm:$0xf] }
  0x24   :  { %158 = vst [vmem:[#allocation2 + $0xe4] sm:$0xf] %v157_v53  ;;  %v165_v56 = vld [vmem:[%s13870_s3 + $0x108] sm:$0xf]  ;;  %160 = vst [vmem:[#allocation2 + $0xe8] sm:$0xf] %v159_v54 }
  0x25   :  { %166 = vst [vmem:[#allocation2 + $0xf4] sm:$0xf] %v165_v56  ;;  %v167_v57 = vld [vmem:[%s13870_s3 + $0xf4] sm:$0xf]  ;;  %v169_v58 = vld [vmem:[%s13870_s3 + $0x10c] sm:$0xf] }
  0x26   :  { %v171_v59 = vld [vmem:[%s13870_s3 + $0xf8] sm:$0xf]  ;;  %168 = vst [vmem:[#allocation2 + $0xf8] sm:$0xf] %v167_v57  ;;  %170 = vst [vmem:[#allocation2 + $0xfc] sm:$0xf] %v169_v58 }
  0x27   :  { %172 = vst [vmem:[#allocation2 + $0x100] sm:$0xf] %v171_v59  ;;  %v173_v60 = vld [vmem:[%s13870_s3 + $0x110] sm:$0xf]  ;;  %v175_v61 = vld [vmem:[%s13870_s3 + $0xfc] sm:$0xf] }
  0x28   :  { %v177_v62 = vld [vmem:[%s13870_s3 + $0x114] sm:$0xf]  ;;  %174 = vst [vmem:[#allocation2 + $0x104] sm:$0xf] %v173_v60  ;;  %176 = vst [vmem:[#allocation2 + $0x108] sm:$0xf] %v175_v61 }
  0x29   :  { %178 = vst [vmem:[#allocation2 + $0x10c] sm:$0xf] %v177_v62  ;;  %v179_v63 = vld [vmem:[%s13870_s3 + $0x100] sm:$0xf]  ;;  %v181_v0 = vld [vmem:[%s13870_s3 + $0x118] sm:$0xf] }
  0x2a   :  { %v183_v1 = vld [vmem:[%s13870_s3 + $0x104] sm:$0xf]  ;;  %180 = vst [vmem:[#allocation2 + $0x110] sm:$0xf] %v179_v63  ;;  %182 = vst [vmem:[#allocation2 + $0x114] sm:$0xf] %v181_v0 }
  0x2b   :  { %184 = vst [vmem:[#allocation2 + $0x118] sm:$0xf] %v183_v1  ;;  %v185_v2 = vld [vmem:[%s13870_s3 + $0x11c] sm:$0xff]   ;;  %v189_v3 = vld [vmem:[%s13870_s3 + $0x138] sm:$0xf]  ;;  %v209_v13 = vld [vmem:[%s13870_s3 + $0x14c] sm:$0xff]  }
  0x2c   :  { %v191_v4 = vld [vmem:[%s13870_s3 + $0x124] sm:$0xf]  ;;  %186 = vst [vmem:[#allocation2 + $0x11c] sm:$0xff] %v185_v2   ;;  %190 = vst [vmem:[#allocation2 + $0x124] sm:$0xf] %v189_v3  ;;  %v233_v24 = vld [vmem:[%s13870_s3 + $0x17c] sm:$0xff]  }
  0x2d   :  { %192 = vst [vmem:[#allocation2 + $0x128] sm:$0xf] %v191_v4  ;;  %v193_v5 = vld [vmem:[%s13870_s3 + $0x13c] sm:$0xf]  ;;  %v195_v6 = vld [vmem:[%s13870_s3 + $0x128] sm:$0xf] }
  0x2e   :  { %v197_v7 = vld [vmem:[%s13870_s3 + $0x140] sm:$0xf]  ;;  %194 = vst [vmem:[#allocation2 + $0x12c] sm:$0xf] %v193_v5  ;;  %196 = vst [vmem:[#allocation2 + $0x130] sm:$0xf] %v195_v6 }
  0x2f   :  { %198 = vst [vmem:[#allocation2 + $0x134] sm:$0xf] %v197_v7  ;;  %v199_v8 = vld [vmem:[%s13870_s3 + $0x12c] sm:$0xf]  ;;  %v201_v9 = vld [vmem:[%s13870_s3 + $0x144] sm:$0xf] }
  0x30   :  { %v203_v10 = vld [vmem:[%s13870_s3 + $0x130] sm:$0xf]  ;;  %200 = vst [vmem:[#allocation2 + $0x138] sm:$0xf] %v199_v8  ;;  %202 = vst [vmem:[#allocation2 + $0x13c] sm:$0xf] %v201_v9 }
  0x31   :  { %204 = vst [vmem:[#allocation2 + $0x140] sm:$0xf] %v203_v10  ;;  %v205_v11 = vld [vmem:[%s13870_s3 + $0x148] sm:$0xf]  ;;  %v207_v12 = vld [vmem:[%s13870_s3 + $0x134] sm:$0xf] }
  0x32   :  { %206 = vst [vmem:[#allocation2 + $0x144] sm:$0xf] %v205_v11  ;;  %208 = vst [vmem:[#allocation2 + $0x148] sm:$0xf] %v207_v12  ;;  %v213_v14 = vld [vmem:[%s13870_s3 + $0x168] sm:$0xf] }
  0x33   :  { %210 = vst [vmem:[#allocation2 + $0x14c] sm:$0xff] %v209_v13   ;;  %v215_v15 = vld [vmem:[%s13870_s3 + $0x154] sm:$0xf]  ;;  %v217_v16 = vld [vmem:[%s13870_s3 + $0x16c] sm:$0xf]  ;;  %234 = vst [vmem:[#allocation2 + $0x17c] sm:$0xff] %v233_v24  }
  0x34   :  { %214 = vst [vmem:[#allocation2 + $0x154] sm:$0xf] %v213_v14  ;;  %216 = vst [vmem:[#allocation2 + $0x158] sm:$0xf] %v215_v15  ;;  %v219_v17 = vld [vmem:[%s13870_s3 + $0x158] sm:$0xf] }
  0x35   :  { %218 = vst [vmem:[#allocation2 + $0x15c] sm:$0xf] %v217_v16  ;;  %v221_v18 = vld [vmem:[%s13870_s3 + $0x170] sm:$0xf]  ;;  %v223_v19 = vld [vmem:[%s13870_s3 + $0x15c] sm:$0xf] }
  0x36   :  { %220 = vst [vmem:[#allocation2 + $0x160] sm:$0xf] %v219_v17  ;;  %222 = vst [vmem:[#allocation2 + $0x164] sm:$0xf] %v221_v18  ;;  %v225_v20 = vld [vmem:[%s13870_s3 + $0x174] sm:$0xf] }
  0x37   :  { %224 = vst [vmem:[#allocation2 + $0x168] sm:$0xf] %v223_v19  ;;  %v227_v21 = vld [vmem:[%s13870_s3 + $0x160] sm:$0xf]  ;;  %v229_v22 = vld [vmem:[%s13870_s3 + $0x178] sm:$0xf] }
  0x38   :  { %226 = vst [vmem:[#allocation2 + $0x16c] sm:$0xf] %v225_v20  ;;  %228 = vst [vmem:[#allocation2 + $0x170] sm:$0xf] %v227_v21  ;;  %v231_v23 = vld [vmem:[%s13870_s3 + $0x164] sm:$0xf] }
  0x39   :  { %230 = vst [vmem:[#allocation2 + $0x174] sm:$0xf] %v229_v22  ;;  %v237_v25 = vld [vmem:[%s13870_s3 + $0x198] sm:$0xf]  ;;  %232 = vst [vmem:[#allocation2 + $0x178] sm:$0xf] %v231_v23 }
  0x3a   :  { %238 = vst [vmem:[#allocation2 + $0x184] sm:$0xf] %v237_v25  ;;  %v239_v26 = vld [vmem:[%s13870_s3 + $0x184] sm:$0xf]  ;;  %v241_v27 = vld [vmem:[%s13870_s3 + $0x19c] sm:$0xf] }
  0x3b   :  { %v243_v28 = vld [vmem:[%s13870_s3 + $0x188] sm:$0xf]  ;;  %240 = vst [vmem:[#allocation2 + $0x188] sm:$0xf] %v239_v26  ;;  %242 = vst [vmem:[#allocation2 + $0x18c] sm:$0xf] %v241_v27 }
  0x3c   :  { %244 = vst [vmem:[#allocation2 + $0x190] sm:$0xf] %v243_v28  ;;  %v245_v29 = vld [vmem:[%s13870_s3 + $0x1a0] sm:$0xf]  ;;  %v247_v30 = vld [vmem:[%s13870_s3 + $0x18c] sm:$0xf] }
  0x3d   :  { %v249_v31 = vld [vmem:[%s13870_s3 + $0x1a4] sm:$0xf]  ;;  %246 = vst [vmem:[#allocation2 + $0x194] sm:$0xf] %v245_v29  ;;  %248 = vst [vmem:[#allocation2 + $0x198] sm:$0xf] %v247_v30 }
  0x3e   :  { %250 = vst [vmem:[#allocation2 + $0x19c] sm:$0xf] %v249_v31  ;;  %v251_v32 = vld [vmem:[%s13870_s3 + $0x190] sm:$0xf]  ;;  %v253_v33 = vld [vmem:[%s13870_s3 + $0x1a8] sm:$0xf] }
  0x3f   :  { %v255_v34 = vld [vmem:[%s13870_s3 + $0x194] sm:$0xf]  ;;  %252 = vst [vmem:[#allocation2 + $0x1a0] sm:$0xf] %v251_v32  ;;  %254 = vst [vmem:[#allocation2 + $0x1a4] sm:$0xf] %v253_v33 }
  0x40   :  { %256 = vst [vmem:[#allocation2 + $0x1a8] sm:$0xf] %v255_v34  ;;  %v257_v35 = vld [vmem:[%s13870_s3 + $0x1ac] sm:$0xff]   ;;  %v261_v36 = vld [vmem:[%s13870_s3 + $0x1c8] sm:$0xf]  ;;  %v281_v46 = vld [vmem:[%s13870_s3 + $0x1dc] sm:$0xff]  }
  0x41   :  { %v263_v37 = vld [vmem:[%s13870_s3 + $0x1b4] sm:$0xf]  ;;  %258 = vst [vmem:[#allocation2 + $0x1ac] sm:$0xff] %v257_v35   ;;  %262 = vst [vmem:[#allocation2 + $0x1b4] sm:$0xf] %v261_v36  ;;  %v305_v57 = vld [vmem:[%s13870_s3 + $0x20c] sm:$0xff]  }
  0x42   :  { %264 = vst [vmem:[#allocation2 + $0x1b8] sm:$0xf] %v263_v37  ;;  %v265_v38 = vld [vmem:[%s13870_s3 + $0x1cc] sm:$0xf]  ;;  %v267_v39 = vld [vmem:[%s13870_s3 + $0x1b8] sm:$0xf] }
  0x43   :  { %v269_v40 = vld [vmem:[%s13870_s3 + $0x1d0] sm:$0xf]  ;;  %266 = vst [vmem:[#allocation2 + $0x1bc] sm:$0xf] %v265_v38  ;;  %268 = vst [vmem:[#allocation2 + $0x1c0] sm:$0xf] %v267_v39 }
  0x44   :  { %270 = vst [vmem:[#allocation2 + $0x1c4] sm:$0xf] %v269_v40  ;;  %v271_v41 = vld [vmem:[%s13870_s3 + $0x1bc] sm:$0xf]  ;;  %v273_v42 = vld [vmem:[%s13870_s3 + $0x1d4] sm:$0xf] }
  0x45   :  { %v275_v43 = vld [vmem:[%s13870_s3 + $0x1c0] sm:$0xf]  ;;  %272 = vst [vmem:[#allocation2 + $0x1c8] sm:$0xf] %v271_v41  ;;  %274 = vst [vmem:[#allocation2 + $0x1cc] sm:$0xf] %v273_v42 }
  0x46   :  { %276 = vst [vmem:[#allocation2 + $0x1d0] sm:$0xf] %v275_v43  ;;  %v277_v44 = vld [vmem:[%s13870_s3 + $0x1d8] sm:$0xf]  ;;  %v279_v45 = vld [vmem:[%s13870_s3 + $0x1c4] sm:$0xf] }
  0x47   :  { %278 = vst [vmem:[#allocation2 + $0x1d4] sm:$0xf] %v277_v44  ;;  %280 = vst [vmem:[#allocation2 + $0x1d8] sm:$0xf] %v279_v45  ;;  %v285_v47 = vld [vmem:[%s13870_s3 + $0x1f8] sm:$0xf] }
  0x48   :  { %282 = vst [vmem:[#allocation2 + $0x1dc] sm:$0xff] %v281_v46   ;;  %v287_v48 = vld [vmem:[%s13870_s3 + $0x1e4] sm:$0xf]  ;;  %v289_v49 = vld [vmem:[%s13870_s3 + $0x1fc] sm:$0xf]  ;;  %306 = vst [vmem:[#allocation2 + $0x20c] sm:$0xff] %v305_v57  }
  0x49   :  { %286 = vst [vmem:[#allocation2 + $0x1e4] sm:$0xf] %v285_v47  ;;  %288 = vst [vmem:[#allocation2 + $0x1e8] sm:$0xf] %v287_v48  ;;  %v291_v50 = vld [vmem:[%s13870_s3 + $0x1e8] sm:$0xf] }
  0x4a   :  { %290 = vst [vmem:[#allocation2 + $0x1ec] sm:$0xf] %v289_v49  ;;  %v293_v51 = vld [vmem:[%s13870_s3 + $0x200] sm:$0xf]  ;;  %v295_v52 = vld [vmem:[%s13870_s3 + $0x1ec] sm:$0xf] }
  0x4b   :  { %292 = vst [vmem:[#allocation2 + $0x1f0] sm:$0xf] %v291_v50  ;;  %294 = vst [vmem:[#allocation2 + $0x1f4] sm:$0xf] %v293_v51  ;;  %v297_v53 = vld [vmem:[%s13870_s3 + $0x204] sm:$0xf] }
  0x4c   :  { %296 = vst [vmem:[#allocation2 + $0x1f8] sm:$0xf] %v295_v52  ;;  %v299_v54 = vld [vmem:[%s13870_s3 + $0x1f0] sm:$0xf]  ;;  %v301_v55 = vld [vmem:[%s13870_s3 + $0x208] sm:$0xf] }
  0x4d   :  { %298 = vst [vmem:[#allocation2 + $0x1fc] sm:$0xf] %v297_v53  ;;  %300 = vst [vmem:[#allocation2 + $0x200] sm:$0xf] %v299_v54  ;;  %v303_v56 = vld [vmem:[%s13870_s3 + $0x1f4] sm:$0xf] }
  0x4e   :  { %302 = vst [vmem:[#allocation2 + $0x204] sm:$0xf] %v301_v55  ;;  %v309_v58 = vld [vmem:[%s13870_s3 + $0x228] sm:$0xf]  ;;  %304 = vst [vmem:[#allocation2 + $0x208] sm:$0xf] %v303_v56 }
  0x4f   :  { %310 = vst [vmem:[#allocation2 + $0x214] sm:$0xf] %v309_v58  ;;  %v311_v59 = vld [vmem:[%s13870_s3 + $0x214] sm:$0xf]  ;;  %v313_v60 = vld [vmem:[%s13870_s3 + $0x22c] sm:$0xf] }
  0x50   :  { %v315_v61 = vld [vmem:[%s13870_s3 + $0x218] sm:$0xf]  ;;  %312 = vst [vmem:[#allocation2 + $0x218] sm:$0xf] %v311_v59  ;;  %314 = vst [vmem:[#allocation2 + $0x21c] sm:$0xf] %v313_v60 }
  0x51   :  { %316 = vst [vmem:[#allocation2 + $0x220] sm:$0xf] %v315_v61  ;;  %v317_v62 = vld [vmem:[%s13870_s3 + $0x230] sm:$0xf]  ;;  %v319_v63 = vld [vmem:[%s13870_s3 + $0x21c] sm:$0xf] }
  0x52   :  { %v321_v0 = vld [vmem:[%s13870_s3 + $0x234] sm:$0xf]  ;;  %318 = vst [vmem:[#allocation2 + $0x224] sm:$0xf] %v317_v62  ;;  %320 = vst [vmem:[#allocation2 + $0x228] sm:$0xf] %v319_v63 }
  0x53   :  { %322 = vst [vmem:[#allocation2 + $0x22c] sm:$0xf] %v321_v0  ;;  %v323_v1 = vld [vmem:[%s13870_s3 + $0x220] sm:$0xf]  ;;  %v325_v2 = vld [vmem:[%s13870_s3 + $0x238] sm:$0xf] }
  0x54   :  { %v327_v3 = vld [vmem:[%s13870_s3 + $0x224] sm:$0xf]  ;;  %324 = vst [vmem:[#allocation2 + $0x230] sm:$0xf] %v323_v1  ;;  %326 = vst [vmem:[#allocation2 + $0x234] sm:$0xf] %v325_v2 }
  0x55   :  { %328 = vst [vmem:[#allocation2 + $0x238] sm:$0xf] %v327_v3  ;;  %v329_v4 = vld [vmem:[%s13870_s3 + $0x23c] sm:$0xff]   ;;  %v333_v5 = vld [vmem:[%s13870_s3 + $0x258] sm:$0xf]  ;;  %v353_v15 = vld [vmem:[%s13870_s3 + $0x26c] sm:$0xff]  }
  0x56   :  { %v335_v6 = vld [vmem:[%s13870_s3 + $0x244] sm:$0xf]  ;;  %330 = vst [vmem:[#allocation2 + $0x23c] sm:$0xff] %v329_v4   ;;  %334 = vst [vmem:[#allocation2 + $0x244] sm:$0xf] %v333_v5  ;;  %v377_v26 = vld [vmem:[%s13870_s3 + $0x29c] sm:$0xff]  }
  0x57   :  { %336 = vst [vmem:[#allocation2 + $0x248] sm:$0xf] %v335_v6  ;;  %v337_v7 = vld [vmem:[%s13870_s3 + $0x25c] sm:$0xf]  ;;  %v339_v8 = vld [vmem:[%s13870_s3 + $0x248] sm:$0xf] }
  0x58   :  { %v341_v9 = vld [vmem:[%s13870_s3 + $0x260] sm:$0xf]  ;;  %338 = vst [vmem:[#allocation2 + $0x24c] sm:$0xf] %v337_v7  ;;  %340 = vst [vmem:[#allocation2 + $0x250] sm:$0xf] %v339_v8 }
  0x59   :  { %342 = vst [vmem:[#allocation2 + $0x254] sm:$0xf] %v341_v9  ;;  %v343_v10 = vld [vmem:[%s13870_s3 + $0x24c] sm:$0xf]  ;;  %v345_v11 = vld [vmem:[%s13870_s3 + $0x264] sm:$0xf] }
  0x5a   :  { %v347_v12 = vld [vmem:[%s13870_s3 + $0x250] sm:$0xf]  ;;  %344 = vst [vmem:[#allocation2 + $0x258] sm:$0xf] %v343_v10  ;;  %346 = vst [vmem:[#allocation2 + $0x25c] sm:$0xf] %v345_v11 }
  0x5b   :  { %348 = vst [vmem:[#allocation2 + $0x260] sm:$0xf] %v347_v12  ;;  %v349_v13 = vld [vmem:[%s13870_s3 + $0x268] sm:$0xf]  ;;  %v351_v14 = vld [vmem:[%s13870_s3 + $0x254] sm:$0xf] }
  0x5c   :  { %350 = vst [vmem:[#allocation2 + $0x264] sm:$0xf] %v349_v13  ;;  %352 = vst [vmem:[#allocation2 + $0x268] sm:$0xf] %v351_v14  ;;  %v357_v16 = vld [vmem:[%s13870_s3 + $0x288] sm:$0xf] }
  0x5d   :  { %354 = vst [vmem:[#allocation2 + $0x26c] sm:$0xff] %v353_v15   ;;  %v359_v17 = vld [vmem:[%s13870_s3 + $0x274] sm:$0xf]  ;;  %v361_v18 = vld [vmem:[%s13870_s3 + $0x28c] sm:$0xf]  ;;  %378 = vst [vmem:[#allocation2 + $0x29c] sm:$0xff] %v377_v26  }
  0x5e   :  { %358 = vst [vmem:[#allocation2 + $0x274] sm:$0xf] %v357_v16  ;;  %360 = vst [vmem:[#allocation2 + $0x278] sm:$0xf] %v359_v17  ;;  %v363_v19 = vld [vmem:[%s13870_s3 + $0x278] sm:$0xf] }
  0x5f   :  { %362 = vst [vmem:[#allocation2 + $0x27c] sm:$0xf] %v361_v18  ;;  %v365_v20 = vld [vmem:[%s13870_s3 + $0x290] sm:$0xf]  ;;  %v367_v21 = vld [vmem:[%s13870_s3 + $0x27c] sm:$0xf] }
  0x60   :  { %364 = vst [vmem:[#allocation2 + $0x280] sm:$0xf] %v363_v19  ;;  %366 = vst [vmem:[#allocation2 + $0x284] sm:$0xf] %v365_v20  ;;  %v369_v22 = vld [vmem:[%s13870_s3 + $0x294] sm:$0xf] }
  0x61   :  { %368 = vst [vmem:[#allocation2 + $0x288] sm:$0xf] %v367_v21  ;;  %v371_v23 = vld [vmem:[%s13870_s3 + $0x280] sm:$0xf]  ;;  %v373_v24 = vld [vmem:[%s13870_s3 + $0x298] sm:$0xf] }
  0x62   :  { %370 = vst [vmem:[#allocation2 + $0x28c] sm:$0xf] %v369_v22  ;;  %372 = vst [vmem:[#allocation2 + $0x290] sm:$0xf] %v371_v23  ;;  %v375_v25 = vld [vmem:[%s13870_s3 + $0x284] sm:$0xf] }
  0x63   :  { %374 = vst [vmem:[#allocation2 + $0x294] sm:$0xf] %v373_v24  ;;  %v381_v27 = vld [vmem:[%s13870_s3 + $0x2b8] sm:$0xf]  ;;  %376 = vst [vmem:[#allocation2 + $0x298] sm:$0xf] %v375_v25 }
  0x64   :  { %382 = vst [vmem:[#allocation2 + $0x2a4] sm:$0xf] %v381_v27  ;;  %v383_v28 = vld [vmem:[%s13870_s3 + $0x2a4] sm:$0xf]  ;;  %v385_v29 = vld [vmem:[%s13870_s3 + $0x2bc] sm:$0xf] }
  0x65   :  { %v387_v30 = vld [vmem:[%s13870_s3 + $0x2a8] sm:$0xf]  ;;  %384 = vst [vmem:[#allocation2 + $0x2a8] sm:$0xf] %v383_v28  ;;  %386 = vst [vmem:[#allocation2 + $0x2ac] sm:$0xf] %v385_v29 }
  0x66   :  { %388 = vst [vmem:[#allocation2 + $0x2b0] sm:$0xf] %v387_v30  ;;  %v389_v31 = vld [vmem:[%s13870_s3 + $0x2c0] sm:$0xf]  ;;  %v391_v32 = vld [vmem:[%s13870_s3 + $0x2ac] sm:$0xf] }
  0x67   :  { %v393_v33 = vld [vmem:[%s13870_s3 + $0x2c4] sm:$0xf]  ;;  %390 = vst [vmem:[#allocation2 + $0x2b4] sm:$0xf] %v389_v31  ;;  %392 = vst [vmem:[#allocation2 + $0x2b8] sm:$0xf] %v391_v32 }
  0x68   :  { %394 = vst [vmem:[#allocation2 + $0x2bc] sm:$0xf] %v393_v33  ;;  %v395_v34 = vld [vmem:[%s13870_s3 + $0x2b0] sm:$0xf]  ;;  %v397_v35 = vld [vmem:[%s13870_s3 + $0x2c8] sm:$0xf] }
  0x69   :  { %v399_v36 = vld [vmem:[%s13870_s3 + $0x2b4] sm:$0xf]  ;;  %396 = vst [vmem:[#allocation2 + $0x2c0] sm:$0xf] %v395_v34  ;;  %398 = vst [vmem:[#allocation2 + $0x2c4] sm:$0xf] %v397_v35 }
  0x6a   :  { %400 = vst [vmem:[#allocation2 + $0x2c8] sm:$0xf] %v399_v36  ;;  %v401_v37 = vld [vmem:[%s13870_s3 + $0x2cc] sm:$0xff]   ;;  %v405_v38 = vld [vmem:[%s13870_s3 + $0x2e8] sm:$0xf]  ;;  %v425_v48 = vld [vmem:[%s13870_s3 + $0x2fc] sm:$0xff]  }
  0x6b   :  { %v407_v39 = vld [vmem:[%s13870_s3 + $0x2d4] sm:$0xf]  ;;  %402 = vst [vmem:[#allocation2 + $0x2cc] sm:$0xff] %v401_v37   ;;  %406 = vst [vmem:[#allocation2 + $0x2d4] sm:$0xf] %v405_v38  ;;  %v449_v59 = vld [vmem:[%s13870_s3 + $0x32c] sm:$0xff]  }
  0x6c   :  { %408 = vst [vmem:[#allocation2 + $0x2d8] sm:$0xf] %v407_v39  ;;  %v409_v40 = vld [vmem:[%s13870_s3 + $0x2ec] sm:$0xf]  ;;  %v411_v41 = vld [vmem:[%s13870_s3 + $0x2d8] sm:$0xf] }
  0x6d   :  { %v413_v42 = vld [vmem:[%s13870_s3 + $0x2f0] sm:$0xf]  ;;  %410 = vst [vmem:[#allocation2 + $0x2dc] sm:$0xf] %v409_v40  ;;  %412 = vst [vmem:[#allocation2 + $0x2e0] sm:$0xf] %v411_v41 }
  0x6e   :  { %414 = vst [vmem:[#allocation2 + $0x2e4] sm:$0xf] %v413_v42  ;;  %v415_v43 = vld [vmem:[%s13870_s3 + $0x2dc] sm:$0xf]  ;;  %v417_v44 = vld [vmem:[%s13870_s3 + $0x2f4] sm:$0xf] }
  0x6f   :  { %v419_v45 = vld [vmem:[%s13870_s3 + $0x2e0] sm:$0xf]  ;;  %416 = vst [vmem:[#allocation2 + $0x2e8] sm:$0xf] %v415_v43  ;;  %418 = vst [vmem:[#allocation2 + $0x2ec] sm:$0xf] %v417_v44 }
  0x70   :  { %420 = vst [vmem:[#allocation2 + $0x2f0] sm:$0xf] %v419_v45  ;;  %v421_v46 = vld [vmem:[%s13870_s3 + $0x2f8] sm:$0xf]  ;;  %v423_v47 = vld [vmem:[%s13870_s3 + $0x2e4] sm:$0xf] }
  0x71   :  { %422 = vst [vmem:[#allocation2 + $0x2f4] sm:$0xf] %v421_v46  ;;  %424 = vst [vmem:[#allocation2 + $0x2f8] sm:$0xf] %v423_v47  ;;  %v429_v49 = vld [vmem:[%s13870_s3 + $0x318] sm:$0xf] }
  0x72   :  { %426 = vst [vmem:[#allocation2 + $0x2fc] sm:$0xff] %v425_v48   ;;  %v431_v50 = vld [vmem:[%s13870_s3 + $0x304] sm:$0xf]  ;;  %v433_v51 = vld [vmem:[%s13870_s3 + $0x31c] sm:$0xf]  ;;  %450 = vst [vmem:[#allocation2 + $0x32c] sm:$0xff] %v449_v59  }
  0x73   :  { %430 = vst [vmem:[#allocation2 + $0x304] sm:$0xf] %v429_v49  ;;  %432 = vst [vmem:[#allocation2 + $0x308] sm:$0xf] %v431_v50  ;;  %v435_v52 = vld [vmem:[%s13870_s3 + $0x308] sm:$0xf] }
  0x74   :  { %434 = vst [vmem:[#allocation2 + $0x30c] sm:$0xf] %v433_v51  ;;  %v437_v53 = vld [vmem:[%s13870_s3 + $0x320] sm:$0xf]  ;;  %v439_v54 = vld [vmem:[%s13870_s3 + $0x30c] sm:$0xf] }
  0x75   :  { %436 = vst [vmem:[#allocation2 + $0x310] sm:$0xf] %v435_v52  ;;  %438 = vst [vmem:[#allocation2 + $0x314] sm:$0xf] %v437_v53  ;;  %v441_v55 = vld [vmem:[%s13870_s3 + $0x324] sm:$0xf] }
  0x76   :  { %440 = vst [vmem:[#allocation2 + $0x318] sm:$0xf] %v439_v54  ;;  %v443_v56 = vld [vmem:[%s13870_s3 + $0x310] sm:$0xf]  ;;  %v445_v57 = vld [vmem:[%s13870_s3 + $0x328] sm:$0xf] }
  0x77   :  { %442 = vst [vmem:[#allocation2 + $0x31c] sm:$0xf] %v441_v55  ;;  %444 = vst [vmem:[#allocation2 + $0x320] sm:$0xf] %v443_v56  ;;  %v447_v58 = vld [vmem:[%s13870_s3 + $0x314] sm:$0xf] }
  0x78   :  { %446 = vst [vmem:[#allocation2 + $0x324] sm:$0xf] %v445_v57  ;;  %v453_v60 = vld [vmem:[%s13870_s3 + $0x348] sm:$0xf]  ;;  %448 = vst [vmem:[#allocation2 + $0x328] sm:$0xf] %v447_v58 }
  0x79   :  { %454 = vst [vmem:[#allocation2 + $0x334] sm:$0xf] %v453_v60  ;;  %v455_v61 = vld [vmem:[%s13870_s3 + $0x334] sm:$0xf]  ;;  %v457_v62 = vld [vmem:[%s13870_s3 + $0x34c] sm:$0xf] }
  0x7a   :  { %v459_v63 = vld [vmem:[%s13870_s3 + $0x338] sm:$0xf]  ;;  %456 = vst [vmem:[#allocation2 + $0x338] sm:$0xf] %v455_v61  ;;  %458 = vst [vmem:[#allocation2 + $0x33c] sm:$0xf] %v457_v62 }
  0x7b   :  { %460 = vst [vmem:[#allocation2 + $0x340] sm:$0xf] %v459_v63  ;;  %v461_v0 = vld [vmem:[%s13870_s3 + $0x350] sm:$0xf]  ;;  %v463_v1 = vld [vmem:[%s13870_s3 + $0x33c] sm:$0xf] }
  0x7c   :  { %v465_v2 = vld [vmem:[%s13870_s3 + $0x354] sm:$0xf]  ;;  %462 = vst [vmem:[#allocation2 + $0x344] sm:$0xf] %v461_v0  ;;  %464 = vst [vmem:[#allocation2 + $0x348] sm:$0xf] %v463_v1 }
  0x7d   :  { %466 = vst [vmem:[#allocation2 + $0x34c] sm:$0xf] %v465_v2  ;;  %v467_v3 = vld [vmem:[%s13870_s3 + $0x340] sm:$0xf]  ;;  %v469_v4 = vld [vmem:[%s13870_s3 + $0x358] sm:$0xf] }
  0x7e   :  { %v471_v5 = vld [vmem:[%s13870_s3 + $0x344] sm:$0xf]  ;;  %468 = vst [vmem:[#allocation2 + $0x350] sm:$0xf] %v467_v3  ;;  %470 = vst [vmem:[#allocation2 + $0x354] sm:$0xf] %v469_v4 }
  0x7f   :  { %472 = vst [vmem:[#allocation2 + $0x358] sm:$0xf] %v471_v5  ;;  %v473_v6 = vld [vmem:[%s13870_s3 + $0x35c] sm:$0xff]   ;;  %v477_v7 = vld [vmem:[%s13870_s3 + $0x378] sm:$0xf]  ;;  %v497_v17 = vld [vmem:[%s13870_s3 + $0x38c] sm:$0xff]  }
  0x80   :  { %v479_v8 = vld [vmem:[%s13870_s3 + $0x364] sm:$0xf]  ;;  %474 = vst [vmem:[#allocation2 + $0x35c] sm:$0xff] %v473_v6   ;;  %478 = vst [vmem:[#allocation2 + $0x364] sm:$0xf] %v477_v7  ;;  %v521_v28 = vld [vmem:[%s13870_s3 + $0x3bc] sm:$0xff]  }
  0x81   :  { %480 = vst [vmem:[#allocation2 + $0x368] sm:$0xf] %v479_v8  ;;  %v481_v9 = vld [vmem:[%s13870_s3 + $0x37c] sm:$0xf]  ;;  %v483_v10 = vld [vmem:[%s13870_s3 + $0x368] sm:$0xf] }
  0x82   :  { %v485_v11 = vld [vmem:[%s13870_s3 + $0x380] sm:$0xf]  ;;  %482 = vst [vmem:[#allocation2 + $0x36c] sm:$0xf] %v481_v9  ;;  %484 = vst [vmem:[#allocation2 + $0x370] sm:$0xf] %v483_v10 }
  0x83   :  { %486 = vst [vmem:[#allocation2 + $0x374] sm:$0xf] %v485_v11  ;;  %v487_v12 = vld [vmem:[%s13870_s3 + $0x36c] sm:$0xf]  ;;  %v489_v13 = vld [vmem:[%s13870_s3 + $0x384] sm:$0xf] }
  0x84   :  { %v491_v14 = vld [vmem:[%s13870_s3 + $0x370] sm:$0xf]  ;;  %488 = vst [vmem:[#allocation2 + $0x378] sm:$0xf] %v487_v12  ;;  %490 = vst [vmem:[#allocation2 + $0x37c] sm:$0xf] %v489_v13 }
  0x85   :  { %492 = vst [vmem:[#allocation2 + $0x380] sm:$0xf] %v491_v14  ;;  %v493_v15 = vld [vmem:[%s13870_s3 + $0x388] sm:$0xf]  ;;  %v495_v16 = vld [vmem:[%s13870_s3 + $0x374] sm:$0xf] }
  0x86   :  { %494 = vst [vmem:[#allocation2 + $0x384] sm:$0xf] %v493_v15  ;;  %496 = vst [vmem:[#allocation2 + $0x388] sm:$0xf] %v495_v16  ;;  %v501_v18 = vld [vmem:[%s13870_s3 + $0x3a8] sm:$0xf] }
  0x87   :  { %498 = vst [vmem:[#allocation2 + $0x38c] sm:$0xff] %v497_v17   ;;  %v503_v19 = vld [vmem:[%s13870_s3 + $0x394] sm:$0xf]  ;;  %v505_v20 = vld [vmem:[%s13870_s3 + $0x3ac] sm:$0xf]  ;;  %522 = vst [vmem:[#allocation2 + $0x3bc] sm:$0xff] %v521_v28  }
  0x88   :  { %502 = vst [vmem:[#allocation2 + $0x394] sm:$0xf] %v501_v18  ;;  %504 = vst [vmem:[#allocation2 + $0x398] sm:$0xf] %v503_v19  ;;  %v507_v21 = vld [vmem:[%s13870_s3 + $0x398] sm:$0xf] }
  0x89   :  { %506 = vst [vmem:[#allocation2 + $0x39c] sm:$0xf] %v505_v20  ;;  %v509_v22 = vld [vmem:[%s13870_s3 + $0x3b0] sm:$0xf]  ;;  %v511_v23 = vld [vmem:[%s13870_s3 + $0x39c] sm:$0xf] }
  0x8a   :  { %508 = vst [vmem:[#allocation2 + $0x3a0] sm:$0xf] %v507_v21  ;;  %510 = vst [vmem:[#allocation2 + $0x3a4] sm:$0xf] %v509_v22  ;;  %v513_v24 = vld [vmem:[%s13870_s3 + $0x3b4] sm:$0xf] }
  0x8b   :  { %512 = vst [vmem:[#allocation2 + $0x3a8] sm:$0xf] %v511_v23  ;;  %v515_v25 = vld [vmem:[%s13870_s3 + $0x3a0] sm:$0xf]  ;;  %v517_v26 = vld [vmem:[%s13870_s3 + $0x3b8] sm:$0xf] }
  0x8c   :  { %514 = vst [vmem:[#allocation2 + $0x3ac] sm:$0xf] %v513_v24  ;;  %516 = vst [vmem:[#allocation2 + $0x3b0] sm:$0xf] %v515_v25  ;;  %v519_v27 = vld [vmem:[%s13870_s3 + $0x3a4] sm:$0xf] }
  0x8d   :  { %518 = vst [vmem:[#allocation2 + $0x3b4] sm:$0xf] %v517_v26  ;;  %v525_v29 = vld [vmem:[%s13870_s3 + $0x3d8] sm:$0xf]  ;;  %520 = vst [vmem:[#allocation2 + $0x3b8] sm:$0xf] %v519_v27 }
  0x8e   :  { %526 = vst [vmem:[#allocation2 + $0x3c4] sm:$0xf] %v525_v29  ;;  %v527_v30 = vld [vmem:[%s13870_s3 + $0x3c4] sm:$0xf]  ;;  %v529_v31 = vld [vmem:[%s13870_s3 + $0x3dc] sm:$0xf] }
  0x8f   :  { %v531_v32 = vld [vmem:[%s13870_s3 + $0x3c8] sm:$0xf]  ;;  %528 = vst [vmem:[#allocation2 + $0x3c8] sm:$0xf] %v527_v30  ;;  %530 = vst [vmem:[#allocation2 + $0x3cc] sm:$0xf] %v529_v31 }
  0x90   :  { %532 = vst [vmem:[#allocation2 + $0x3d0] sm:$0xf] %v531_v32  ;;  %v533_v33 = vld [vmem:[%s13870_s3 + $0x3e0] sm:$0xf]  ;;  %v535_v34 = vld [vmem:[%s13870_s3 + $0x3cc] sm:$0xf] }
  0x91   :  { %v537_v35 = vld [vmem:[%s13870_s3 + $0x3e4] sm:$0xf]  ;;  %534 = vst [vmem:[#allocation2 + $0x3d4] sm:$0xf] %v533_v33  ;;  %536 = vst [vmem:[#allocation2 + $0x3d8] sm:$0xf] %v535_v34 }
  0x92   :  { %538 = vst [vmem:[#allocation2 + $0x3dc] sm:$0xf] %v537_v35  ;;  %v539_v36 = vld [vmem:[%s13870_s3 + $0x3d0] sm:$0xf]  ;;  %v541_v37 = vld [vmem:[%s13870_s3 + $0x3e8] sm:$0xf] }
  0x93   :  { %v543_v38 = vld [vmem:[%s13870_s3 + $0x3d4] sm:$0xf]  ;;  %540 = vst [vmem:[#allocation2 + $0x3e0] sm:$0xf] %v539_v36  ;;  %542 = vst [vmem:[#allocation2 + $0x3e4] sm:$0xf] %v541_v37 }
  0x94   :  { %544 = vst [vmem:[#allocation2 + $0x3e8] sm:$0xf] %v543_v38  ;;  %v545_v39 = vld [vmem:[%s13870_s3 + $0x3ec] sm:$0xff]   ;;  %v549_v40 = vld [vmem:[%s13870_s3 + $0x408] sm:$0xf]  ;;  %v569_v50 = vld [vmem:[%s13870_s3 + $0x41c] sm:$0xff]  }
  0x95   :  { %v551_v41 = vld [vmem:[%s13870_s3 + $0x3f4] sm:$0xf]  ;;  %546 = vst [vmem:[#allocation2 + $0x3ec] sm:$0xff] %v545_v39   ;;  %550 = vst [vmem:[#allocation2 + $0x3f4] sm:$0xf] %v549_v40  ;;  %v593_v61 = vld [vmem:[%s13870_s3 + $0x44c] sm:$0xff]  }
  0x96   :  { %552 = vst [vmem:[#allocation2 + $0x3f8] sm:$0xf] %v551_v41  ;;  %v553_v42 = vld [vmem:[%s13870_s3 + $0x40c] sm:$0xf]  ;;  %v555_v43 = vld [vmem:[%s13870_s3 + $0x3f8] sm:$0xf] }
  0x97   :  { %v557_v44 = vld [vmem:[%s13870_s3 + $0x410] sm:$0xf]  ;;  %554 = vst [vmem:[#allocation2 + $0x3fc] sm:$0xf] %v553_v42  ;;  %556 = vst [vmem:[#allocation2 + $0x400] sm:$0xf] %v555_v43 }
  0x98   :  { %558 = vst [vmem:[#allocation2 + $0x404] sm:$0xf] %v557_v44  ;;  %v559_v45 = vld [vmem:[%s13870_s3 + $0x3fc] sm:$0xf]  ;;  %v561_v46 = vld [vmem:[%s13870_s3 + $0x414] sm:$0xf] }
  0x99   :  { %v563_v47 = vld [vmem:[%s13870_s3 + $0x400] sm:$0xf]  ;;  %560 = vst [vmem:[#allocation2 + $0x408] sm:$0xf] %v559_v45  ;;  %562 = vst [vmem:[#allocation2 + $0x40c] sm:$0xf] %v561_v46 }
  0x9a   :  { %564 = vst [vmem:[#allocation2 + $0x410] sm:$0xf] %v563_v47  ;;  %v565_v48 = vld [vmem:[%s13870_s3 + $0x418] sm:$0xf]  ;;  %v567_v49 = vld [vmem:[%s13870_s3 + $0x404] sm:$0xf] }
  0x9b   :  { %566 = vst [vmem:[#allocation2 + $0x414] sm:$0xf] %v565_v48  ;;  %568 = vst [vmem:[#allocation2 + $0x418] sm:$0xf] %v567_v49  ;;  %v573_v51 = vld [vmem:[%s13870_s3 + $0x438] sm:$0xf] }
  0x9c   :  { %570 = vst [vmem:[#allocation2 + $0x41c] sm:$0xff] %v569_v50   ;;  %v575_v52 = vld [vmem:[%s13870_s3 + $0x424] sm:$0xf]  ;;  %v577_v53 = vld [vmem:[%s13870_s3 + $0x43c] sm:$0xf]  ;;  %594 = vst [vmem:[#allocation2 + $0x44c] sm:$0xff] %v593_v61  }
  0x9d   :  { %574 = vst [vmem:[#allocation2 + $0x424] sm:$0xf] %v573_v51  ;;  %576 = vst [vmem:[#allocation2 + $0x428] sm:$0xf] %v575_v52  ;;  %v579_v54 = vld [vmem:[%s13870_s3 + $0x428] sm:$0xf] }
  0x9e   :  { %578 = vst [vmem:[#allocation2 + $0x42c] sm:$0xf] %v577_v53  ;;  %v581_v55 = vld [vmem:[%s13870_s3 + $0x440] sm:$0xf]  ;;  %v583_v56 = vld [vmem:[%s13870_s3 + $0x42c] sm:$0xf] }
  0x9f   :  { %580 = vst [vmem:[#allocation2 + $0x430] sm:$0xf] %v579_v54  ;;  %582 = vst [vmem:[#allocation2 + $0x434] sm:$0xf] %v581_v55  ;;  %v585_v57 = vld [vmem:[%s13870_s3 + $0x444] sm:$0xf] }
  0xa0   :  { %584 = vst [vmem:[#allocation2 + $0x438] sm:$0xf] %v583_v56  ;;  %v587_v58 = vld [vmem:[%s13870_s3 + $0x430] sm:$0xf]  ;;  %v589_v59 = vld [vmem:[%s13870_s3 + $0x448] sm:$0xf] }
  0xa1   :  { %586 = vst [vmem:[#allocation2 + $0x43c] sm:$0xf] %v585_v57  ;;  %588 = vst [vmem:[#allocation2 + $0x440] sm:$0xf] %v587_v58  ;;  %v591_v60 = vld [vmem:[%s13870_s3 + $0x434] sm:$0xf] }
  0xa2   :  { %590 = vst [vmem:[#allocation2 + $0x444] sm:$0xf] %v589_v59  ;;  %v597_v62 = vld [vmem:[%s13870_s3 + $0x468] sm:$0xf]  ;;  %592 = vst [vmem:[#allocation2 + $0x448] sm:$0xf] %v591_v60 }
  0xa3   :  { %598 = vst [vmem:[#allocation2 + $0x454] sm:$0xf] %v597_v62  ;;  %v599_v63 = vld [vmem:[%s13870_s3 + $0x454] sm:$0xf]  ;;  %v601_v0 = vld [vmem:[%s13870_s3 + $0x46c] sm:$0xf] }
  0xa4   :  { %v603_v1 = vld [vmem:[%s13870_s3 + $0x458] sm:$0xf]  ;;  %600 = vst [vmem:[#allocation2 + $0x458] sm:$0xf] %v599_v63  ;;  %602 = vst [vmem:[#allocation2 + $0x45c] sm:$0xf] %v601_v0 }
  0xa5   :  { %604 = vst [vmem:[#allocation2 + $0x460] sm:$0xf] %v603_v1  ;;  %v605_v2 = vld [vmem:[%s13870_s3 + $0x470] sm:$0xf]  ;;  %v607_v3 = vld [vmem:[%s13870_s3 + $0x45c] sm:$0xf] }
  0xa6   :  { %v609_v4 = vld [vmem:[%s13870_s3 + $0x474] sm:$0xf]  ;;  %606 = vst [vmem:[#allocation2 + $0x464] sm:$0xf] %v605_v2  ;;  %608 = vst [vmem:[#allocation2 + $0x468] sm:$0xf] %v607_v3 }
  0xa7   :  { %610 = vst [vmem:[#allocation2 + $0x46c] sm:$0xf] %v609_v4  ;;  %v611_v5 = vld [vmem:[%s13870_s3 + $0x460] sm:$0xf]  ;;  %v613_v6 = vld [vmem:[%s13870_s3 + $0x478] sm:$0xf] }
  0xa8   :  { %v615_v7 = vld [vmem:[%s13870_s3 + $0x464] sm:$0xf]  ;;  %612 = vst [vmem:[#allocation2 + $0x470] sm:$0xf] %v611_v5  ;;  %614 = vst [vmem:[#allocation2 + $0x474] sm:$0xf] %v613_v6 }
  0xa9   :  { %616 = vst [vmem:[#allocation2 + $0x478] sm:$0xf] %v615_v7  ;;  %v617_v8 = vld [vmem:[%s13870_s3 + $0x47c] sm:$0xff]   ;;  %v621_v9 = vld [vmem:[%s13870_s3 + $0x498] sm:$0xf]  ;;  %v641_v19 = vld [vmem:[%s13870_s3 + $0x4ac] sm:$0xff]  }
  0xaa   :  { %v623_v10 = vld [vmem:[%s13870_s3 + $0x484] sm:$0xf]  ;;  %618 = vst [vmem:[#allocation2 + $0x47c] sm:$0xff] %v617_v8   ;;  %622 = vst [vmem:[#allocation2 + $0x484] sm:$0xf] %v621_v9  ;;  %v665_v30 = vld [vmem:[%s13870_s3 + $0x4dc] sm:$0xff]  }
  0xab   :  { %624 = vst [vmem:[#allocation2 + $0x488] sm:$0xf] %v623_v10  ;;  %v625_v11 = vld [vmem:[%s13870_s3 + $0x49c] sm:$0xf]  ;;  %v627_v12 = vld [vmem:[%s13870_s3 + $0x488] sm:$0xf] }
  0xac   :  { %v629_v13 = vld [vmem:[%s13870_s3 + $0x4a0] sm:$0xf]  ;;  %626 = vst [vmem:[#allocation2 + $0x48c] sm:$0xf] %v625_v11  ;;  %628 = vst [vmem:[#allocation2 + $0x490] sm:$0xf] %v627_v12 }
  0xad   :  { %630 = vst [vmem:[#allocation2 + $0x494] sm:$0xf] %v629_v13  ;;  %v631_v14 = vld [vmem:[%s13870_s3 + $0x48c] sm:$0xf]  ;;  %v633_v15 = vld [vmem:[%s13870_s3 + $0x4a4] sm:$0xf] }
  0xae   :  { %v635_v16 = vld [vmem:[%s13870_s3 + $0x490] sm:$0xf]  ;;  %632 = vst [vmem:[#allocation2 + $0x498] sm:$0xf] %v631_v14  ;;  %634 = vst [vmem:[#allocation2 + $0x49c] sm:$0xf] %v633_v15 }
  0xaf   :  { %636 = vst [vmem:[#allocation2 + $0x4a0] sm:$0xf] %v635_v16  ;;  %v637_v17 = vld [vmem:[%s13870_s3 + $0x4a8] sm:$0xf]  ;;  %v639_v18 = vld [vmem:[%s13870_s3 + $0x494] sm:$0xf] }
  0xb0   :  { %638 = vst [vmem:[#allocation2 + $0x4a4] sm:$0xf] %v637_v17  ;;  %640 = vst [vmem:[#allocation2 + $0x4a8] sm:$0xf] %v639_v18  ;;  %v645_v20 = vld [vmem:[%s13870_s3 + $0x4c8] sm:$0xf] }
  0xb1   :  { %642 = vst [vmem:[#allocation2 + $0x4ac] sm:$0xff] %v641_v19   ;;  %v647_v21 = vld [vmem:[%s13870_s3 + $0x4b4] sm:$0xf]  ;;  %v649_v22 = vld [vmem:[%s13870_s3 + $0x4cc] sm:$0xf]  ;;  %666 = vst [vmem:[#allocation2 + $0x4dc] sm:$0xff] %v665_v30  }
  0xb2   :  { %646 = vst [vmem:[#allocation2 + $0x4b4] sm:$0xf] %v645_v20  ;;  %648 = vst [vmem:[#allocation2 + $0x4b8] sm:$0xf] %v647_v21  ;;  %v651_v23 = vld [vmem:[%s13870_s3 + $0x4b8] sm:$0xf] }
  0xb3   :  { %650 = vst [vmem:[#allocation2 + $0x4bc] sm:$0xf] %v649_v22  ;;  %v653_v24 = vld [vmem:[%s13870_s3 + $0x4d0] sm:$0xf]  ;;  %v655_v25 = vld [vmem:[%s13870_s3 + $0x4bc] sm:$0xf] }
  0xb4   :  { %652 = vst [vmem:[#allocation2 + $0x4c0] sm:$0xf] %v651_v23  ;;  %654 = vst [vmem:[#allocation2 + $0x4c4] sm:$0xf] %v653_v24  ;;  %v657_v26 = vld [vmem:[%s13870_s3 + $0x4d4] sm:$0xf] }
  0xb5   :  { %656 = vst [vmem:[#allocation2 + $0x4c8] sm:$0xf] %v655_v25  ;;  %v659_v27 = vld [vmem:[%s13870_s3 + $0x4c0] sm:$0xf]  ;;  %v661_v28 = vld [vmem:[%s13870_s3 + $0x4d8] sm:$0xf] }
  0xb6   :  { %658 = vst [vmem:[#allocation2 + $0x4cc] sm:$0xf] %v657_v26  ;;  %660 = vst [vmem:[#allocation2 + $0x4d0] sm:$0xf] %v659_v27  ;;  %v663_v29 = vld [vmem:[%s13870_s3 + $0x4c4] sm:$0xf] }
  0xb7   :  { %662 = vst [vmem:[#allocation2 + $0x4d4] sm:$0xf] %v661_v28  ;;  %v669_v31 = vld [vmem:[%s13870_s3 + $0x4f8] sm:$0xf]  ;;  %664 = vst [vmem:[#allocation2 + $0x4d8] sm:$0xf] %v663_v29 }
  0xb8   :  { %670 = vst [vmem:[#allocation2 + $0x4e4] sm:$0xf] %v669_v31  ;;  %v671_v32 = vld [vmem:[%s13870_s3 + $0x4e4] sm:$0xf]  ;;  %v673_v33 = vld [vmem:[%s13870_s3 + $0x4fc] sm:$0xf] }
  0xb9   :  { %v675_v34 = vld [vmem:[%s13870_s3 + $0x4e8] sm:$0xf]  ;;  %672 = vst [vmem:[#allocation2 + $0x4e8] sm:$0xf] %v671_v32  ;;  %674 = vst [vmem:[#allocation2 + $0x4ec] sm:$0xf] %v673_v33 }
  0xba   :  { %676 = vst [vmem:[#allocation2 + $0x4f0] sm:$0xf] %v675_v34  ;;  %v677_v35 = vld [vmem:[%s13870_s3 + $0x500] sm:$0xf]  ;;  %v679_v36 = vld [vmem:[%s13870_s3 + $0x4ec] sm:$0xf] }
  0xbb   :  { %v681_v37 = vld [vmem:[%s13870_s3 + $0x504] sm:$0xf]  ;;  %678 = vst [vmem:[#allocation2 + $0x4f4] sm:$0xf] %v677_v35  ;;  %680 = vst [vmem:[#allocation2 + $0x4f8] sm:$0xf] %v679_v36 }
  0xbc   :  { %682 = vst [vmem:[#allocation2 + $0x4fc] sm:$0xf] %v681_v37  ;;  %v683_v38 = vld [vmem:[%s13870_s3 + $0x4f0] sm:$0xf]  ;;  %v685_v39 = vld [vmem:[%s13870_s3 + $0x508] sm:$0xf] }
  0xbd   :  { %v687_v40 = vld [vmem:[%s13870_s3 + $0x4f4] sm:$0xf]  ;;  %684 = vst [vmem:[#allocation2 + $0x500] sm:$0xf] %v683_v38  ;;  %686 = vst [vmem:[#allocation2 + $0x504] sm:$0xf] %v685_v39 }
  0xbe   :  { %688 = vst [vmem:[#allocation2 + $0x508] sm:$0xf] %v687_v40  ;;  %v689_v41 = vld [vmem:[%s13870_s3 + $0x50c] sm:$0xff]   ;;  %v693_v42 = vld [vmem:[%s13870_s3 + $0x528] sm:$0xf]  ;;  %v713_v52 = vld [vmem:[%s13870_s3 + $0x53c] sm:$0xff]  }
  0xbf   :  { %v695_v43 = vld [vmem:[%s13870_s3 + $0x514] sm:$0xf]  ;;  %690 = vst [vmem:[#allocation2 + $0x50c] sm:$0xff] %v689_v41   ;;  %694 = vst [vmem:[#allocation2 + $0x514] sm:$0xf] %v693_v42  ;;  %v737_v63 = vld [vmem:[%s13870_s3 + $0x56c] sm:$0xff]  }
  0xc0   :  { %696 = vst [vmem:[#allocation2 + $0x518] sm:$0xf] %v695_v43  ;;  %v697_v44 = vld [vmem:[%s13870_s3 + $0x52c] sm:$0xf]  ;;  %v699_v45 = vld [vmem:[%s13870_s3 + $0x518] sm:$0xf] }
  0xc1   :  { %v701_v46 = vld [vmem:[%s13870_s3 + $0x530] sm:$0xf]  ;;  %698 = vst [vmem:[#allocation2 + $0x51c] sm:$0xf] %v697_v44  ;;  %700 = vst [vmem:[#allocation2 + $0x520] sm:$0xf] %v699_v45 }
  0xc2   :  { %702 = vst [vmem:[#allocation2 + $0x524] sm:$0xf] %v701_v46  ;;  %v703_v47 = vld [vmem:[%s13870_s3 + $0x51c] sm:$0xf]  ;;  %v705_v48 = vld [vmem:[%s13870_s3 + $0x534] sm:$0xf] }
  0xc3   :  { %v707_v49 = vld [vmem:[%s13870_s3 + $0x520] sm:$0xf]  ;;  %704 = vst [vmem:[#allocation2 + $0x528] sm:$0xf] %v703_v47  ;;  %706 = vst [vmem:[#allocation2 + $0x52c] sm:$0xf] %v705_v48 }
  0xc4   :  { %708 = vst [vmem:[#allocation2 + $0x530] sm:$0xf] %v707_v49  ;;  %v709_v50 = vld [vmem:[%s13870_s3 + $0x538] sm:$0xf]  ;;  %v711_v51 = vld [vmem:[%s13870_s3 + $0x524] sm:$0xf] }
  0xc5   :  { %710 = vst [vmem:[#allocation2 + $0x534] sm:$0xf] %v709_v50  ;;  %712 = vst [vmem:[#allocation2 + $0x538] sm:$0xf] %v711_v51  ;;  %v717_v53 = vld [vmem:[%s13870_s3 + $0x558] sm:$0xf] }
  0xc6   :  { %714 = vst [vmem:[#allocation2 + $0x53c] sm:$0xff] %v713_v52   ;;  %v719_v54 = vld [vmem:[%s13870_s3 + $0x544] sm:$0xf]  ;;  %v721_v55 = vld [vmem:[%s13870_s3 + $0x55c] sm:$0xf]  ;;  %738 = vst [vmem:[#allocation2 + $0x56c] sm:$0xff] %v737_v63  }
  0xc7   :  { %718 = vst [vmem:[#allocation2 + $0x544] sm:$0xf] %v717_v53  ;;  %720 = vst [vmem:[#allocation2 + $0x548] sm:$0xf] %v719_v54  ;;  %v723_v56 = vld [vmem:[%s13870_s3 + $0x548] sm:$0xf] }
  0xc8   :  { %722 = vst [vmem:[#allocation2 + $0x54c] sm:$0xf] %v721_v55  ;;  %v725_v57 = vld [vmem:[%s13870_s3 + $0x560] sm:$0xf]  ;;  %v727_v58 = vld [vmem:[%s13870_s3 + $0x54c] sm:$0xf] }
  0xc9   :  { %724 = vst [vmem:[#allocation2 + $0x550] sm:$0xf] %v723_v56  ;;  %726 = vst [vmem:[#allocation2 + $0x554] sm:$0xf] %v725_v57  ;;  %v729_v59 = vld [vmem:[%s13870_s3 + $0x564] sm:$0xf] }
  0xca   :  { %728 = vst [vmem:[#allocation2 + $0x558] sm:$0xf] %v727_v58  ;;  %v731_v60 = vld [vmem:[%s13870_s3 + $0x550] sm:$0xf]  ;;  %v733_v61 = vld [vmem:[%s13870_s3 + $0x568] sm:$0xf] }
  0xcb   :  { %730 = vst [vmem:[#allocation2 + $0x55c] sm:$0xf] %v729_v59  ;;  %732 = vst [vmem:[#allocation2 + $0x560] sm:$0xf] %v731_v60  ;;  %v735_v62 = vld [vmem:[%s13870_s3 + $0x554] sm:$0xf] }
  0xcc   :  { %734 = vst [vmem:[#allocation2 + $0x564] sm:$0xf] %v733_v61  ;;  %v741_v0 = vld [vmem:[%s13870_s3 + $0x588] sm:$0xf]  ;;  %736 = vst [vmem:[#allocation2 + $0x568] sm:$0xf] %v735_v62 }
  0xcd   :  { %742 = vst [vmem:[#allocation2 + $0x574] sm:$0xf] %v741_v0  ;;  %v743_v1 = vld [vmem:[%s13870_s3 + $0x574] sm:$0xf]  ;;  %v745_v2 = vld [vmem:[%s13870_s3 + $0x58c] sm:$0xf] }
  0xce   :  { %v747_v3 = vld [vmem:[%s13870_s3 + $0x578] sm:$0xf]  ;;  %744 = vst [vmem:[#allocation2 + $0x578] sm:$0xf] %v743_v1  ;;  %746 = vst [vmem:[#allocation2 + $0x57c] sm:$0xf] %v745_v2 }
  0xcf   :  { %748 = vst [vmem:[#allocation2 + $0x580] sm:$0xf] %v747_v3  ;;  %v749_v4 = vld [vmem:[%s13870_s3 + $0x590] sm:$0xf]  ;;  %v751_v5 = vld [vmem:[%s13870_s3 + $0x57c] sm:$0xf] }
  0xd0   :  { %v753_v6 = vld [vmem:[%s13870_s3 + $0x594] sm:$0xf]  ;;  %750 = vst [vmem:[#allocation2 + $0x584] sm:$0xf] %v749_v4  ;;  %752 = vst [vmem:[#allocation2 + $0x588] sm:$0xf] %v751_v5 }
  0xd1   :  { %754 = vst [vmem:[#allocation2 + $0x58c] sm:$0xf] %v753_v6  ;;  %v755_v7 = vld [vmem:[%s13870_s3 + $0x580] sm:$0xf]  ;;  %v757_v8 = vld [vmem:[%s13870_s3 + $0x598] sm:$0xf] }
  0xd2   :  { %v759_v9 = vld [vmem:[%s13870_s3 + $0x584] sm:$0xf]  ;;  %756 = vst [vmem:[#allocation2 + $0x590] sm:$0xf] %v755_v7  ;;  %758 = vst [vmem:[#allocation2 + $0x594] sm:$0xf] %v757_v8 }
  0xd3   :  { %760 = vst [vmem:[#allocation2 + $0x598] sm:$0xf] %v759_v9  ;;  %v761_v10 = vld [vmem:[%s13870_s3 + $0x59c] sm:$0xff]   ;;  %v765_v11 = vld [vmem:[%s13870_s3 + $0x5b8] sm:$0xf]  ;;  %v785_v21 = vld [vmem:[%s13870_s3 + $0x5cc] sm:$0xff]  }
  0xd4   :  { %v767_v12 = vld [vmem:[%s13870_s3 + $0x5a4] sm:$0xf]  ;;  %762 = vst [vmem:[#allocation2 + $0x59c] sm:$0xff] %v761_v10   ;;  %766 = vst [vmem:[#allocation2 + $0x5a4] sm:$0xf] %v765_v11  ;;  %v809_v32 = vld [vmem:[%s13870_s3 + $0x5fc] sm:$0xff]  }
  0xd5   :  { %768 = vst [vmem:[#allocation2 + $0x5a8] sm:$0xf] %v767_v12  ;;  %v769_v13 = vld [vmem:[%s13870_s3 + $0x5bc] sm:$0xf]  ;;  %v771_v14 = vld [vmem:[%s13870_s3 + $0x5a8] sm:$0xf] }
  0xd6   :  { %v773_v15 = vld [vmem:[%s13870_s3 + $0x5c0] sm:$0xf]  ;;  %770 = vst [vmem:[#allocation2 + $0x5ac] sm:$0xf] %v769_v13  ;;  %772 = vst [vmem:[#allocation2 + $0x5b0] sm:$0xf] %v771_v14 }
  0xd7   :  { %774 = vst [vmem:[#allocation2 + $0x5b4] sm:$0xf] %v773_v15  ;;  %v775_v16 = vld [vmem:[%s13870_s3 + $0x5ac] sm:$0xf]  ;;  %v777_v17 = vld [vmem:[%s13870_s3 + $0x5c4] sm:$0xf] }
  0xd8   :  { %v779_v18 = vld [vmem:[%s13870_s3 + $0x5b0] sm:$0xf]  ;;  %776 = vst [vmem:[#allocation2 + $0x5b8] sm:$0xf] %v775_v16  ;;  %778 = vst [vmem:[#allocation2 + $0x5bc] sm:$0xf] %v777_v17 }
  0xd9   :  { %780 = vst [vmem:[#allocation2 + $0x5c0] sm:$0xf] %v779_v18  ;;  %v781_v19 = vld [vmem:[%s13870_s3 + $0x5c8] sm:$0xf]  ;;  %v783_v20 = vld [vmem:[%s13870_s3 + $0x5b4] sm:$0xf] }
  0xda   :  { %782 = vst [vmem:[#allocation2 + $0x5c4] sm:$0xf] %v781_v19  ;;  %784 = vst [vmem:[#allocation2 + $0x5c8] sm:$0xf] %v783_v20  ;;  %v789_v22 = vld [vmem:[%s13870_s3 + $0x5e8] sm:$0xf] }
  0xdb   :  { %786 = vst [vmem:[#allocation2 + $0x5cc] sm:$0xff] %v785_v21   ;;  %v791_v23 = vld [vmem:[%s13870_s3 + $0x5d4] sm:$0xf]  ;;  %v793_v24 = vld [vmem:[%s13870_s3 + $0x5ec] sm:$0xf]  ;;  %810 = vst [vmem:[#allocation2 + $0x5fc] sm:$0xff] %v809_v32  }
  0xdc   :  { %790 = vst [vmem:[#allocation2 + $0x5d4] sm:$0xf] %v789_v22  ;;  %792 = vst [vmem:[#allocation2 + $0x5d8] sm:$0xf] %v791_v23  ;;  %v795_v25 = vld [vmem:[%s13870_s3 + $0x5d8] sm:$0xf] }
  0xdd   :  { %794 = vst [vmem:[#allocation2 + $0x5dc] sm:$0xf] %v793_v24  ;;  %v797_v26 = vld [vmem:[%s13870_s3 + $0x5f0] sm:$0xf]  ;;  %v799_v27 = vld [vmem:[%s13870_s3 + $0x5dc] sm:$0xf] }
  0xde   :  { %796 = vst [vmem:[#allocation2 + $0x5e0] sm:$0xf] %v795_v25  ;;  %798 = vst [vmem:[#allocation2 + $0x5e4] sm:$0xf] %v797_v26  ;;  %v801_v28 = vld [vmem:[%s13870_s3 + $0x5f4] sm:$0xf] }
  0xdf   :  { %800 = vst [vmem:[#allocation2 + $0x5e8] sm:$0xf] %v799_v27  ;;  %v803_v29 = vld [vmem:[%s13870_s3 + $0x5e0] sm:$0xf]  ;;  %v805_v30 = vld [vmem:[%s13870_s3 + $0x5f8] sm:$0xf] }
  0xe0   :  { %802 = vst [vmem:[#allocation2 + $0x5ec] sm:$0xf] %v801_v28  ;;  %804 = vst [vmem:[#allocation2 + $0x5f0] sm:$0xf] %v803_v29  ;;  %v807_v31 = vld [vmem:[%s13870_s3 + $0x5e4] sm:$0xf] }
  0xe1   :  { %806 = vst [vmem:[#allocation2 + $0x5f4] sm:$0xf] %v805_v30  ;;  %v813_v33 = vld [vmem:[%s13870_s3 + $0x618] sm:$0xf]  ;;  %808 = vst [vmem:[#allocation2 + $0x5f8] sm:$0xf] %v807_v31 }
  0xe2   :  { %814 = vst [vmem:[#allocation2 + $0x604] sm:$0xf] %v813_v33  ;;  %v815_v34 = vld [vmem:[%s13870_s3 + $0x604] sm:$0xf]  ;;  %v817_v35 = vld [vmem:[%s13870_s3 + $0x61c] sm:$0xf] }
  0xe3   :  { %v819_v36 = vld [vmem:[%s13870_s3 + $0x608] sm:$0xf]  ;;  %816 = vst [vmem:[#allocation2 + $0x608] sm:$0xf] %v815_v34  ;;  %818 = vst [vmem:[#allocation2 + $0x60c] sm:$0xf] %v817_v35 }
  0xe4   :  { %820 = vst [vmem:[#allocation2 + $0x610] sm:$0xf] %v819_v36  ;;  %v821_v37 = vld [vmem:[%s13870_s3 + $0x620] sm:$0xf]  ;;  %v823_v38 = vld [vmem:[%s13870_s3 + $0x60c] sm:$0xf] }
  0xe5   :  { %v825_v39 = vld [vmem:[%s13870_s3 + $0x624] sm:$0xf]  ;;  %822 = vst [vmem:[#allocation2 + $0x614] sm:$0xf] %v821_v37  ;;  %824 = vst [vmem:[#allocation2 + $0x618] sm:$0xf] %v823_v38 }
  0xe6   :  { %826 = vst [vmem:[#allocation2 + $0x61c] sm:$0xf] %v825_v39  ;;  %v827_v40 = vld [vmem:[%s13870_s3 + $0x610] sm:$0xf]  ;;  %v829_v41 = vld [vmem:[%s13870_s3 + $0x628] sm:$0xf] }
  0xe7   :  { %v831_v42 = vld [vmem:[%s13870_s3 + $0x614] sm:$0xf]  ;;  %828 = vst [vmem:[#allocation2 + $0x620] sm:$0xf] %v827_v40  ;;  %830 = vst [vmem:[#allocation2 + $0x624] sm:$0xf] %v829_v41 }
  0xe8   :  { %832 = vst [vmem:[#allocation2 + $0x628] sm:$0xf] %v831_v42  ;;  %v833_v43 = vld [vmem:[%s13870_s3 + $0x62c] sm:$0xff]   ;;  %v837_v44 = vld [vmem:[%s13870_s3 + $0x648] sm:$0xf]  ;;  %v857_v54 = vld [vmem:[%s13870_s3 + $0x65c] sm:$0xff]  }
  0xe9   :  { %v839_v45 = vld [vmem:[%s13870_s3 + $0x634] sm:$0xf]  ;;  %834 = vst [vmem:[#allocation2 + $0x62c] sm:$0xff] %v833_v43   ;;  %838 = vst [vmem:[#allocation2 + $0x634] sm:$0xf] %v837_v44  ;;  %v881_v1 = vld [vmem:[%s13870_s3 + $0x68c] sm:$0xff]  }
  0xea   :  { %840 = vst [vmem:[#allocation2 + $0x638] sm:$0xf] %v839_v45  ;;  %v841_v46 = vld [vmem:[%s13870_s3 + $0x64c] sm:$0xf]  ;;  %v843_v47 = vld [vmem:[%s13870_s3 + $0x638] sm:$0xf] }
  0xeb   :  { %v845_v48 = vld [vmem:[%s13870_s3 + $0x650] sm:$0xf]  ;;  %842 = vst [vmem:[#allocation2 + $0x63c] sm:$0xf] %v841_v46  ;;  %844 = vst [vmem:[#allocation2 + $0x640] sm:$0xf] %v843_v47 }
  0xec   :  { %846 = vst [vmem:[#allocation2 + $0x644] sm:$0xf] %v845_v48  ;;  %v847_v49 = vld [vmem:[%s13870_s3 + $0x63c] sm:$0xf]  ;;  %v849_v50 = vld [vmem:[%s13870_s3 + $0x654] sm:$0xf] }
  0xed   :  { %v851_v51 = vld [vmem:[%s13870_s3 + $0x640] sm:$0xf]  ;;  %848 = vst [vmem:[#allocation2 + $0x648] sm:$0xf] %v847_v49  ;;  %850 = vst [vmem:[#allocation2 + $0x64c] sm:$0xf] %v849_v50 }
  0xee   :  { %852 = vst [vmem:[#allocation2 + $0x650] sm:$0xf] %v851_v51  ;;  %v853_v52 = vld [vmem:[%s13870_s3 + $0x658] sm:$0xf]  ;;  %v855_v53 = vld [vmem:[%s13870_s3 + $0x644] sm:$0xf] }
  0xef   :  { %854 = vst [vmem:[#allocation2 + $0x654] sm:$0xf] %v853_v52  ;;  %856 = vst [vmem:[#allocation2 + $0x658] sm:$0xf] %v855_v53  ;;  %v861_v55 = vld [vmem:[%s13870_s3 + $0x678] sm:$0xf] }
  0xf0   :  { %858 = vst [vmem:[#allocation2 + $0x65c] sm:$0xff] %v857_v54   ;;  %v863_v56 = vld [vmem:[%s13870_s3 + $0x664] sm:$0xf]  ;;  %v865_v57 = vld [vmem:[%s13870_s3 + $0x67c] sm:$0xf]  ;;  %882 = vst [vmem:[#allocation2 + $0x68c] sm:$0xff] %v881_v1  }
  0xf1   :  { %862 = vst [vmem:[#allocation2 + $0x664] sm:$0xf] %v861_v55  ;;  %864 = vst [vmem:[#allocation2 + $0x668] sm:$0xf] %v863_v56  ;;  %v867_v58 = vld [vmem:[%s13870_s3 + $0x668] sm:$0xf] }
  0xf2   :  { %866 = vst [vmem:[#allocation2 + $0x66c] sm:$0xf] %v865_v57  ;;  %v869_v59 = vld [vmem:[%s13870_s3 + $0x680] sm:$0xf]  ;;  %v871_v60 = vld [vmem:[%s13870_s3 + $0x66c] sm:$0xf] }
  0xf3   :  { %868 = vst [vmem:[#allocation2 + $0x670] sm:$0xf] %v867_v58  ;;  %870 = vst [vmem:[#allocation2 + $0x674] sm:$0xf] %v869_v59  ;;  %v873_v61 = vld [vmem:[%s13870_s3 + $0x684] sm:$0xf] }
  0xf4   :  { %872 = vst [vmem:[#allocation2 + $0x678] sm:$0xf] %v871_v60  ;;  %v875_v62 = vld [vmem:[%s13870_s3 + $0x670] sm:$0xf]  ;;  %v877_v63 = vld [vmem:[%s13870_s3 + $0x688] sm:$0xf] }
  0xf5   :  { %874 = vst [vmem:[#allocation2 + $0x67c] sm:$0xf] %v873_v61  ;;  %876 = vst [vmem:[#allocation2 + $0x680] sm:$0xf] %v875_v62  ;;  %v879_v0 = vld [vmem:[%s13870_s3 + $0x674] sm:$0xf] }
  0xf6   :  { %878 = vst [vmem:[#allocation2 + $0x684] sm:$0xf] %v877_v63  ;;  %v885_v2 = vld [vmem:[%s13870_s3 + $0x6a8] sm:$0xf]  ;;  %880 = vst [vmem:[#allocation2 + $0x688] sm:$0xf] %v879_v0 }
  0xf7   :  { %886 = vst [vmem:[#allocation2 + $0x694] sm:$0xf] %v885_v2  ;;  %v887_v3 = vld [vmem:[%s13870_s3 + $0x694] sm:$0xf]  ;;  %v889_v4 = vld [vmem:[%s13870_s3 + $0x6ac] sm:$0xf] }
  0xf8   :  { %v891_v5 = vld [vmem:[%s13870_s3 + $0x698] sm:$0xf]  ;;  %888 = vst [vmem:[#allocation2 + $0x698] sm:$0xf] %v887_v3  ;;  %890 = vst [vmem:[#allocation2 + $0x69c] sm:$0xf] %v889_v4 }
  0xf9   :  { %892 = vst [vmem:[#allocation2 + $0x6a0] sm:$0xf] %v891_v5  ;;  %v893_v6 = vld [vmem:[%s13870_s3 + $0x6b0] sm:$0xf]  ;;  %v895_v7 = vld [vmem:[%s13870_s3 + $0x69c] sm:$0xf] }
  0xfa   :  { %v897_v8 = vld [vmem:[%s13870_s3 + $0x6b4] sm:$0xf]  ;;  %894 = vst [vmem:[#allocation2 + $0x6a4] sm:$0xf] %v893_v6  ;;  %896 = vst [vmem:[#allocation2 + $0x6a8] sm:$0xf] %v895_v7 }
  0xfb   :  { %898 = vst [vmem:[#allocation2 + $0x6ac] sm:$0xf] %v897_v8  ;;  %v899_v9 = vld [vmem:[%s13870_s3 + $0x6a0] sm:$0xf]  ;;  %v901_v10 = vld [vmem:[%s13870_s3 + $0x6b8] sm:$0xf] }
  0xfc   :  { %v903_v11 = vld [vmem:[%s13870_s3 + $0x6a4] sm:$0xf]  ;;  %900 = vst [vmem:[#allocation2 + $0x6b0] sm:$0xf] %v899_v9  ;;  %902 = vst [vmem:[#allocation2 + $0x6b4] sm:$0xf] %v901_v10 }
  0xfd   :  { %904 = vst [vmem:[#allocation2 + $0x6b8] sm:$0xf] %v903_v11  ;;  %v905_v12 = vld [vmem:[%s13870_s3 + $0x6bc] sm:$0xff]   ;;  %v909_v13 = vld [vmem:[%s13870_s3 + $0x6d8] sm:$0xf]  ;;  %v929_v23 = vld [vmem:[%s13870_s3 + $0x6ec] sm:$0xff]  }
  0xfe   :  { %v911_v14 = vld [vmem:[%s13870_s3 + $0x6c4] sm:$0xf]  ;;  %906 = vst [vmem:[#allocation2 + $0x6bc] sm:$0xff] %v905_v12   ;;  %910 = vst [vmem:[#allocation2 + $0x6c4] sm:$0xf] %v909_v13  ;;  %v953_v34 = vld [vmem:[%s13870_s3 + $0x71c] sm:$0xff]  }
  0xff   :  { %912 = vst [vmem:[#allocation2 + $0x6c8] sm:$0xf] %v911_v14  ;;  %v913_v15 = vld [vmem:[%s13870_s3 + $0x6dc] sm:$0xf]  ;;  %v915_v16 = vld [vmem:[%s13870_s3 + $0x6c8] sm:$0xf] }
 0x100   :  { %v917_v17 = vld [vmem:[%s13870_s3 + $0x6e0] sm:$0xf]  ;;  %914 = vst [vmem:[#allocation2 + $0x6cc] sm:$0xf] %v913_v15  ;;  %916 = vst [vmem:[#allocation2 + $0x6d0] sm:$0xf] %v915_v16 }
 0x101   :  { %918 = vst [vmem:[#allocation2 + $0x6d4] sm:$0xf] %v917_v17  ;;  %v919_v18 = vld [vmem:[%s13870_s3 + $0x6cc] sm:$0xf]  ;;  %v921_v19 = vld [vmem:[%s13870_s3 + $0x6e4] sm:$0xf] }
 0x102   :  { %v923_v20 = vld [vmem:[%s13870_s3 + $0x6d0] sm:$0xf]  ;;  %920 = vst [vmem:[#allocation2 + $0x6d8] sm:$0xf] %v919_v18  ;;  %922 = vst [vmem:[#allocation2 + $0x6dc] sm:$0xf] %v921_v19 }
 0x103   :  { %924 = vst [vmem:[#allocation2 + $0x6e0] sm:$0xf] %v923_v20  ;;  %v925_v21 = vld [vmem:[%s13870_s3 + $0x6e8] sm:$0xf]  ;;  %v927_v22 = vld [vmem:[%s13870_s3 + $0x6d4] sm:$0xf] }
 0x104   :  { %926 = vst [vmem:[#allocation2 + $0x6e4] sm:$0xf] %v925_v21  ;;  %928 = vst [vmem:[#allocation2 + $0x6e8] sm:$0xf] %v927_v22  ;;  %v933_v24 = vld [vmem:[%s13870_s3 + $0x708] sm:$0xf] }
 0x105   :  { %930 = vst [vmem:[#allocation2 + $0x6ec] sm:$0xff] %v929_v23   ;;  %v935_v25 = vld [vmem:[%s13870_s3 + $0x6f4] sm:$0xf]  ;;  %v937_v26 = vld [vmem:[%s13870_s3 + $0x70c] sm:$0xf]  ;;  %954 = vst [vmem:[#allocation2 + $0x71c] sm:$0xff] %v953_v34  }
 0x106   :  { %934 = vst [vmem:[#allocation2 + $0x6f4] sm:$0xf] %v933_v24  ;;  %936 = vst [vmem:[#allocation2 + $0x6f8] sm:$0xf] %v935_v25  ;;  %v939_v27 = vld [vmem:[%s13870_s3 + $0x6f8] sm:$0xf] }
 0x107   :  { %938 = vst [vmem:[#allocation2 + $0x6fc] sm:$0xf] %v937_v26  ;;  %v941_v28 = vld [vmem:[%s13870_s3 + $0x710] sm:$0xf]  ;;  %v943_v29 = vld [vmem:[%s13870_s3 + $0x6fc] sm:$0xf] }
 0x108   :  { %940 = vst [vmem:[#allocation2 + $0x700] sm:$0xf] %v939_v27  ;;  %942 = vst [vmem:[#allocation2 + $0x704] sm:$0xf] %v941_v28  ;;  %v945_v30 = vld [vmem:[%s13870_s3 + $0x714] sm:$0xf] }
 0x109   :  { %944 = vst [vmem:[#allocation2 + $0x708] sm:$0xf] %v943_v29  ;;  %v947_v31 = vld [vmem:[%s13870_s3 + $0x700] sm:$0xf]  ;;  %v949_v32 = vld [vmem:[%s13870_s3 + $0x718] sm:$0xf] }
 0x10a   :  { %946 = vst [vmem:[#allocation2 + $0x70c] sm:$0xf] %v945_v30  ;;  %948 = vst [vmem:[#allocation2 + $0x710] sm:$0xf] %v947_v31  ;;  %v951_v33 = vld [vmem:[%s13870_s3 + $0x704] sm:$0xf] }
 0x10b   :  { %950 = vst [vmem:[#allocation2 + $0x714] sm:$0xf] %v949_v32  ;;  %v957_v35 = vld [vmem:[%s13870_s3 + $0x738] sm:$0xf]  ;;  %952 = vst [vmem:[#allocation2 + $0x718] sm:$0xf] %v951_v33 }
 0x10c   :  { %958 = vst [vmem:[#allocation2 + $0x724] sm:$0xf] %v957_v35  ;;  %v959_v36 = vld [vmem:[%s13870_s3 + $0x724] sm:$0xf]  ;;  %v961_v37 = vld [vmem:[%s13870_s3 + $0x73c] sm:$0xf] }
 0x10d   :  { %v963_v38 = vld [vmem:[%s13870_s3 + $0x728] sm:$0xf]  ;;  %960 = vst [vmem:[#allocation2 + $0x728] sm:$0xf] %v959_v36  ;;  %962 = vst [vmem:[#allocation2 + $0x72c] sm:$0xf] %v961_v37 }
 0x10e   :  { %964 = vst [vmem:[#allocation2 + $0x730] sm:$0xf] %v963_v38  ;;  %v965_v39 = vld [vmem:[%s13870_s3 + $0x740] sm:$0xf]  ;;  %v967_v40 = vld [vmem:[%s13870_s3 + $0x72c] sm:$0xf] }
 0x10f   :  { %v969_v41 = vld [vmem:[%s13870_s3 + $0x744] sm:$0xf]  ;;  %966 = vst [vmem:[#allocation2 + $0x734] sm:$0xf] %v965_v39  ;;  %968 = vst [vmem:[#allocation2 + $0x738] sm:$0xf] %v967_v40 }
 0x110   :  { %970 = vst [vmem:[#allocation2 + $0x73c] sm:$0xf] %v969_v41  ;;  %v971_v42 = vld [vmem:[%s13870_s3 + $0x730] sm:$0xf]  ;;  %v973_v43 = vld [vmem:[%s13870_s3 + $0x748] sm:$0xf] }
 0x111   :  { %v975_v44 = vld [vmem:[%s13870_s3 + $0x734] sm:$0xf]  ;;  %972 = vst [vmem:[#allocation2 + $0x740] sm:$0xf] %v971_v42  ;;  %974 = vst [vmem:[#allocation2 + $0x744] sm:$0xf] %v973_v43 }
 0x112   :  { %976 = vst [vmem:[#allocation2 + $0x748] sm:$0xf] %v975_v44  ;;  %v977_v45 = vld [vmem:[%s13870_s3 + $0x74c] sm:$0xff]   ;;  %v981_v46 = vld [vmem:[%s13870_s3 + $0x768] sm:$0xf]  ;;  %v1001_v56 = vld [vmem:[%s13870_s3 + $0x77c] sm:$0xff]  }
 0x113   :  { %v983_v47 = vld [vmem:[%s13870_s3 + $0x754] sm:$0xf]  ;;  %978 = vst [vmem:[#allocation2 + $0x74c] sm:$0xff] %v977_v45   ;;  %982 = vst [vmem:[#allocation2 + $0x754] sm:$0xf] %v981_v46  ;;  %v1025_v3 = vld [vmem:[%s13870_s3 + $0x7ac] sm:$0xff]  }
 0x114   :  { %984 = vst [vmem:[#allocation2 + $0x758] sm:$0xf] %v983_v47  ;;  %v985_v48 = vld [vmem:[%s13870_s3 + $0x76c] sm:$0xf]  ;;  %v987_v49 = vld [vmem:[%s13870_s3 + $0x758] sm:$0xf] }
 0x115   :  { %v989_v50 = vld [vmem:[%s13870_s3 + $0x770] sm:$0xf]  ;;  %986 = vst [vmem:[#allocation2 + $0x75c] sm:$0xf] %v985_v48  ;;  %988 = vst [vmem:[#allocation2 + $0x760] sm:$0xf] %v987_v49 }
 0x116   :  { %990 = vst [vmem:[#allocation2 + $0x764] sm:$0xf] %v989_v50  ;;  %v991_v51 = vld [vmem:[%s13870_s3 + $0x75c] sm:$0xf]  ;;  %v993_v52 = vld [vmem:[%s13870_s3 + $0x774] sm:$0xf] }
 0x117   :  { %v995_v53 = vld [vmem:[%s13870_s3 + $0x760] sm:$0xf]  ;;  %992 = vst [vmem:[#allocation2 + $0x768] sm:$0xf] %v991_v51  ;;  %994 = vst [vmem:[#allocation2 + $0x76c] sm:$0xf] %v993_v52 }
 0x118   :  { %996 = vst [vmem:[#allocation2 + $0x770] sm:$0xf] %v995_v53  ;;  %v997_v54 = vld [vmem:[%s13870_s3 + $0x778] sm:$0xf]  ;;  %v999_v55 = vld [vmem:[%s13870_s3 + $0x764] sm:$0xf] }
 0x119   :  { %998 = vst [vmem:[#allocation2 + $0x774] sm:$0xf] %v997_v54  ;;  %1000 = vst [vmem:[#allocation2 + $0x778] sm:$0xf] %v999_v55  ;;  %v1005_v57 = vld [vmem:[%s13870_s3 + $0x798] sm:$0xf] }
 0x11a   :  { %1002 = vst [vmem:[#allocation2 + $0x77c] sm:$0xff] %v1001_v56   ;;  %v1007_v58 = vld [vmem:[%s13870_s3 + $0x784] sm:$0xf]  ;;  %v1009_v59 = vld [vmem:[%s13870_s3 + $0x79c] sm:$0xf]  ;;  %1026 = vst [vmem:[#allocation2 + $0x7ac] sm:$0xff] %v1025_v3  }
 0x11b   :  { %1006 = vst [vmem:[#allocation2 + $0x784] sm:$0xf] %v1005_v57  ;;  %1008 = vst [vmem:[#allocation2 + $0x788] sm:$0xf] %v1007_v58  ;;  %v1011_v60 = vld [vmem:[%s13870_s3 + $0x788] sm:$0xf] }
 0x11c   :  { %1010 = vst [vmem:[#allocation2 + $0x78c] sm:$0xf] %v1009_v59  ;;  %v1013_v61 = vld [vmem:[%s13870_s3 + $0x7a0] sm:$0xf]  ;;  %v1015_v62 = vld [vmem:[%s13870_s3 + $0x78c] sm:$0xf] }
 0x11d   :  { %1012 = vst [vmem:[#allocation2 + $0x790] sm:$0xf] %v1011_v60  ;;  %1014 = vst [vmem:[#allocation2 + $0x794] sm:$0xf] %v1013_v61  ;;  %v1017_v63 = vld [vmem:[%s13870_s3 + $0x7a4] sm:$0xf] }
 0x11e   :  { %1016 = vst [vmem:[#allocation2 + $0x798] sm:$0xf] %v1015_v62  ;;  %v1019_v0 = vld [vmem:[%s13870_s3 + $0x790] sm:$0xf]  ;;  %v1021_v1 = vld [vmem:[%s13870_s3 + $0x7a8] sm:$0xf] }
 0x11f   :  { %1018 = vst [vmem:[#allocation2 + $0x79c] sm:$0xf] %v1017_v63  ;;  %1020 = vst [vmem:[#allocation2 + $0x7a0] sm:$0xf] %v1019_v0  ;;  %v1023_v2 = vld [vmem:[%s13870_s3 + $0x794] sm:$0xf] }
 0x120   :  { %1022 = vst [vmem:[#allocation2 + $0x7a4] sm:$0xf] %v1021_v1  ;;  %v1029_v4 = vld [vmem:[%s13870_s3 + $0x7c8] sm:$0xf]  ;;  %1024 = vst [vmem:[#allocation2 + $0x7a8] sm:$0xf] %v1023_v2 }
 0x121   :  { %1030 = vst [vmem:[#allocation2 + $0x7b4] sm:$0xf] %v1029_v4  ;;  %v1031_v5 = vld [vmem:[%s13870_s3 + $0x7b4] sm:$0xf]  ;;  %v1033_v6 = vld [vmem:[%s13870_s3 + $0x7cc] sm:$0xf] }
 0x122   :  { %v1035_v7 = vld [vmem:[%s13870_s3 + $0x7b8] sm:$0xf]  ;;  %1032 = vst [vmem:[#allocation2 + $0x7b8] sm:$0xf] %v1031_v5  ;;  %1034 = vst [vmem:[#allocation2 + $0x7bc] sm:$0xf] %v1033_v6 }
 0x123   :  { %1036 = vst [vmem:[#allocation2 + $0x7c0] sm:$0xf] %v1035_v7  ;;  %v1037_v8 = vld [vmem:[%s13870_s3 + $0x7d0] sm:$0xf]  ;;  %v1039_v9 = vld [vmem:[%s13870_s3 + $0x7bc] sm:$0xf] }
 0x124   :  { %v1041_v10 = vld [vmem:[%s13870_s3 + $0x7d4] sm:$0xf]  ;;  %1038 = vst [vmem:[#allocation2 + $0x7c4] sm:$0xf] %v1037_v8  ;;  %1040 = vst [vmem:[#allocation2 + $0x7c8] sm:$0xf] %v1039_v9 }
 0x125   :  { %1042 = vst [vmem:[#allocation2 + $0x7cc] sm:$0xf] %v1041_v10  ;;  %v1043_v11 = vld [vmem:[%s13870_s3 + $0x7c0] sm:$0xf]  ;;  %v1045_v12 = vld [vmem:[%s13870_s3 + $0x7d8] sm:$0xf] }
 0x126   :  { %v1047_v13 = vld [vmem:[%s13870_s3 + $0x7c4] sm:$0xf]  ;;  %1044 = vst [vmem:[#allocation2 + $0x7d0] sm:$0xf] %v1043_v11  ;;  %1046 = vst [vmem:[#allocation2 + $0x7d4] sm:$0xf] %v1045_v12 }
 0x127   :  { %1048 = vst [vmem:[#allocation2 + $0x7d8] sm:$0xf] %v1047_v13  ;;  %v1049_v14 = vld [vmem:[%s13870_s3 + $0x7dc] sm:$0xff]   ;;  %v1053_v15 = vld [vmem:[%s13870_s3 + $0x7f8] sm:$0xf]  ;;  %v1073_v25 = vld [vmem:[%s13870_s3 + $0x80c] sm:$0xff]  }
 0x128   :  { %v1055_v16 = vld [vmem:[%s13870_s3 + $0x7e4] sm:$0xf]  ;;  %1050 = vst [vmem:[#allocation2 + $0x7dc] sm:$0xff] %v1049_v14   ;;  %1054 = vst [vmem:[#allocation2 + $0x7e4] sm:$0xf] %v1053_v15  ;;  %v1097_v36 = vld [vmem:[%s13870_s3 + $0x83c] sm:$0xff]  }
 0x129   :  { %1056 = vst [vmem:[#allocation2 + $0x7e8] sm:$0xf] %v1055_v16  ;;  %v1057_v17 = vld [vmem:[%s13870_s3 + $0x7fc] sm:$0xf]  ;;  %v1059_v18 = vld [vmem:[%s13870_s3 + $0x7e8] sm:$0xf] }
 0x12a   :  { %v1061_v19 = vld [vmem:[%s13870_s3 + $0x800] sm:$0xf]  ;;  %1058 = vst [vmem:[#allocation2 + $0x7ec] sm:$0xf] %v1057_v17  ;;  %1060 = vst [vmem:[#allocation2 + $0x7f0] sm:$0xf] %v1059_v18 }
 0x12b   :  { %1062 = vst [vmem:[#allocation2 + $0x7f4] sm:$0xf] %v1061_v19  ;;  %v1063_v20 = vld [vmem:[%s13870_s3 + $0x7ec] sm:$0xf]  ;;  %v1065_v21 = vld [vmem:[%s13870_s3 + $0x804] sm:$0xf] }
 0x12c   :  { %v1067_v22 = vld [vmem:[%s13870_s3 + $0x7f0] sm:$0xf]  ;;  %1064 = vst [vmem:[#allocation2 + $0x7f8] sm:$0xf] %v1063_v20  ;;  %1066 = vst [vmem:[#allocation2 + $0x7fc] sm:$0xf] %v1065_v21 }
 0x12d   :  { %1068 = vst [vmem:[#allocation2 + $0x800] sm:$0xf] %v1067_v22  ;;  %v1069_v23 = vld [vmem:[%s13870_s3 + $0x808] sm:$0xf]  ;;  %v1071_v24 = vld [vmem:[%s13870_s3 + $0x7f4] sm:$0xf] }
 0x12e   :  { %1070 = vst [vmem:[#allocation2 + $0x804] sm:$0xf] %v1069_v23  ;;  %1072 = vst [vmem:[#allocation2 + $0x808] sm:$0xf] %v1071_v24  ;;  %v1077_v26 = vld [vmem:[%s13870_s3 + $0x828] sm:$0xf] }
 0x12f   :  { %1074 = vst [vmem:[#allocation2 + $0x80c] sm:$0xff] %v1073_v25   ;;  %v1079_v27 = vld [vmem:[%s13870_s3 + $0x814] sm:$0xf]  ;;  %v1081_v28 = vld [vmem:[%s13870_s3 + $0x82c] sm:$0xf]  ;;  %1098 = vst [vmem:[#allocation2 + $0x83c] sm:$0xff] %v1097_v36  }
 0x130   :  { %1078 = vst [vmem:[#allocation2 + $0x814] sm:$0xf] %v1077_v26  ;;  %1080 = vst [vmem:[#allocation2 + $0x818] sm:$0xf] %v1079_v27  ;;  %v1083_v29 = vld [vmem:[%s13870_s3 + $0x818] sm:$0xf] }
 0x131   :  { %1082 = vst [vmem:[#allocation2 + $0x81c] sm:$0xf] %v1081_v28  ;;  %v1085_v30 = vld [vmem:[%s13870_s3 + $0x830] sm:$0xf]  ;;  %v1087_v31 = vld [vmem:[%s13870_s3 + $0x81c] sm:$0xf] }
 0x132   :  { %1084 = vst [vmem:[#allocation2 + $0x820] sm:$0xf] %v1083_v29  ;;  %1086 = vst [vmem:[#allocation2 + $0x824] sm:$0xf] %v1085_v30  ;;  %v1089_v32 = vld [vmem:[%s13870_s3 + $0x834] sm:$0xf] }
 0x133   :  { %1088 = vst [vmem:[#allocation2 + $0x828] sm:$0xf] %v1087_v31  ;;  %v1091_v33 = vld [vmem:[%s13870_s3 + $0x820] sm:$0xf]  ;;  %v1093_v34 = vld [vmem:[%s13870_s3 + $0x838] sm:$0xf] }
 0x134   :  { %1090 = vst [vmem:[#allocation2 + $0x82c] sm:$0xf] %v1089_v32  ;;  %1092 = vst [vmem:[#allocation2 + $0x830] sm:$0xf] %v1091_v33  ;;  %v1095_v35 = vld [vmem:[%s13870_s3 + $0x824] sm:$0xf] }
 0x135   :  { %1094 = vst [vmem:[#allocation2 + $0x834] sm:$0xf] %v1093_v34  ;;  %v1101_v37 = vld [vmem:[%s13870_s3 + $0x858] sm:$0xf]  ;;  %1096 = vst [vmem:[#allocation2 + $0x838] sm:$0xf] %v1095_v35 }
 0x136   :  { %1102 = vst [vmem:[#allocation2 + $0x844] sm:$0xf] %v1101_v37  ;;  %v1103_v38 = vld [vmem:[%s13870_s3 + $0x844] sm:$0xf]  ;;  %v1105_v39 = vld [vmem:[%s13870_s3 + $0x85c] sm:$0xf] }
 0x137   :  { %v1107_v40 = vld [vmem:[%s13870_s3 + $0x848] sm:$0xf]  ;;  %1104 = vst [vmem:[#allocation2 + $0x848] sm:$0xf] %v1103_v38  ;;  %1106 = vst [vmem:[#allocation2 + $0x84c] sm:$0xf] %v1105_v39 }
 0x138   :  { %1108 = vst [vmem:[#allocation2 + $0x850] sm:$0xf] %v1107_v40  ;;  %v1109_v41 = vld [vmem:[%s13870_s3 + $0x860] sm:$0xf]  ;;  %v1111_v42 = vld [vmem:[%s13870_s3 + $0x84c] sm:$0xf] }
 0x139   :  { %v1113_v43 = vld [vmem:[%s13870_s3 + $0x864] sm:$0xf]  ;;  %1110 = vst [vmem:[#allocation2 + $0x854] sm:$0xf] %v1109_v41  ;;  %1112 = vst [vmem:[#allocation2 + $0x858] sm:$0xf] %v1111_v42 }
 0x13a   :  { %1114 = vst [vmem:[#allocation2 + $0x85c] sm:$0xf] %v1113_v43  ;;  %v1115_v44 = vld [vmem:[%s13870_s3 + $0x850] sm:$0xf]  ;;  %v1117_v45 = vld [vmem:[%s13870_s3 + $0x868] sm:$0xf] }
 0x13b   :  { %v1119_v46 = vld [vmem:[%s13870_s3 + $0x854] sm:$0xf]  ;;  %1116 = vst [vmem:[#allocation2 + $0x860] sm:$0xf] %v1115_v44  ;;  %1118 = vst [vmem:[#allocation2 + $0x864] sm:$0xf] %v1117_v45 }
 0x13c   :  { %1120 = vst [vmem:[#allocation2 + $0x868] sm:$0xf] %v1119_v46  ;;  %v1121_v47 = vld [vmem:[%s13870_s3 + $0x86c] sm:$0xff]   ;;  %v1125_v48 = vld [vmem:[%s13870_s3 + $0x888] sm:$0xf]  ;;  %v1145_v58 = vld [vmem:[%s13870_s3 + $0x89c] sm:$0xff]  }
 0x13d   :  { %v1127_v49 = vld [vmem:[%s13870_s3 + $0x874] sm:$0xf]  ;;  %1122 = vst [vmem:[#allocation2 + $0x86c] sm:$0xff] %v1121_v47   ;;  %1126 = vst [vmem:[#allocation2 + $0x874] sm:$0xf] %v1125_v48  ;;  %v1169_v5 = vld [vmem:[%s13870_s3 + $0x8cc] sm:$0xff]  }
 0x13e   :  { %1128 = vst [vmem:[#allocation2 + $0x878] sm:$0xf] %v1127_v49  ;;  %v1129_v50 = vld [vmem:[%s13870_s3 + $0x88c] sm:$0xf]  ;;  %v1131_v51 = vld [vmem:[%s13870_s3 + $0x878] sm:$0xf] }
 0x13f   :  { %v1133_v52 = vld [vmem:[%s13870_s3 + $0x890] sm:$0xf]  ;;  %1130 = vst [vmem:[#allocation2 + $0x87c] sm:$0xf] %v1129_v50  ;;  %1132 = vst [vmem:[#allocation2 + $0x880] sm:$0xf] %v1131_v51 }
 0x140   :  { %1134 = vst [vmem:[#allocation2 + $0x884] sm:$0xf] %v1133_v52  ;;  %v1135_v53 = vld [vmem:[%s13870_s3 + $0x87c] sm:$0xf]  ;;  %v1137_v54 = vld [vmem:[%s13870_s3 + $0x894] sm:$0xf] }
 0x141   :  { %v1139_v55 = vld [vmem:[%s13870_s3 + $0x880] sm:$0xf]  ;;  %1136 = vst [vmem:[#allocation2 + $0x888] sm:$0xf] %v1135_v53  ;;  %1138 = vst [vmem:[#allocation2 + $0x88c] sm:$0xf] %v1137_v54 }
 0x142   :  { %1140 = vst [vmem:[#allocation2 + $0x890] sm:$0xf] %v1139_v55  ;;  %v1141_v56 = vld [vmem:[%s13870_s3 + $0x898] sm:$0xf]  ;;  %v1143_v57 = vld [vmem:[%s13870_s3 + $0x884] sm:$0xf] }
 0x143   :  { %1142 = vst [vmem:[#allocation2 + $0x894] sm:$0xf] %v1141_v56  ;;  %1144 = vst [vmem:[#allocation2 + $0x898] sm:$0xf] %v1143_v57  ;;  %v1149_v59 = vld [vmem:[%s13870_s3 + $0x8b8] sm:$0xf] }
 0x144   :  { %1146 = vst [vmem:[#allocation2 + $0x89c] sm:$0xff] %v1145_v58   ;;  %v1151_v60 = vld [vmem:[%s13870_s3 + $0x8a4] sm:$0xf]  ;;  %v1153_v61 = vld [vmem:[%s13870_s3 + $0x8bc] sm:$0xf]  ;;  %1170 = vst [vmem:[#allocation2 + $0x8cc] sm:$0xff] %v1169_v5  }
 0x145   :  { %1150 = vst [vmem:[#allocation2 + $0x8a4] sm:$0xf] %v1149_v59  ;;  %1152 = vst [vmem:[#allocation2 + $0x8a8] sm:$0xf] %v1151_v60  ;;  %v1155_v62 = vld [vmem:[%s13870_s3 + $0x8a8] sm:$0xf] }
 0x146   :  { %1154 = vst [vmem:[#allocation2 + $0x8ac] sm:$0xf] %v1153_v61  ;;  %v1157_v63 = vld [vmem:[%s13870_s3 + $0x8c0] sm:$0xf]  ;;  %v1159_v0 = vld [vmem:[%s13870_s3 + $0x8ac] sm:$0xf] }
 0x147   :  { %1156 = vst [vmem:[#allocation2 + $0x8b0] sm:$0xf] %v1155_v62  ;;  %1158 = vst [vmem:[#allocation2 + $0x8b4] sm:$0xf] %v1157_v63  ;;  %v1161_v1 = vld [vmem:[%s13870_s3 + $0x8c4] sm:$0xf] }
 0x148   :  { %1160 = vst [vmem:[#allocation2 + $0x8b8] sm:$0xf] %v1159_v0  ;;  %v1163_v2 = vld [vmem:[%s13870_s3 + $0x8b0] sm:$0xf]  ;;  %v1165_v3 = vld [vmem:[%s13870_s3 + $0x8c8] sm:$0xf] }
 0x149   :  { %1162 = vst [vmem:[#allocation2 + $0x8bc] sm:$0xf] %v1161_v1  ;;  %1164 = vst [vmem:[#allocation2 + $0x8c0] sm:$0xf] %v1163_v2  ;;  %v1167_v4 = vld [vmem:[%s13870_s3 + $0x8b4] sm:$0xf] }
 0x14a   :  { %1166 = vst [vmem:[#allocation2 + $0x8c4] sm:$0xf] %v1165_v3  ;;  %v1173_v6 = vld [vmem:[%s13870_s3 + $0x8e8] sm:$0xf]  ;;  %1168 = vst [vmem:[#allocation2 + $0x8c8] sm:$0xf] %v1167_v4 }
 0x14b   :  { %1174 = vst [vmem:[#allocation2 + $0x8d4] sm:$0xf] %v1173_v6  ;;  %v1175_v7 = vld [vmem:[%s13870_s3 + $0x8d4] sm:$0xf]  ;;  %v1177_v8 = vld [vmem:[%s13870_s3 + $0x8ec] sm:$0xf] }
 0x14c   :  { %v1179_v9 = vld [vmem:[%s13870_s3 + $0x8d8] sm:$0xf]  ;;  %1176 = vst [vmem:[#allocation2 + $0x8d8] sm:$0xf] %v1175_v7  ;;  %1178 = vst [vmem:[#allocation2 + $0x8dc] sm:$0xf] %v1177_v8 }
 0x14d   :  { %1180 = vst [vmem:[#allocation2 + $0x8e0] sm:$0xf] %v1179_v9  ;;  %v1181_v10 = vld [vmem:[%s13870_s3 + $0x8f0] sm:$0xf]  ;;  %v1183_v11 = vld [vmem:[%s13870_s3 + $0x8dc] sm:$0xf] }
 0x14e   :  { %v1185_v12 = vld [vmem:[%s13870_s3 + $0x8f4] sm:$0xf]  ;;  %1182 = vst [vmem:[#allocation2 + $0x8e4] sm:$0xf] %v1181_v10  ;;  %1184 = vst [vmem:[#allocation2 + $0x8e8] sm:$0xf] %v1183_v11 }
 0x14f   :  { %1186 = vst [vmem:[#allocation2 + $0x8ec] sm:$0xf] %v1185_v12  ;;  %v1187_v13 = vld [vmem:[%s13870_s3 + $0x8e0] sm:$0xf]  ;;  %v1189_v14 = vld [vmem:[%s13870_s3 + $0x8f8] sm:$0xf] }
 0x150   :  { %v1191_v15 = vld [vmem:[%s13870_s3 + $0x8e4] sm:$0xf]  ;;  %1188 = vst [vmem:[#allocation2 + $0x8f0] sm:$0xf] %v1187_v13  ;;  %1190 = vst [vmem:[#allocation2 + $0x8f4] sm:$0xf] %v1189_v14 }
 0x151   :  { %1192 = vst [vmem:[#allocation2 + $0x8f8] sm:$0xf] %v1191_v15  ;;  %v1193_v16 = vld [vmem:[%s13870_s3 + $0x8fc] sm:$0xff]   ;;  %v1197_v17 = vld [vmem:[%s13870_s3 + $0x918] sm:$0xf]  ;;  %v1217_v27 = vld [vmem:[%s13870_s3 + $0x92c] sm:$0xff]  }
 0x152   :  { %v1199_v18 = vld [vmem:[%s13870_s3 + $0x904] sm:$0xf]  ;;  %1194 = vst [vmem:[#allocation2 + $0x8fc] sm:$0xff] %v1193_v16   ;;  %1198 = vst [vmem:[#allocation2 + $0x904] sm:$0xf] %v1197_v17 }
 0x153   :  { %1200 = vst [vmem:[#allocation2 + $0x908] sm:$0xf] %v1199_v18  ;;  %v1201_v19 = vld [vmem:[%s13870_s3 + $0x91c] sm:$0xf]  ;;  %v1203_v20 = vld [vmem:[%s13870_s3 + $0x908] sm:$0xf] }
 0x154   :  { %v1205_v21 = vld [vmem:[%s13870_s3 + $0x920] sm:$0xf]  ;;  %1202 = vst [vmem:[#allocation2 + $0x90c] sm:$0xf] %v1201_v19  ;;  %1204 = vst [vmem:[#allocation2 + $0x910] sm:$0xf] %v1203_v20 }
 0x155   :  { %1206 = vst [vmem:[#allocation2 + $0x914] sm:$0xf] %v1205_v21  ;;  %v1207_v22 = vld [vmem:[%s13870_s3 + $0x90c] sm:$0xf]  ;;  %v1209_v23 = vld [vmem:[%s13870_s3 + $0x924] sm:$0xf] }
 0x156   :  { %v1211_v24 = vld [vmem:[%s13870_s3 + $0x910] sm:$0xf]  ;;  %1208 = vst [vmem:[#allocation2 + $0x918] sm:$0xf] %v1207_v22  ;;  %1210 = vst [vmem:[#allocation2 + $0x91c] sm:$0xf] %v1209_v23 }
 0x157   :  { %1212 = vst [vmem:[#allocation2 + $0x920] sm:$0xf] %v1211_v24  ;;  %v1213_v25 = vld [vmem:[%s13870_s3 + $0x928] sm:$0xf]  ;;  %v1215_v26 = vld [vmem:[%s13870_s3 + $0x914] sm:$0xf] }
 0x158   :  { %1214 = vst [vmem:[#allocation2 + $0x924] sm:$0xf] %v1213_v25  ;;  %1216 = vst [vmem:[#allocation2 + $0x928] sm:$0xf] %v1215_v26  ;;  %v1221_v28 = vld [vmem:[%s13870_s3 + $0x948] sm:$0xf] }
 0x159   :  { %1218 = vst [vmem:[#allocation2 + $0x92c] sm:$0xff] %v1217_v27   ;;  %v1223_v29 = vld [vmem:[%s13870_s3 + $0x934] sm:$0xf]  ;;  %v1225_v30 = vld [vmem:[%s13870_s3 + $0x94c] sm:$0xf] }
 0x15a   :  { %1222 = vst [vmem:[#allocation2 + $0x934] sm:$0xf] %v1221_v28  ;;  %1224 = vst [vmem:[#allocation2 + $0x938] sm:$0xf] %v1223_v29  ;;  %v1227_v31 = vld [vmem:[%s13870_s3 + $0x938] sm:$0xf] }
 0x15b   :  { %1226 = vst [vmem:[#allocation2 + $0x93c] sm:$0xf] %v1225_v30  ;;  %v1229_v32 = vld [vmem:[%s13870_s3 + $0x950] sm:$0xf]  ;;  %v1231_v33 = vld [vmem:[%s13870_s3 + $0x93c] sm:$0xf] }
 0x15c   :  { %1228 = vst [vmem:[#allocation2 + $0x940] sm:$0xf] %v1227_v31  ;;  %1230 = vst [vmem:[#allocation2 + $0x944] sm:$0xf] %v1229_v32  ;;  %v1233_v34 = vld [vmem:[%s13870_s3 + $0x954] sm:$0xf] }
 0x15d   :  { %1232 = vst [vmem:[#allocation2 + $0x948] sm:$0xf] %v1231_v33  ;;  %v1235_v35 = vld [vmem:[%s13870_s3 + $0x940] sm:$0xf]  ;;  %v1237_v36 = vld [vmem:[%s13870_s3 + $0x958] sm:$0xf] }
 0x15e   :  { %1234 = vst [vmem:[#allocation2 + $0x94c] sm:$0xf] %v1233_v34  ;;  %1236 = vst [vmem:[#allocation2 + $0x950] sm:$0xf] %v1235_v35  ;;  %v1239_v37 = vld [vmem:[%s13870_s3 + $0x944] sm:$0xf] }
 0x15f   :  { %1238 = vst [vmem:[#allocation2 + $0x954] sm:$0xf] %v1237_v36  ;;  %v1241_v38 = vld [vmem:[%s13870_s3 + $0x95c] sm:$0xf]  ;;  %1240 = vst [vmem:[#allocation2 + $0x958] sm:$0xf] %v1239_v37 }
 0x160   :  { %1242 = vst [vmem:[#allocation2 + $0x95c] sm:$0xf] %v1241_v38 }
 0x161   :  { %4906 = vsyncadd [#allocation4], 38400  ;;  %v4940_v39 = vld [vmem:[%s13871_s4] sm:$0xff]  ;;  %v4942_v40 = vld [vmem:[%s13871_s4 + $0x8] sm:$0xff] }
 0x162   :  { %4941 = vst [vmem:[#allocation3] sm:$0xff] %v4940_v39  ;;  %4943 = vst [vmem:[#allocation3 + $0x8] sm:$0xff] %v4942_v40  ;;  %v4944_v41 = vld [vmem:[%s13871_s4 + $0x10] sm:$0xff]  ;;  %v4946_v42 = vld [vmem:[%s13871_s4 + $0x18] sm:$0xff] }
 0x163   :  { %v4948_v43 = vld [vmem:[%s13871_s4 + $0x20] sm:$0xff]  ;;  %4945 = vst [vmem:[#allocation3 + $0x10] sm:$0xff] %v4944_v41  ;;  %4947 = vst [vmem:[#allocation3 + $0x18] sm:$0xff] %v4946_v42  ;;  %v4950_v44 = vld [vmem:[%s13871_s4 + $0x28] sm:$0xff] }
 0x164   :  { %4949 = vst [vmem:[#allocation3 + $0x20] sm:$0xff] %v4948_v43  ;;  %v4952_v45 = vld [vmem:[%s13871_s4 + $0x30] sm:$0xff]  ;;  %v4954_v46 = vld [vmem:[%s13871_s4 + $0x38] sm:$0xff]  ;;  %4951 = vst [vmem:[#allocation3 + $0x28] sm:$0xff] %v4950_v44 }
 0x165   :  { %4953 = vst [vmem:[#allocation3 + $0x30] sm:$0xff] %v4952_v45  ;;  %4955 = vst [vmem:[#allocation3 + $0x38] sm:$0xff] %v4954_v46  ;;  %v4956_v47 = vld [vmem:[%s13871_s4 + $0x40] sm:$0xff]  ;;  %v4958_v48 = vld [vmem:[%s13871_s4 + $0x48] sm:$0xff] }
 0x166   :  { %v4960_v49 = vld [vmem:[%s13871_s4 + $0x50] sm:$0xff]  ;;  %4957 = vst [vmem:[#allocation3 + $0x40] sm:$0xff] %v4956_v47  ;;  %4959 = vst [vmem:[#allocation3 + $0x48] sm:$0xff] %v4958_v48  ;;  %v4962_v50 = vld [vmem:[%s13871_s4 + $0x58] sm:$0xff] }
 0x167   :  { %4961 = vst [vmem:[#allocation3 + $0x50] sm:$0xff] %v4960_v49  ;;  %v4964_v51 = vld [vmem:[%s13871_s4 + $0x60] sm:$0xff]  ;;  %v4966_v52 = vld [vmem:[%s13871_s4 + $0x68] sm:$0xff]  ;;  %4963 = vst [vmem:[#allocation3 + $0x58] sm:$0xff] %v4962_v50 }
 0x168   :  { %4965 = vst [vmem:[#allocation3 + $0x60] sm:$0xff] %v4964_v51  ;;  %4967 = vst [vmem:[#allocation3 + $0x68] sm:$0xff] %v4966_v52  ;;  %v4968_v53 = vld [vmem:[%s13871_s4 + $0x70] sm:$0xff]  ;;  %v4970_v54 = vld [vmem:[%s13871_s4 + $0x78] sm:$0xff] }
 0x169   :  { %v4972_v55 = vld [vmem:[%s13871_s4 + $0x80] sm:$0xff]  ;;  %4969 = vst [vmem:[#allocation3 + $0x70] sm:$0xff] %v4968_v53  ;;  %4971 = vst [vmem:[#allocation3 + $0x78] sm:$0xff] %v4970_v54  ;;  %v4974_v56 = vld [vmem:[%s13871_s4 + $0x88] sm:$0xff] }
 0x16a   :  { %4973 = vst [vmem:[#allocation3 + $0x80] sm:$0xff] %v4972_v55  ;;  %v4976_v57 = vld [vmem:[%s13871_s4 + $0x90] sm:$0xff]  ;;  %v4978_v58 = vld [vmem:[%s13871_s4 + $0x98] sm:$0xff]  ;;  %4975 = vst [vmem:[#allocation3 + $0x88] sm:$0xff] %v4974_v56 }
 0x16b   :  { %4977 = vst [vmem:[#allocation3 + $0x90] sm:$0xff] %v4976_v57  ;;  %4979 = vst [vmem:[#allocation3 + $0x98] sm:$0xff] %v4978_v58  ;;  %v4980_v59 = vld [vmem:[%s13871_s4 + $0xa0] sm:$0xff]  ;;  %v4982_v60 = vld [vmem:[%s13871_s4 + $0xa8] sm:$0xff] }
 0x16c   :  { %v4984_v61 = vld [vmem:[%s13871_s4 + $0xb0] sm:$0xff]  ;;  %4981 = vst [vmem:[#allocation3 + $0xa0] sm:$0xff] %v4980_v59  ;;  %4983 = vst [vmem:[#allocation3 + $0xa8] sm:$0xff] %v4982_v60  ;;  %v4986_v62 = vld [vmem:[%s13871_s4 + $0xb8] sm:$0xff] }
 0x16d   :  { %4985 = vst [vmem:[#allocation3 + $0xb0] sm:$0xff] %v4984_v61  ;;  %v4988_v63 = vld [vmem:[%s13871_s4 + $0xc0] sm:$0xff]  ;;  %v4990_v0 = vld [vmem:[%s13871_s4 + $0xc8] sm:$0xff]  ;;  %4987 = vst [vmem:[#allocation3 + $0xb8] sm:$0xff] %v4986_v62 }
 0x16e   :  { %4989 = vst [vmem:[#allocation3 + $0xc0] sm:$0xff] %v4988_v63  ;;  %4991 = vst [vmem:[#allocation3 + $0xc8] sm:$0xff] %v4990_v0  ;;  %v4992_v1 = vld [vmem:[%s13871_s4 + $0xd0] sm:$0xff]  ;;  %v4994_v2 = vld [vmem:[%s13871_s4 + $0xd8] sm:$0xff] }
 0x16f   :  { %v4996_v3 = vld [vmem:[%s13871_s4 + $0xe0] sm:$0xff]  ;;  %4993 = vst [vmem:[#allocation3 + $0xd0] sm:$0xff] %v4992_v1  ;;  %4995 = vst [vmem:[#allocation3 + $0xd8] sm:$0xff] %v4994_v2  ;;  %v4998_v4 = vld [vmem:[%s13871_s4 + $0xe8] sm:$0xff] }
 0x170   :  { %4997 = vst [vmem:[#allocation3 + $0xe0] sm:$0xff] %v4996_v3  ;;  %v5000_v5 = vld [vmem:[%s13871_s4 + $0xf0] sm:$0xff]  ;;  %v5002_v6 = vld [vmem:[%s13871_s4 + $0xf8] sm:$0xff]  ;;  %4999 = vst [vmem:[#allocation3 + $0xe8] sm:$0xff] %v4998_v4 }
 0x171   :  { %5001 = vst [vmem:[#allocation3 + $0xf0] sm:$0xff] %v5000_v5  ;;  %5003 = vst [vmem:[#allocation3 + $0xf8] sm:$0xff] %v5002_v6  ;;  %v5004_v7 = vld [vmem:[%s13871_s4 + $0x100] sm:$0xff]  ;;  %v5006_v8 = vld [vmem:[%s13871_s4 + $0x108] sm:$0xff] }
 0x172   :  { %v5008_v9 = vld [vmem:[%s13871_s4 + $0x110] sm:$0xff]  ;;  %5005 = vst [vmem:[#allocation3 + $0x100] sm:$0xff] %v5004_v7  ;;  %5007 = vst [vmem:[#allocation3 + $0x108] sm:$0xff] %v5006_v8  ;;  %v5010_v10 = vld [vmem:[%s13871_s4 + $0x118] sm:$0xff] }
 0x173   :  { %5009 = vst [vmem:[#allocation3 + $0x110] sm:$0xff] %v5008_v9  ;;  %v5012_v11 = vld [vmem:[%s13871_s4 + $0x120] sm:$0xff]  ;;  %v5014_v12 = vld [vmem:[%s13871_s4 + $0x128] sm:$0xff]  ;;  %5011 = vst [vmem:[#allocation3 + $0x118] sm:$0xff] %v5010_v10 }
 0x174   :  { %5013 = vst [vmem:[#allocation3 + $0x120] sm:$0xff] %v5012_v11  ;;  %5015 = vst [vmem:[#allocation3 + $0x128] sm:$0xff] %v5014_v12  ;;  %v5016_v13 = vld [vmem:[%s13871_s4 + $0x130] sm:$0xff]  ;;  %v5018_v14 = vld [vmem:[%s13871_s4 + $0x138] sm:$0xff] }
 0x175   :  { %v5020_v15 = vld [vmem:[%s13871_s4 + $0x140] sm:$0xff]  ;;  %5017 = vst [vmem:[#allocation3 + $0x130] sm:$0xff] %v5016_v13  ;;  %5019 = vst [vmem:[#allocation3 + $0x138] sm:$0xff] %v5018_v14  ;;  %v5022_v16 = vld [vmem:[%s13871_s4 + $0x148] sm:$0xff] }
 0x176   :  { %5021 = vst [vmem:[#allocation3 + $0x140] sm:$0xff] %v5020_v15  ;;  %v5024_v17 = vld [vmem:[%s13871_s4 + $0x150] sm:$0xff]  ;;  %v5026_v18 = vld [vmem:[%s13871_s4 + $0x158] sm:$0xff]  ;;  %5023 = vst [vmem:[#allocation3 + $0x148] sm:$0xff] %v5022_v16 }
 0x177   :  { %5025 = vst [vmem:[#allocation3 + $0x150] sm:$0xff] %v5024_v17  ;;  %5027 = vst [vmem:[#allocation3 + $0x158] sm:$0xff] %v5026_v18  ;;  %v5028_v19 = vld [vmem:[%s13871_s4 + $0x160] sm:$0xff]  ;;  %v5030_v20 = vld [vmem:[%s13871_s4 + $0x168] sm:$0xff] }
 0x178   :  { %v5032_v21 = vld [vmem:[%s13871_s4 + $0x170] sm:$0xff]  ;;  %5029 = vst [vmem:[#allocation3 + $0x160] sm:$0xff] %v5028_v19  ;;  %5031 = vst [vmem:[#allocation3 + $0x168] sm:$0xff] %v5030_v20  ;;  %v5034_v22 = vld [vmem:[%s13871_s4 + $0x178] sm:$0xff] }
 0x179   :  { %5033 = vst [vmem:[#allocation3 + $0x170] sm:$0xff] %v5032_v21  ;;  %v5036_v23 = vld [vmem:[%s13871_s4 + $0x180] sm:$0xff]  ;;  %v5038_v24 = vld [vmem:[%s13871_s4 + $0x188] sm:$0xff]  ;;  %5035 = vst [vmem:[#allocation3 + $0x178] sm:$0xff] %v5034_v22 }
 0x17a   :  { %5037 = vst [vmem:[#allocation3 + $0x180] sm:$0xff] %v5036_v23  ;;  %5039 = vst [vmem:[#allocation3 + $0x188] sm:$0xff] %v5038_v24  ;;  %v5040_v25 = vld [vmem:[%s13871_s4 + $0x190] sm:$0xff]  ;;  %v5042_v26 = vld [vmem:[%s13871_s4 + $0x198] sm:$0xff] }
 0x17b   :  { %v5044_v27 = vld [vmem:[%s13871_s4 + $0x1a0] sm:$0xff]  ;;  %5041 = vst [vmem:[#allocation3 + $0x190] sm:$0xff] %v5040_v25  ;;  %5043 = vst [vmem:[#allocation3 + $0x198] sm:$0xff] %v5042_v26  ;;  %v5046_v28 = vld [vmem:[%s13871_s4 + $0x1a8] sm:$0xff] }
 0x17c   :  { %5045 = vst [vmem:[#allocation3 + $0x1a0] sm:$0xff] %v5044_v27  ;;  %v5048_v29 = vld [vmem:[%s13871_s4 + $0x1b0] sm:$0xff]  ;;  %v5050_v30 = vld [vmem:[%s13871_s4 + $0x1b8] sm:$0xff]  ;;  %5047 = vst [vmem:[#allocation3 + $0x1a8] sm:$0xff] %v5046_v28 }
 0x17d   :  { %5049 = vst [vmem:[#allocation3 + $0x1b0] sm:$0xff] %v5048_v29  ;;  %5051 = vst [vmem:[#allocation3 + $0x1b8] sm:$0xff] %v5050_v30  ;;  %v5052_v31 = vld [vmem:[%s13871_s4 + $0x1c0] sm:$0xff]  ;;  %v5054_v32 = vld [vmem:[%s13871_s4 + $0x1c8] sm:$0xff] }
 0x17e   :  { %v5056_v33 = vld [vmem:[%s13871_s4 + $0x1d0] sm:$0xff]  ;;  %5053 = vst [vmem:[#allocation3 + $0x1c0] sm:$0xff] %v5052_v31  ;;  %5055 = vst [vmem:[#allocation3 + $0x1c8] sm:$0xff] %v5054_v32  ;;  %v5058_v34 = vld [vmem:[%s13871_s4 + $0x1d8] sm:$0xff] }
 0x17f   :  { %5057 = vst [vmem:[#allocation3 + $0x1d0] sm:$0xff] %v5056_v33  ;;  %v5060_v35 = vld [vmem:[%s13871_s4 + $0x1e0] sm:$0xff]  ;;  %v5062_v36 = vld [vmem:[%s13871_s4 + $0x1e8] sm:$0xff]  ;;  %5059 = vst [vmem:[#allocation3 + $0x1d8] sm:$0xff] %v5058_v34 }
 0x180   :  { %5061 = vst [vmem:[#allocation3 + $0x1e0] sm:$0xff] %v5060_v35  ;;  %5063 = vst [vmem:[#allocation3 + $0x1e8] sm:$0xff] %v5062_v36  ;;  %v5064_v37 = vld [vmem:[%s13871_s4 + $0x1f0] sm:$0xff]  ;;  %v5066_v38 = vld [vmem:[%s13871_s4 + $0x1f8] sm:$0xff] }
 0x181   :  { %v5068_v39 = vld [vmem:[%s13871_s4 + $0x200] sm:$0xff]  ;;  %5065 = vst [vmem:[#allocation3 + $0x1f0] sm:$0xff] %v5064_v37  ;;  %5067 = vst [vmem:[#allocation3 + $0x1f8] sm:$0xff] %v5066_v38  ;;  %v5070_v40 = vld [vmem:[%s13871_s4 + $0x208] sm:$0xff] }
 0x182   :  { %5069 = vst [vmem:[#allocation3 + $0x200] sm:$0xff] %v5068_v39  ;;  %v5072_v41 = vld [vmem:[%s13871_s4 + $0x210] sm:$0xff]  ;;  %v5074_v42 = vld [vmem:[%s13871_s4 + $0x218] sm:$0xff]  ;;  %5071 = vst [vmem:[#allocation3 + $0x208] sm:$0xff] %v5070_v40 }
 0x183   :  { %5073 = vst [vmem:[#allocation3 + $0x210] sm:$0xff] %v5072_v41  ;;  %5075 = vst [vmem:[#allocation3 + $0x218] sm:$0xff] %v5074_v42  ;;  %v5076_v43 = vld [vmem:[%s13871_s4 + $0x220] sm:$0xff]  ;;  %v5078_v44 = vld [vmem:[%s13871_s4 + $0x228] sm:$0xff] }
 0x184   :  { %v5080_v45 = vld [vmem:[%s13871_s4 + $0x230] sm:$0xff]  ;;  %5077 = vst [vmem:[#allocation3 + $0x220] sm:$0xff] %v5076_v43  ;;  %5079 = vst [vmem:[#allocation3 + $0x228] sm:$0xff] %v5078_v44  ;;  %v5082_v46 = vld [vmem:[%s13871_s4 + $0x238] sm:$0xff] }
 0x185   :  { %5081 = vst [vmem:[#allocation3 + $0x230] sm:$0xff] %v5080_v45  ;;  %v5084_v47 = vld [vmem:[%s13871_s4 + $0x240] sm:$0xff]  ;;  %v5086_v48 = vld [vmem:[%s13871_s4 + $0x248] sm:$0xff]  ;;  %5083 = vst [vmem:[#allocation3 + $0x238] sm:$0xff] %v5082_v46 }
 0x186   :  { %5085 = vst [vmem:[#allocation3 + $0x240] sm:$0xff] %v5084_v47  ;;  %5087 = vst [vmem:[#allocation3 + $0x248] sm:$0xff] %v5086_v48  ;;  %v5088_v49 = vld [vmem:[%s13871_s4 + $0x250] sm:$0xff]  ;;  %v5090_v50 = vld [vmem:[%s13871_s4 + $0x258] sm:$0xff] }
 0x187   :  { %v5092_v51 = vld [vmem:[%s13871_s4 + $0x260] sm:$0xff]  ;;  %5089 = vst [vmem:[#allocation3 + $0x250] sm:$0xff] %v5088_v49  ;;  %5091 = vst [vmem:[#allocation3 + $0x258] sm:$0xff] %v5090_v50  ;;  %v5094_v52 = vld [vmem:[%s13871_s4 + $0x268] sm:$0xff] }
 0x188   :  { %5093 = vst [vmem:[#allocation3 + $0x260] sm:$0xff] %v5092_v51  ;;  %v5096_v53 = vld [vmem:[%s13871_s4 + $0x270] sm:$0xff]  ;;  %v5098_v54 = vld [vmem:[%s13871_s4 + $0x278] sm:$0xff]  ;;  %5095 = vst [vmem:[#allocation3 + $0x268] sm:$0xff] %v5094_v52 }
 0x189   :  { %5097 = vst [vmem:[#allocation3 + $0x270] sm:$0xff] %v5096_v53  ;;  %5099 = vst [vmem:[#allocation3 + $0x278] sm:$0xff] %v5098_v54  ;;  %v5100_v55 = vld [vmem:[%s13871_s4 + $0x280] sm:$0xff]  ;;  %v5102_v56 = vld [vmem:[%s13871_s4 + $0x288] sm:$0xff] }
 0x18a   :  { %v5104_v57 = vld [vmem:[%s13871_s4 + $0x290] sm:$0xff]  ;;  %5101 = vst [vmem:[#allocation3 + $0x280] sm:$0xff] %v5100_v55  ;;  %5103 = vst [vmem:[#allocation3 + $0x288] sm:$0xff] %v5102_v56  ;;  %v5106_v58 = vld [vmem:[%s13871_s4 + $0x298] sm:$0xff] }
 0x18b   :  { %5105 = vst [vmem:[#allocation3 + $0x290] sm:$0xff] %v5104_v57  ;;  %v5108_v59 = vld [vmem:[%s13871_s4 + $0x2a0] sm:$0xff]  ;;  %5107 = vst [vmem:[#allocation3 + $0x298] sm:$0xff] %v5106_v58 }
 0x18c   :  { %5109 = vst [vmem:[#allocation3 + $0x2a0] sm:$0xff] %v5108_v59 }
 0x18d   :  { %5117 = vsyncadd [#allocation4 + $0x1], 10880  ;;  %vm5133_vm0 = vcmask 1044480   ;;  %v10228_v60 = vld [vmem:[%s13868_s1 + $0x4] ss:$8 sps:$4 sm:$0x1f]  }
 0x18e   :  { %v10230_v61 = vld [vmem:[%s13868_s1] ss:$8 sps:$4 sm:$0x1f]   ;;  %9470 = vmatprep.subr.msk.bf16.mxu1 %vm5133_vm0, %v10228_v60  ;;  %v10533_v1 = vmov 0   ;;  %v5199_v5 = vld [vmem:[%s13872_s5 + $0x90] sm:$0xff]  ;;  %vm5129_vm1 = vcmask 80896  }
 0x18f   :  { %v5197_v62 = vld [vmem:[%s13872_s5 + $0x80] sm:$0xff]  ;;  %v5198_v63 = vld [vmem:[%s13872_s5 + $0x88] sm:$0xff]  ;;  %v5135_v0 = vsel %vm5133_vm0, %v10230_v61, 0  ;;  %5172 = vmatprep.mubr.bf16.mxu1 %v10533_v1  ;;  %v5200_v8 = vld [vmem:[%s13872_s5 + $0x98] sm:$0xff]  ;;  %vm5219_vm2 = vcmask 1041408   ;;  %vm5250_vm3 = vcmask 1040384  }
 0x190   :  { %v9950_v2 = vpack.c.bf16 %v5198_v63, %v5197_v62  ;;  %v5181_v3 = vld [vmem:[%s13872_s5] sm:$0xff]  ;;  %v5182_v4 = vld [vmem:[%s13872_s5 + $0x8] sm:$0xff]  ;;  %5141 = vmatpush1.bf16.msra.mxu1 %v5135_v0  ;;  %v9954_v9 = vpack.c.bf16 %v5200_v8, %v5199_v5  ;;  %v5183_v10 = vld [vmem:[%s13872_s5 + $0x10] sm:$0xff]  ;;  %vm5342_vm4 = vcmask 130048   ;;  %vm10536_vm5 = vmmov 0  }
 0x191   :  { %v5118_v6 = vld [vmem:[%s13867_s0] sm:$0x1]  ;;  %v9952_v7 = vpack.c.bf16 %v5182_v4, %v5181_v3  ;;  %v5184_v11 = vld [vmem:[%s13872_s5 + $0x18] sm:$0xff]  ;;  %v5202_v13 = vld [vmem:[%s13872_s5 + $0xa8] sm:$0xff]  ;;  %vm6459_vm6 = vcmask 254976   ;;  %vm6530_vm7 = vcmask 261120  }
 0x192   :  { %9951 = vmatprep.subr.bf16.mxu1 %v9950_v2  ;;  %v5201_v12 = vld [vmem:[%s13872_s5 + $0xa0] sm:$0xff]  ;;  %v5186_v15 = vld [vmem:[%s13872_s5 + $0x28] sm:$0xff]  ;;  %v9956_v16 = vpack.c.bf16 %v5184_v11, %v5183_v10  ;;  %v5203_v17 = vld [vmem:[%s13872_s5 + $0xb0] sm:$0xff]  ;;  %vm6833_vm8 = vcmask 64512  }
 0x193   :  { %9471 = vmatmul.mubr.msk.bf16.vlgmr.msra.gmra.mrb[0].mxu1 %vm5129_vm1, %v5118_v6  ;;  %v5185_v14 = vld [vmem:[%s13872_s5 + $0x20] sm:$0xff]  ;;  %v5204_v18 = vld [vmem:[%s13872_s5 + $0xb8] sm:$0xff]  ;;  %v9958_v19 = vpack.c.bf16 %v5202_v13, %v5201_v12  ;;  %v5187_v22 = vld [vmem:[%s13872_s5 + $0x30] sm:$0xff] }
 0x194   :  { %9953 = vmatpush3.bf16.msra.mxu1 %v9952_v7  ;;  %v9960_v20 = vpack.c.bf16 %v5186_v15, %v5185_v14  ;;  %v9962_v21 = vpack.c.bf16 %v5204_v18, %v5203_v17  ;;  %v5188_v23 = vld [vmem:[%s13872_s5 + $0x38] sm:$0xff]  ;;  %v5205_v25 = vld [vmem:[%s13872_s5 + $0xc0] sm:$0xff]  ;;  %v5206_v26 = vld [vmem:[%s13872_s5 + $0xc8] sm:$0xff] }
 0x195   :  { %9955 = vmatprep.subr.bf16.mxu1 %v9954_v9  ;;  %v9964_v24 = vpack.c.bf16 %v5188_v23, %v5187_v22  ;;  %v9966_v27 = vpack.c.bf16 %v5206_v26, %v5205_v25  ;;  %v5189_v28 = vld [vmem:[%s13872_s5 + $0x40] sm:$0xff]  ;;  %v5190_v29 = vld [vmem:[%s13872_s5 + $0x48] sm:$0xff]  ;;  %v5207_v31 = vld [vmem:[%s13872_s5 + $0xd0] sm:$0xff] }
 0x196   :  { %v9968_v30 = vpack.c.bf16 %v5190_v29, %v5189_v28  ;;  %v5208_v32 = vld [vmem:[%s13872_s5 + $0xd8] sm:$0xff]  ;;  %v5191_v34 = vld [vmem:[%s13872_s5 + $0x50] sm:$0xff]  ;;  %v5209_v37 = vld [vmem:[%s13872_s5 + $0xe0] sm:$0xff]  ;;  %v10534_v28 = vmov 0.0  }
 0x197   :  { %v9970_v33 = vpack.c.bf16 %v5208_v32, %v5207_v31  ;;  %v5192_v35 = vld [vmem:[%s13872_s5 + $0x58] sm:$0xff]  ;;  %v5210_v38 = vld [vmem:[%s13872_s5 + $0xe8] sm:$0xff]  ;;  %v5193_v40 = vld [vmem:[%s13872_s5 + $0x60] sm:$0xff]  ;;  %5410 = vmatprep.mubr.f32.mxu0 %v10534_v28 }
 0x198   :  { %9957 = vmatpush3.bf16.msra.mxu1 %v9956_v16  ;;  %v9972_v36 = vpack.c.bf16 %v5192_v35, %v5191_v34  ;;  %v9974_v39 = vpack.c.bf16 %v5210_v38, %v5209_v37  ;;  %v5194_v41 = vld [vmem:[%s13872_s5 + $0x68] sm:$0xff]  ;;  %v5211_v43 = vld [vmem:[%s13872_s5 + $0xf0] sm:$0xff]  ;;  %v5212_v44 = vld [vmem:[%s13872_s5 + $0xf8] sm:$0xff] }
 0x199   :  { %9959 = vmatprep.subr.bf16.mxu1 %v9958_v19  ;;  %v9976_v42 = vpack.c.bf16 %v5194_v41, %v5193_v40  ;;  %v5195_v45 = vld [vmem:[%s13872_s5 + $0x70] sm:$0xff]  ;;  %v9978_v46 = vpack.c.bf16 %v5212_v44, %v5211_v43  ;;  %v5196_v47 = vld [vmem:[%s13872_s5 + $0x78] sm:$0xff]  ;;  %v5214_v22 = vld [vmem:[%s13873_s6 + $0x8] sm:$0xff] }
 0x19a   :  { %v9980_v48 = vpack.c.bf16 %v5196_v47, %v5195_v45  ;;  %v5216_v23 = vld [vmem:[%s13873_s6 + $0x80] sm:$0xff]  ;;  %v5215_v26 = vld [vmem:[%s13873_s6 + $0x78] sm:$0xff]  ;;  %v10236_v31 = vld [vmem:[%s13869_s2 + $0xc] ss:$28 sps:$4 sm:$0xff]  }
 0x19b   :  { %v5213_v25 = vld [vmem:[%s13873_s6] sm:$0xff]  ;;  %v10248_v34 = vld [vmem:[%s13869_s2 + $0x7c] ss:$28 sps:$4 sm:$0xff]   ;;  %v10252_v37 = vld [vmem:[%s13869_s2 + $0xb0] ss:$28 sps:$4 sm:$0xff]  }
 0x19c   :  { %9961 = vmatpush3.bf16.msra.mxu1 %v9960_v20  ;;  %v10233_v29 = vld [vmem:[%s13869_s2 + $0x4] ss:$28 sps:$4 sm:$0xff]   ;;  %v10246_v35 = vld [vmem:[%s13869_s2 + $0x78] ss:$28 sps:$4 sm:$0xff]   ;;  %v10260_v38 = vld [vmem:[%s13869_s2 + $0xec] ss:$28 sps:$4 sm:$0xff]  }
 0x19d   :  { %9963 = vmatprep.subr.bf16.mxu1 %v9962_v21  ;;  %v10242_v32 = vld [vmem:[%s13869_s2 + $0x44] ss:$28 sps:$4 sm:$0xff]   ;;  %v10270_v43 = vld [vmem:[%s13869_s2 + $0x158] ss:$28 sps:$4 sm:$0xff]   ;;  %v10276_v45 = vld [vmem:[%s13869_s2 + $0x190] ss:$28 sps:$4 sm:$0xff]  }
 0x19e   :  { %v10266_v40 = vld [vmem:[%s13869_s2 + $0x124] ss:$28 sps:$4 sm:$0xff]   ;;  %v10278_v44 = vld [vmem:[%s13869_s2 + $0x194] ss:$28 sps:$4 sm:$0xff]  }
 0x19f   :  { %v10264_v41 = vld [vmem:[%s13869_s2 + $0x120] ss:$28 sps:$4 sm:$0xff]   ;;  %v10282_v47 = vld [vmem:[%s13869_s2 + $0x1c8] ss:$28 sps:$4 sm:$0xff]  }
 0x1a0   :  { %9965 = vmatpush3.bf16.msra.mxu1 %v9964_v24  ;;  %v9982_v24 = vpack.c.bf16 %v5216_v23, %v5214_v22  ;;  %v10263_v22 = vld [vmem:[%s13869_s2 + $0x11c] ss:$28 sps:$4 sm:$0xff]  }
 0x1a1   :  { %9967 = vmatprep.subr.bf16.mxu1 %v9966_v27  ;;  %v9984_v27 = vpack.c.bf16 %v5215_v26, %v5213_v25  ;;  %v10261_v23 = vld [vmem:[%s13869_s2 + $0x118] ss:$28 sps:$4 sm:$0xff]   ;;  %v10267_v25 = vld [vmem:[%s13869_s2 + $0x150] ss:$28 sps:$4 sm:$0xff]  }
 0x1a2   :  { %9983 = vmatprep.subr.bf16.mxu0 %v9982_v24  ;;  %v10269_v24 = vld [vmem:[%s13869_s2 + $0x154] ss:$28 sps:$4 sm:$0xff]   ;;  %v10275_v26 = vld [vmem:[%s13869_s2 + $0x18c] ss:$28 sps:$4 sm:$0xff]  }
 0x1a3   :  { %9985 = vmatpush1.bf16.msra.mxu0 %v9984_v27  ;;  %v10273_v27 = vld [vmem:[%s13869_s2 + $0x188] ss:$28 sps:$4 sm:$0xff]  }
 0x1a4   :  { %9969 = vmatpush3.bf16.msra.mxu1 %v9968_v30  ;;  %v10234_v30 = vld [vmem:[%s13869_s2 + $0x8] ss:$28 sps:$4 sm:$0xff]   ;;  %6145 = vmatprep.subr.bf16.mxu0 %v10233_v29 }
 0x1a5   :  { %9971 = vmatprep.subr.bf16.mxu1 %v9970_v33  ;;  %v10240_v33 = vld [vmem:[%s13869_s2 + $0x40] ss:$28 sps:$4 sm:$0xff]  }
 0x1a6   :  { %v10281_v29 = vld [vmem:[%s13869_s2 + $0x1c4] ss:$28 sps:$4 sm:$0xff]  }
 0x1a8   :  { %9973 = vmatpush3.bf16.msra.mxu1 %v9972_v36  ;;  %v10254_v36 = vld [vmem:[%s13869_s2 + $0xb4] ss:$28 sps:$4 sm:$0xff]  }
 0x1a9   :  { %9975 = vmatprep.subr.bf16.mxu1 %v9974_v39  ;;  %v10258_v39 = vld [vmem:[%s13869_s2 + $0xe8] ss:$28 sps:$4 sm:$0xff]  }
 0x1ac   :  { %9977 = vmatpush3.bf16.msra.mxu1 %v9976_v42  ;;  %v10272_v42 = vld [vmem:[%s13869_s2 + $0x15c] ss:$28 sps:$4 sm:$0xff]  }
 0x1ad   :  { %9979 = vmatprep.subr.bf16.mxu1 %v9978_v46  ;;  %v10284_v46 = vld [vmem:[%s13869_s2 + $0x1cc] ss:$28 sps:$4 sm:$0xff]  }
 0x1b0   :  { %9981 = vmatpush3.bf16.msra.mxu1 %v9980_v48  ;;  %v10290_v48 = vld [vmem:[%s13869_s2 + $0x204] ss:$28 sps:$4 sm:$0xff]  }
 0x1b1   :  { %6186 = vmatprep.subr.bf16.mxu1 %v10236_v31  ;;  %v10287_v31 = vld [vmem:[%s13869_s2 + $0x1fc] ss:$28 sps:$4 sm:$0xff]  }
 0x266   :  { %v12596_v49 = vpop.f32.mrb[0].mxu1 }
 0x267   :  { %v5220_v50 = vsel %vm5219_vm2, %v12596_v49, 0.0  ;;  %v5234_v51 = vmul.f32 %v12596_v49, %v12596_v49  ;;  %v12602_v52 = vpop.f32.mrb[1].mxu1 }
 0x268   :  { %v5221_v53 = vrot.slane %v5220_v50, 4  ;;  %v5227_v54 = vsel %vm5219_vm2, %v12602_v52, 0.0  ;;  %v5235_v55 = vmul.f32 %v12602_v52, %v12602_v52  ;;  %v5178_v56 = vpop.f32.mrb[2].mxu1 }
 0x269   :  { %v5236_v57 = vsel %vm5219_vm2, %v5234_v51, 0.0  ;;  %v5228_v58 = vrot.slane %v5227_v54, 4  ;;  %v5179_v59 = vpop.f32.mrb[3].mxu1  ;;  %v10296_v51 = vld [vmem:[%s13869_s2 + $0x23c] ss:$28 sps:$4 sm:$0xff]  }
 0x26a   :  { %v5222_v60 = vadd.f32 %v5221_v53, %v5220_v50  ;;  %v5237_v61 = vrot.slane %v5236_v57, 4  ;;  %v5243_v62 = vsel %vm5219_vm2, %v5235_v55, 0.0  ;;  %v10288_v50 = vld [vmem:[%s13869_s2 + $0x200] ss:$28 sps:$4 sm:$0xff]   ;;  %v10294_v53 = vld [vmem:[%s13869_s2 + $0x238] ss:$28 sps:$4 sm:$0xff]  }
 0x26b   :  { %v5229_v63 = vadd.f32 %v5228_v58, %v5227_v54  ;;  %v5244_v0 = vrot.slane %v5243_v62, 4  ;;  %v10302_v54 = vld [vmem:[%s13869_s2 + $0x274] ss:$28 sps:$4 sm:$0xff]   ;;  %v10308_v56 = vld [vmem:[%s13869_s2 + $0x2ac] ss:$28 sps:$4 sm:$0xff]  }
 0x26c   :  { %v5223_v2 = vrot.slane %v5222_v60, 2  ;;  %v5238_v3 = vadd.f32 %v5237_v61, %v5236_v57  ;;  %v10300_v55 = vld [vmem:[%s13869_s2 + $0x270] ss:$28 sps:$4 sm:$0xff]   ;;  %v10306_v57 = vld [vmem:[%s13869_s2 + $0x2a8] ss:$28 sps:$4 sm:$0xff]  }
 0x26d   :  { %v5230_v4 = vrot.slane %v5229_v63, 2  ;;  %v5245_v5 = vadd.f32 %v5244_v0, %v5243_v62 }
 0x26e   :  { %v5224_v6 = vadd.f32 %v5223_v2, %v5222_v60  ;;  %v5239_v7 = vrot.slane %v5238_v3, 2 }
 0x26f   :  { %v5231_v8 = vadd.f32 %v5230_v4, %v5229_v63  ;;  %v5246_v9 = vrot.slane %v5245_v5, 2 }
 0x270   :  { %v5240_v10 = vadd.f32 %v5239_v7, %v5238_v3  ;;  %v5225_v13 = vrot.slane %v5224_v6, 1 }
 0x271   :  { %v5232_v11 = vrot.slane %v5231_v8, 1  ;;  %v5247_v12 = vadd.f32 %v5246_v9, %v5245_v5  ;;  %v5217_v5 = vld [vmem:[%s13874_s7] sm:$0x1] }
 0x272   :  { %v5241_v14 = vrot.slane %v5240_v10, 1  ;;  %v5226_v19 = vadd.f32 %v5225_v13, %v5224_v6  ;;  %v10239_v13 = vld [vmem:[%s13869_s2 + $0x3c] ss:$28 sps:$4 sm:$0xff]  }
 0x273   :  { %v5248_v15 = vrot.slane %v5247_v12, 1  ;;  %v5233_v17 = vadd.f32 %v5232_v11, %v5231_v8  ;;  %v5218_v8 = vld [vmem:[%s13874_s7 + $0x1] sm:$0x1] }
 0x274   :  { %v5242_v16 = vadd.f32 %v5241_v14, %v5240_v10 }
 0x275   :  { %v5249_v18 = vadd.f32 %v5248_v15, %v5247_v12  ;;  %v10231_v12 = vld [vmem:[%s13869_s2] ss:$28 sps:$4 sm:$0xff]   ;;  %v10237_v15 = vld [vmem:[%s13869_s2 + $0x38] ss:$28 sps:$4 sm:$0xff]  }
 0x276   :  { %v5251_v21 = vsel %vm5250_vm3, %v5226_v19, %v5242_v16  ;;  %v10245_v16 = vld [vmem:[%s13869_s2 + $0x74] ss:$28 sps:$4 sm:$0xff]   ;;  %v10249_v19 = vld [vmem:[%s13869_s2 + $0xa8] ss:$28 sps:$4 sm:$0xff]  }
 0x277   :  { %v5252_v20 = vsel %vm5250_vm3, %v5233_v17, %v5249_v18  ;;  %v10243_v17 = vld [vmem:[%s13869_s2 + $0x70] ss:$28 sps:$4 sm:$0xff]  }
 0x278   :  { %5317 = vmatprep.mubr.f32.mxu1 %v5252_v20  ;;  %v10251_v18 = vld [vmem:[%s13869_s2 + $0xac] ss:$28 sps:$4 sm:$0xff]   ;;  %v10257_v20 = vld [vmem:[%s13869_s2 + $0xe4] ss:$28 sps:$4 sm:$0xff]  }
 0x279   :  { %5318 = vmatmul.mubr.f32.vlgmr.msra.gmra.mrb[4].mxu1 %v5251_v21  ;;  %v10255_v21 = vld [vmem:[%s13869_s2 + $0xe0] ss:$28 sps:$4 sm:$0xff]  }
 0x27a   :  { %6187 = vmatpush1.bf16.msra.mxu1 %v10234_v30  ;;  %v10279_v30 = vld [vmem:[%s13869_s2 + $0x1c0] ss:$28 sps:$4 sm:$0xff]  }
 0x27b   :  { %6188 = vmatprep.subr.bf16.mxu1 %v10242_v32  ;;  %v10285_v32 = vld [vmem:[%s13869_s2 + $0x1f8] ss:$28 sps:$4 sm:$0xff]  }
 0x27e   :  { %6189 = vmatpush1.bf16.msra.mxu1 %v10240_v33  ;;  %v10293_v33 = vld [vmem:[%s13869_s2 + $0x234] ss:$28 sps:$4 sm:$0xff]  }
 0x27f   :  { %6190 = vmatprep.subr.bf16.mxu1 %v10248_v34  ;;  %v10291_v34 = vld [vmem:[%s13869_s2 + $0x230] ss:$28 sps:$4 sm:$0xff]  }
 0x282   :  { %6191 = vmatpush1.bf16.msra.mxu1 %v10246_v35  ;;  %v10299_v35 = vld [vmem:[%s13869_s2 + $0x26c] ss:$28 sps:$4 sm:$0xff]  }
 0x283   :  { %6192 = vmatprep.subr.bf16.mxu1 %v10254_v36  ;;  %v10297_v36 = vld [vmem:[%s13869_s2 + $0x268] ss:$28 sps:$4 sm:$0xff]  }
 0x286   :  { %6193 = vmatpush1.bf16.msra.mxu1 %v10252_v37  ;;  %v10305_v37 = vld [vmem:[%s13869_s2 + $0x2a4] ss:$28 sps:$4 sm:$0xff]  }
 0x287   :  { %6194 = vmatprep.subr.bf16.mxu1 %v10260_v38  ;;  %v10303_v38 = vld [vmem:[%s13869_s2 + $0x2a0] ss:$28 sps:$4 sm:$0xff]  }
 0x28a   :  { %6195 = vmatpush1.bf16.msra.mxu1 %v10258_v39  ;;  %v10311_v39 = vld [vmem:[%s13869_s2 + $0x2dc] ss:$28 sps:$4 sm:$0xff]  }
 0x28b   :  { %6196 = vmatprep.subr.bf16.mxu1 %v10266_v40  ;;  %v10314_v40 = vld [vmem:[%s13869_s2 + $0x2e4] ss:$28 sps:$4 sm:$0xff]  }
 0x28e   :  { %6197 = vmatpush1.bf16.msra.mxu1 %v10264_v41  ;;  %v10309_v41 = vld [vmem:[%s13869_s2 + $0x2d8] ss:$28 sps:$4 sm:$0xff]  }
 0x28f   :  { %6198 = vmatprep.subr.bf16.mxu1 %v10272_v42  ;;  %v10312_v42 = vld [vmem:[%s13869_s2 + $0x2e0] ss:$28 sps:$4 sm:$0xff]  }
 0x292   :  { %6199 = vmatpush1.bf16.msra.mxu1 %v10270_v43  ;;  %v10317_v43 = vld [vmem:[%s13869_s2 + $0x314] ss:$28 sps:$4 sm:$0xff]  }
 0x293   :  { %6200 = vmatprep.subr.bf16.mxu1 %v10278_v44  ;;  %v10320_v44 = vld [vmem:[%s13869_s2 + $0x31c] ss:$28 sps:$4 sm:$0xff]  }
 0x296   :  { %6201 = vmatpush1.bf16.msra.mxu1 %v10276_v45  ;;  %v10315_v45 = vld [vmem:[%s13869_s2 + $0x310] ss:$28 sps:$4 sm:$0xff]  }
 0x297   :  { %6202 = vmatprep.subr.bf16.mxu1 %v10284_v46  ;;  %v10318_v46 = vld [vmem:[%s13869_s2 + $0x318] ss:$28 sps:$4 sm:$0xff]  }
 0x29a   :  { %6203 = vmatpush1.bf16.msra.mxu1 %v10282_v47  ;;  %v10323_v47 = vld [vmem:[%s13869_s2 + $0x34c] ss:$28 sps:$4 sm:$0xff]  }
 0x29b   :  { %6204 = vmatprep.subr.bf16.mxu1 %v10290_v48  ;;  %v10326_v48 = vld [vmem:[%s13869_s2 + $0x354] ss:$28 sps:$4 sm:$0xff]  }
 0x29e   :  { %6205 = vmatpush1.bf16.msra.mxu1 %v10288_v50  ;;  %v10321_v50 = vld [vmem:[%s13869_s2 + $0x348] ss:$28 sps:$4 sm:$0xff]  }
 0x29f   :  { %6206 = vmatprep.subr.bf16.mxu1 %v10296_v51  ;;  %v10324_v51 = vld [vmem:[%s13869_s2 + $0x350] ss:$28 sps:$4 sm:$0xff]  }
 0x2a2   :  { %6207 = vmatpush1.bf16.msra.mxu1 %v10294_v53  ;;  %v10329_v53 = vld [vmem:[%s13869_s2 + $0x14] ss:$28 sps:$4 sm:$0xff]  }
 0x2a3   :  { %6208 = vmatprep.subr.bf16.mxu1 %v10302_v54  ;;  %v10330_v54 = vld [vmem:[%s13869_s2 + $0x1d8] ss:$28 sps:$4 sm:$0xff]  }
 0x2a6   :  { %6209 = vmatpush1.bf16.msra.mxu1 %v10300_v55  ;;  %v5417_v55 = vlaneseq }
 0x2a7   :  { %6210 = vmatprep.subr.bf16.mxu1 %v10308_v56 }
 0x2a8   :  { %v5418_v56 = vshrl.u32 %v5417_v55, 7  ;;  %v6328_v55 = vld [vmem:[%s13872_s5 + $0x1a0] sm:$0xff] }
 0x2aa   :  { %6211 = vmatpush1.bf16.msra.mxu1 %v10306_v57  ;;  %v12830_v57 = vsub.s32 0, %v5418_v56 }
 0x2ab   :  { %6212 = vmatprep.subr.bf16.mxu1 %v10314_v40  ;;  %v10366_v40 = vld [vmem:[%s13869_s2 + $0x1a0] ss:$28 sps:$4 sm:$0xff]  }
 0x2ae   :  { %6213 = vmatpush1.bf16.msra.mxu1 %v10312_v42 }
 0x2af   :  { %6214 = vmatprep.subr.bf16.mxu1 %v10320_v44  ;;  %v6309_v44 = vld [vmem:[%s13872_s5 + $0x108] sm:$0xff] }
 0x2b2   :  { %6215 = vmatpush1.bf16.msra.mxu1 %v10318_v46  ;;  %v6327_v46 = vld [vmem:[%s13872_s5 + $0x198] sm:$0xff] }
 0x2b3   :  { %6216 = vmatprep.subr.bf16.mxu1 %v10326_v48 }
 0x2b6   :  { %6217 = vmatpush1.bf16.msra.mxu1 %v10324_v51 }
 0x2b7   :  { %9730 = vmatprep.subr.bf16.mxu1 %v10330_v54  ;;  %v6311_v54 = vld [vmem:[%s13872_s5 + $0x118] sm:$0xff] }
 0x34c   :  { %v9727_v58 = vpop.f32.mrb[4].mxu1 }
 0x34d   :  { %v9728_v59 = vpop.f32.mrb[5].mxu1 }
 0x34e   :  { %v9729_v60 = vadd.f32 %v9728_v59, %v9727_v58  ;;  %v12832_v58 = vsub.s32 1, %v5418_v56  ;;  %v6329_v56 = vld [vmem:[%s13872_s5 + $0x1a8] sm:$0xff] }
 0x350   :  { %v5323_v61 = vmul.f32 0.03125, %v9729_v60 }
 0x352   :  { %v5324_v62 = vmul.f32 %v5323_v61, %v5323_v61 }
 0x354   :  { %v5326_v63 = vrot.slane %v5324_v62, 7 }
 0x356   :  { %v5328_v0 = vsub.f32 %v5323_v61, %v5326_v63 }
 0x358   :  { %v5329_v2 = vmax.f32 %v5328_v0, 0.0 }
 0x35a   :  { %v5330_v3 = vadd.f32 1e-05, %v5329_v2 }
 0x35c   :  { %10391 = vrsqrt.f32 %v5330_v3 }
 0x366   :  { %v10392_v4 = vpop.eup %10391 }
 0x367   :  { %v5333_v6 = vrot.slane %v10392_v4, 1 }
 0x369   :  { %v5335_v7 = vmul.f32 %v5333_v6, %v5217_v5 }
 0x36b   :  { %v5336_v9 = vmul.f32 %v5335_v7, %v5323_v61 }
 0x36d   :  { %v5337_v10 = vsub.f32 %v5218_v8, %v5336_v9  ;;  %v10327_v9 = vld [vmem:[%s13869_s2 + $0x10] ss:$28 sps:$4 sm:$0xff]  }
 0x36f   :  { %v5339_v11 = vrot.slane %v5337_v10, 7  ;;  %v10331_v10 = vld [vmem:[%s13869_s2 + $0x18] ss:$28 sps:$4 sm:$0xff]  }
 0x371   :  { %v5341_v14 = vsel %vm5250_vm3, %v5335_v7, %v5339_v11  ;;  %v10335_v11 = vld [vmem:[%s13869_s2 + $0x210] ss:$28 sps:$4 sm:$0xff]  }
 0x372   :  { %9472 = vmatmul.mubr.msk.f32.vlgmr.msra.gmra.mrb[0].mxu0 %vm5342_vm4, %v5341_v14  ;;  %v10339_v14 = vld [vmem:[%s13869_s2 + $0x84] ss:$28 sps:$4 sm:$0xff]  }
 0x373   :  { %6146 = vmatpush1.bf16.msra.mxu0 %v10231_v12  ;;  %v10332_v12 = vld [vmem:[%s13869_s2 + $0x48] ss:$28 sps:$4 sm:$0xff]  }
 0x374   :  { %6147 = vmatprep.subr.bf16.mxu0 %v10239_v13  ;;  %v10336_v13 = vld [vmem:[%s13869_s2 + $0x50] ss:$28 sps:$4 sm:$0xff]  }
 0x377   :  { %6148 = vmatpush1.bf16.msra.mxu0 %v10237_v15  ;;  %v10340_v15 = vld [vmem:[%s13869_s2 + $0x248] ss:$28 sps:$4 sm:$0xff]  }
 0x378   :  { %6149 = vmatprep.subr.bf16.mxu0 %v10245_v16  ;;  %v10337_v16 = vld [vmem:[%s13869_s2 + $0x80] ss:$28 sps:$4 sm:$0xff]  }
 0x37b   :  { %6150 = vmatpush1.bf16.msra.mxu0 %v10243_v17  ;;  %v10341_v17 = vld [vmem:[%s13869_s2 + $0x88] ss:$28 sps:$4 sm:$0xff]  }
 0x37c   :  { %6151 = vmatprep.subr.bf16.mxu0 %v10251_v18  ;;  %v10344_v18 = vld [vmem:[%s13869_s2 + $0xbc] ss:$28 sps:$4 sm:$0xff]  }
 0x37f   :  { %6152 = vmatpush1.bf16.msra.mxu0 %v10249_v19  ;;  %v10345_v19 = vld [vmem:[%s13869_s2 + $0x280] ss:$28 sps:$4 sm:$0xff]  }
 0x380   :  { %6153 = vmatprep.subr.bf16.mxu0 %v10257_v20  ;;  %v10342_v20 = vld [vmem:[%s13869_s2 + $0xb8] ss:$28 sps:$4 sm:$0xff]  }
 0x383   :  { %6154 = vmatpush1.bf16.msra.mxu0 %v10255_v21  ;;  %v10346_v21 = vld [vmem:[%s13869_s2 + $0xc0] ss:$28 sps:$4 sm:$0xff]  }
 0x384   :  { %6155 = vmatprep.subr.bf16.mxu0 %v10263_v22  ;;  %v10349_v22 = vld [vmem:[%s13869_s2 + $0xf4] ss:$28 sps:$4 sm:$0xff]  }
 0x387   :  { %6156 = vmatpush1.bf16.msra.mxu0 %v10261_v23  ;;  %v10350_v23 = vld [vmem:[%s13869_s2 + $0x2b8] ss:$28 sps:$4 sm:$0xff]  }
 0x388   :  { %6157 = vmatprep.subr.bf16.mxu0 %v10269_v24  ;;  %v10347_v24 = vld [vmem:[%s13869_s2 + $0xf0] ss:$28 sps:$4 sm:$0xff]  }
 0x38b   :  { %6158 = vmatpush1.bf16.msra.mxu0 %v10267_v25  ;;  %v10351_v25 = vld [vmem:[%s13869_s2 + $0xf8] ss:$28 sps:$4 sm:$0xff]  }
 0x38c   :  { %6159 = vmatprep.subr.bf16.mxu0 %v10275_v26  ;;  %v10354_v26 = vld [vmem:[%s13869_s2 + $0x12c] ss:$28 sps:$4 sm:$0xff]  }
 0x38f   :  { %6160 = vmatpush1.bf16.msra.mxu0 %v10273_v27  ;;  %v10355_v27 = vld [vmem:[%s13869_s2 + $0x2f0] ss:$28 sps:$4 sm:$0xff]  }
 0x390   :  { %6161 = vmatprep.subr.bf16.mxu0 %v10281_v29  ;;  %v10352_v29 = vld [vmem:[%s13869_s2 + $0x128] ss:$28 sps:$4 sm:$0xff]  }
 0x393   :  { %6162 = vmatpush1.bf16.msra.mxu0 %v10279_v30  ;;  %v10356_v30 = vld [vmem:[%s13869_s2 + $0x130] ss:$28 sps:$4 sm:$0xff]  }
 0x394   :  { %6163 = vmatprep.subr.bf16.mxu0 %v10287_v31  ;;  %v10359_v31 = vld [vmem:[%s13869_s2 + $0x164] ss:$28 sps:$4 sm:$0xff]  }
 0x397   :  { %6164 = vmatpush1.bf16.msra.mxu0 %v10285_v32  ;;  %v10360_v32 = vld [vmem:[%s13869_s2 + $0x328] ss:$28 sps:$4 sm:$0xff]  }
 0x398   :  { %6165 = vmatprep.subr.bf16.mxu0 %v10293_v33  ;;  %v10357_v33 = vld [vmem:[%s13869_s2 + $0x160] ss:$28 sps:$4 sm:$0xff]  }
 0x39b   :  { %6166 = vmatpush1.bf16.msra.mxu0 %v10291_v34  ;;  %v10361_v34 = vld [vmem:[%s13869_s2 + $0x168] ss:$28 sps:$4 sm:$0xff]  }
 0x39c   :  { %6167 = vmatprep.subr.bf16.mxu0 %v10299_v35  ;;  %v10364_v35 = vld [vmem:[%s13869_s2 + $0x19c] ss:$28 sps:$4 sm:$0xff]  }
 0x39f   :  { %6168 = vmatpush1.bf16.msra.mxu0 %v10297_v36  ;;  %v10365_v36 = vld [vmem:[%s13869_s2 + $0x360] ss:$28 sps:$4 sm:$0xff]  }
 0x3a0   :  { %6169 = vmatprep.subr.bf16.mxu0 %v10305_v37  ;;  %v6324_v37 = vld [vmem:[%s13872_s5 + $0x180] sm:$0xff] }
 0x3a3   :  { %6170 = vmatpush1.bf16.msra.mxu0 %v10303_v38  ;;  %v6325_v38 = vld [vmem:[%s13872_s5 + $0x188] sm:$0xff] }
 0x3a4   :  { %6171 = vmatprep.subr.bf16.mxu0 %v10311_v39  ;;  %v10362_v39 = vld [vmem:[%s13869_s2 + $0x198] ss:$28 sps:$4 sm:$0xff]   ;;  %v9986_v42 = vpack.c.bf16 %v6325_v38, %v6324_v37 }
 0x3a5   :  { %v6314_v37 = vld [vmem:[%s13872_s5 + $0x130] sm:$0xff]  ;;  %v6315_v38 = vld [vmem:[%s13872_s5 + $0x138] sm:$0xff] }
 0x3a7   :  { %6172 = vmatpush1.bf16.msra.mxu0 %v10309_v41  ;;  %v10369_v41 = vld [vmem:[%s13869_s2 + $0x1d4] ss:$28 sps:$4 sm:$0xff]  }
 0x3a8   :  { %6173 = vmatprep.subr.bf16.mxu0 %v10317_v43  ;;  %v6308_v43 = vld [vmem:[%s13872_s5 + $0x100] sm:$0xff] }
 0x3a9   :  { %v9988_v48 = vpack.c.bf16 %v6309_v44, %v6308_v43  ;;  %v6332_v43 = vld [vmem:[%s13872_s5 + $0x1c0] sm:$0xff]  ;;  %v6333_v44 = vld [vmem:[%s13872_s5 + $0x1c8] sm:$0xff] }
 0x3ab   :  { %6174 = vmatpush1.bf16.msra.mxu0 %v10315_v45  ;;  %v6326_v45 = vld [vmem:[%s13872_s5 + $0x190] sm:$0xff] }
 0x3ac   :  { %6175 = vmatprep.subr.bf16.mxu0 %v10323_v47  ;;  %v10367_v47 = vld [vmem:[%s13869_s2 + $0x1d0] ss:$28 sps:$4 sm:$0xff]   ;;  %v9990_v51 = vpack.c.bf16 %v6327_v46, %v6326_v45  ;;  %v6364_v45 = vld [vmem:[%s13872_s5 + $0x2c0] sm:$0xff]  ;;  %v10002_v46 = vpack.c.bf16 %v6333_v44, %v6332_v43 }
 0x3af   :  { %6176 = vmatpush1.bf16.msra.mxu0 %v10321_v50  ;;  %v10372_v50 = vld [vmem:[%s13869_s2 + $0x20c] ss:$28 sps:$4 sm:$0xff]  }
 0x3b0   :  { %6227 = vmatprep.subr.bf16.mxu0 %v10329_v53  ;;  %v6310_v53 = vld [vmem:[%s13872_s5 + $0x110] sm:$0xff] }
 0x445   :  { %v5412_v59 = vpop.f32.mrb[0].mxu0 }
 0x446   :  { %v5420_v60 = vrot.slane %v5412_v59, %v12830_v57  ;;  %v5414_v61 = vpop.f32.mrb[1].mxu0  ;;  %v5430_v0 = vrot.slane %v5412_v59, %v12832_v58  ;;  %v10370_v59 = vld [vmem:[%s13869_s2 + $0x208] ss:$28 sps:$4 sm:$0xff]  }
 0x447   :  { %v5424_v62 = vrot.slane %v5414_v61, %v12830_v57  ;;  %v5434_v3 = vrot.slane %v5414_v61, %v12832_v58  ;;  %v10375_v61 = vld [vmem:[%s13869_s2 + $0x244] ss:$28 sps:$4 sm:$0xff]  }
 0x448   :  { %v5425_v63 = vmul.f32 %v5420_v60, %v12596_v49  ;;  %v9992_v60 = vpack.c.bf16 %v6311_v54, %v6310_v53  ;;  %v6348_v54 = vld [vmem:[%s13872_s5 + $0x240] sm:$0xff] }
 0x449   :  { %v5426_v2 = vmul.f32 %v5424_v62, %v12602_v52  ;;  %v10334_v52 = vld [vmem:[%s13869_s2 + $0x4c] ss:$28 sps:$4 sm:$0xff]   ;;  %v9994_v62 = vpack.c.bf16 %v6329_v56, %v6328_v55 }
 0x44a   :  { %v5435_v4 = vadd.f32 %v5430_v0, %v5425_v63  ;;  %v6312_v63 = vld [vmem:[%s13872_s5 + $0x120] sm:$0xff]  ;;  %v6313_v0 = vld [vmem:[%s13872_s5 + $0x128] sm:$0xff] }
 0x44b   :  { %v5436_v5 = vadd.f32 %v5434_v3, %v5426_v2  ;;  %v6330_v2 = vld [vmem:[%s13872_s5 + $0x1b0] sm:$0xff]  ;;  %v6331_v3 = vld [vmem:[%s13872_s5 + $0x1b8] sm:$0xff]  ;;  %v6349_v55 = vld [vmem:[%s13872_s5 + $0x248] sm:$0xff] }
 0x44c   :  { %v5437_v6 = vmax.f32 %v5435_v4, 0.0  ;;  %v10373_v4 = vld [vmem:[%s13869_s2 + $0x240] ss:$28 sps:$4 sm:$0xff]   ;;  %v10036_v56 = vpack.c.bf16 %v6349_v55, %v6348_v54 }
 0x44d   :  { %v5438_v7 = vmax.f32 %v5436_v5, 0.0  ;;  %v9996_v5 = vpack.c.bf16 %v6313_v0, %v6312_v63  ;;  %v6367_v63 = vld [vmem:[%s13872_s5 + $0x2d8] sm:$0xff]  ;;  %v6318_v0 = vld [vmem:[%s13872_s5 + $0x150] sm:$0xff] }
 0x44e   :  { %v12846_v49 = vpack.c.bf16 %v5437_v6, %v5437_v6  ;;  %v10378_v6 = vld [vmem:[%s13869_s2 + $0x27c] ss:$28 sps:$4 sm:$0xff]  }
 0x44f   :  { %v5568_v8 = vpack.c.bf16 %v5438_v7, %v5438_v7  ;;  %v9998_v7 = vpack.c.bf16 %v6331_v3, %v6330_v2  ;;  %v6319_v2 = vld [vmem:[%s13872_s5 + $0x158] sm:$0xff] }
 0x451   :  { %6177 = vmatprep.mubr.bf16.mxu0 %v5568_v8  ;;  %6218 = vmatprep.mubr.bf16.mxu1 %v5568_v8 }
 0x452   :  { %6178 = vmatmul.mubr.bf16.vlgmr.msra.gmra.mrb[4].mxu0 %v12846_v49  ;;  %6219 = vmatmul.mubr.bf16.vlgmr.msra.gmra.mrb[8].mxu1 %v12846_v49 }
 0x453   :  { %6228 = vmatpush1.bf16.msra.mxu0 %v10327_v9  ;;  %9731 = vmatpush3.bf16.msra.mxu1 %v10331_v10  ;;  %v10381_v9 = vld [vmem:[%s13869_s2 + $0x2b4] ss:$28 sps:$4 sm:$0xff]  }
 0x454   :  { %6259 = vmatprep.mubr.bf16.mxu0 %v5568_v8  ;;  %6300 = vmatprep.mubr.bf16.mxu1 %v5568_v8  ;;  %v10376_v8 = vld [vmem:[%s13869_s2 + $0x278] ss:$28 sps:$4 sm:$0xff]   ;;  %v10379_v10 = vld [vmem:[%s13869_s2 + $0x2b0] ss:$28 sps:$4 sm:$0xff]  }
 0x455   :  { %6229 = vmatprep.subr.bf16.mxu0 %v10334_v52  ;;  %9732 = vmatprep.subr.bf16.mxu1 %v10335_v11  ;;  %v10384_v52 = vld [vmem:[%s13869_s2 + $0x2ec] ss:$28 sps:$4 sm:$0xff]  }
 0x456   :  { %v10382_v11 = vld [vmem:[%s13869_s2 + $0x2e8] ss:$28 sps:$4 sm:$0xff]  }
 0x457   :  { %6230 = vmatpush1.bf16.msra.mxu0 %v10332_v12  ;;  %9733 = vmatpush3.bf16.msra.mxu1 %v10336_v13  ;;  %v10387_v12 = vld [vmem:[%s13869_s2 + $0x324] ss:$28 sps:$4 sm:$0xff]  }
 0x458   :  { %6231 = vmatprep.subr.bf16.mxu0 %v10339_v14  ;;  %9734 = vmatprep.subr.bf16.mxu1 %v10340_v15  ;;  %v10385_v13 = vld [vmem:[%s13869_s2 + $0x320] ss:$28 sps:$4 sm:$0xff]  }
 0x459   :  { %v10390_v14 = vld [vmem:[%s13869_s2 + $0x35c] ss:$28 sps:$4 sm:$0xff]   ;;  %v6356_v15 = vld [vmem:[%s13872_s5 + $0x280] sm:$0xff] }
 0x45b   :  { %6232 = vmatpush1.bf16.msra.mxu0 %v10337_v16  ;;  %9735 = vmatpush3.bf16.msra.mxu1 %v10341_v17  ;;  %v6357_v16 = vld [vmem:[%s13872_s5 + $0x288] sm:$0xff]  ;;  %v10388_v17 = vld [vmem:[%s13869_s2 + $0x358] ss:$28 sps:$4 sm:$0xff]  }
 0x45c   :  { %6233 = vmatprep.subr.bf16.mxu0 %v10344_v18  ;;  %9736 = vmatprep.subr.bf16.mxu1 %v10345_v19  ;;  %v10018_v18 = vpack.c.bf16 %v6357_v16, %v6356_v15  ;;  %v6340_v19 = vld [vmem:[%s13872_s5 + $0x200] sm:$0xff] }
 0x45d   :  { %v6352_v16 = vld [vmem:[%s13872_s5 + $0x260] sm:$0xff] }
 0x45f   :  { %6234 = vmatpush1.bf16.msra.mxu0 %v10342_v20  ;;  %9737 = vmatpush3.bf16.msra.mxu1 %v10346_v21  ;;  %v6341_v20 = vld [vmem:[%s13872_s5 + $0x208] sm:$0xff]  ;;  %v6358_v21 = vld [vmem:[%s13872_s5 + $0x290] sm:$0xff] }
 0x460   :  { %6235 = vmatprep.subr.bf16.mxu0 %v10349_v22  ;;  %9738 = vmatprep.subr.bf16.mxu1 %v10350_v23  ;;  %v6359_v22 = vld [vmem:[%s13872_s5 + $0x298] sm:$0xff]  ;;  %v10020_v23 = vpack.c.bf16 %v6341_v20, %v6340_v19 }
 0x461   :  { %v6339_v20 = vld [vmem:[%s13872_s5 + $0x1f8] sm:$0xff] }
 0x463   :  { %6236 = vmatpush1.bf16.msra.mxu0 %v10347_v24  ;;  %9739 = vmatpush3.bf16.msra.mxu1 %v10351_v25  ;;  %v10022_v24 = vpack.c.bf16 %v6359_v22, %v6358_v21  ;;  %v6342_v25 = vld [vmem:[%s13872_s5 + $0x210] sm:$0xff]  ;;  %v6371_v22 = vld [vmem:[%s13872_s5 + $0x2f8] sm:$0xff] }
 0x464   :  { %6237 = vmatprep.subr.bf16.mxu0 %v10354_v26  ;;  %9740 = vmatprep.subr.bf16.mxu1 %v10355_v27  ;;  %v6343_v26 = vld [vmem:[%s13872_s5 + $0x218] sm:$0xff]  ;;  %v6360_v27 = vld [vmem:[%s13872_s5 + $0x2a0] sm:$0xff]  ;;  %v6370_v21 = vld [vmem:[%s13872_s5 + $0x2f0] sm:$0xff] }
 0x467   :  { %6238 = vmatpush1.bf16.msra.mxu0 %v10352_v29  ;;  %9741 = vmatpush3.bf16.msra.mxu1 %v10356_v30  ;;  %v6361_v29 = vld [vmem:[%s13872_s5 + $0x2a8] sm:$0xff]  ;;  %v10024_v30 = vpack.c.bf16 %v6343_v26, %v6342_v25  ;;  %v6322_v25 = vld [vmem:[%s13872_s5 + $0x170] sm:$0xff]  ;;  %v6323_v26 = vld [vmem:[%s13872_s5 + $0x178] sm:$0xff] }
 0x468   :  { %6239 = vmatprep.subr.bf16.mxu0 %v10359_v31  ;;  %9742 = vmatprep.subr.bf16.mxu1 %v10360_v32  ;;  %v10026_v31 = vpack.c.bf16 %v6361_v29, %v6360_v27  ;;  %v6344_v32 = vld [vmem:[%s13872_s5 + $0x220] sm:$0xff]  ;;  %v6354_v27 = vld [vmem:[%s13872_s5 + $0x270] sm:$0xff]  ;;  %v10016_v29 = vpack.c.bf16 %v6323_v26, %v6322_v25 }
 0x46b   :  { %6240 = vmatpush1.bf16.msra.mxu0 %v10357_v33  ;;  %9743 = vmatpush3.bf16.msra.mxu1 %v10361_v34  ;;  %v6345_v33 = vld [vmem:[%s13872_s5 + $0x228] sm:$0xff]  ;;  %v6362_v34 = vld [vmem:[%s13872_s5 + $0x2b0] sm:$0xff] }
 0x46c   :  { %6241 = vmatprep.subr.bf16.mxu0 %v10364_v35  ;;  %9744 = vmatprep.subr.bf16.mxu1 %v10365_v36  ;;  %v10028_v35 = vpack.c.bf16 %v6345_v33, %v6344_v32  ;;  %v10535_v32 = vmov 0.0|0.0   ;;  %v6388_v33 = vld [vmem:[%s13872_s5 + $0x380] sm:$0xff] }
 0x46f   :  { %6242 = vmatpush1.bf16.msra.mxu0 %v10362_v39  ;;  %9745 = vmatpush3.bf16.msra.mxu1 %v10366_v40  ;;  %v6346_v39 = vld [vmem:[%s13872_s5 + $0x230] sm:$0xff]  ;;  %v10000_v40 = vpack.c.bf16 %v6315_v38, %v6314_v37 }
 0x470   :  { %6243 = vmatprep.subr.bf16.mxu0 %v10369_v41  ;;  %9987 = vmatprep.subr.bf16.mxu1 %v9986_v42  ;;  %v6347_v41 = vld [vmem:[%s13872_s5 + $0x238] sm:$0xff] }
 0x471   :  { %v10032_v42 = vpack.c.bf16 %v6347_v41, %v6346_v39 }
 0x472   :  { %6301 = vmatmul.mubr.bf16.vlgmr.msra.gmra.mrb[12].mxu1 %v12846_v49 }
 0x473   :  { %6244 = vmatpush1.bf16.msra.mxu0 %v10367_v47  ;;  %9989 = vmatpush3.bf16.msra.mxu1 %v9988_v48  ;;  %v6365_v47 = vld [vmem:[%s13872_s5 + $0x2c8] sm:$0xff]  ;;  %v6316_v48 = vld [vmem:[%s13872_s5 + $0x140] sm:$0xff] }
 0x474   :  { %6245 = vmatprep.subr.bf16.mxu0 %v10372_v50  ;;  %9991 = vmatprep.subr.bf16.mxu1 %v9990_v51  ;;  %v6317_v50 = vld [vmem:[%s13872_s5 + $0x148] sm:$0xff]  ;;  %v10034_v51 = vpack.c.bf16 %v6365_v47, %v6364_v45 }
 0x475   :  { %v10004_v53 = vpack.c.bf16 %v6317_v50, %v6316_v48 }
 0x477   :  { %6246 = vmatpush1.bf16.msra.mxu0 %v10370_v59  ;;  %9993 = vmatpush3.bf16.msra.mxu1 %v9992_v60  ;;  %v6334_v59 = vld [vmem:[%s13872_s5 + $0x1d0] sm:$0xff]  ;;  %v6335_v60 = vld [vmem:[%s13872_s5 + $0x1d8] sm:$0xff] }
 0x478   :  { %6247 = vmatprep.subr.bf16.mxu0 %v10375_v61  ;;  %9995 = vmatprep.subr.bf16.mxu1 %v9994_v62  ;;  %v6366_v61 = vld [vmem:[%s13872_s5 + $0x2d0] sm:$0xff]  ;;  %v10006_v62 = vpack.c.bf16 %v6335_v60, %v6334_v59 }
 0x479   :  { %v10038_v3 = vpack.c.bf16 %v6367_v63, %v6366_v61 }
 0x47b   :  { %6248 = vmatpush1.bf16.msra.mxu0 %v10373_v4  ;;  %9997 = vmatpush3.bf16.msra.mxu1 %v9996_v5  ;;  %v10008_v4 = vpack.c.bf16 %v6319_v2, %v6318_v0  ;;  %v6350_v5 = vld [vmem:[%s13872_s5 + $0x250] sm:$0xff] }
 0x47c   :  { %6249 = vmatprep.subr.bf16.mxu0 %v10378_v6  ;;  %9999 = vmatprep.subr.bf16.mxu1 %v9998_v7  ;;  %v6351_v6 = vld [vmem:[%s13872_s5 + $0x258] sm:$0xff] }
 0x47d   :  { %v10040_v7 = vpack.c.bf16 %v6351_v6, %v6350_v5 }
 0x47f   :  { %6250 = vmatpush1.bf16.msra.mxu0 %v10376_v8  ;;  %10001 = vmatpush3.bf16.msra.mxu1 %v10000_v40  ;;  %v6336_v8 = vld [vmem:[%s13872_s5 + $0x1e0] sm:$0xff] }
 0x480   :  { %6251 = vmatprep.subr.bf16.mxu0 %v10381_v9  ;;  %10003 = vmatprep.subr.bf16.mxu1 %v10002_v46  ;;  %v6337_v9 = vld [vmem:[%s13872_s5 + $0x1e8] sm:$0xff] }
 0x483   :  { %6252 = vmatpush1.bf16.msra.mxu0 %v10379_v10  ;;  %10005 = vmatpush3.bf16.msra.mxu1 %v10004_v53  ;;  %v6368_v10 = vld [vmem:[%s13872_s5 + $0x2e0] sm:$0xff] }
 0x484   :  { %6253 = vmatprep.subr.bf16.mxu0 %v10384_v52  ;;  %10007 = vmatprep.subr.bf16.mxu1 %v10006_v62  ;;  %v10010_v52 = vpack.c.bf16 %v6337_v9, %v6336_v8 }
 0x487   :  { %6254 = vmatpush1.bf16.msra.mxu0 %v10382_v11  ;;  %10009 = vmatpush3.bf16.msra.mxu1 %v10008_v4  ;;  %v6369_v11 = vld [vmem:[%s13872_s5 + $0x2e8] sm:$0xff] }
 0x488   :  { %6255 = vmatprep.subr.bf16.mxu0 %v10387_v12  ;;  %v6320_v12 = vld [vmem:[%s13872_s5 + $0x160] sm:$0xff]  ;;  %10011 = vmatprep.subr.bf16.mxu1 %v10010_v52 }
 0x48b   :  { %6256 = vmatpush1.bf16.msra.mxu0 %v10385_v13  ;;  %v6321_v13 = vld [vmem:[%s13872_s5 + $0x168] sm:$0xff] }
 0x48c   :  { %6257 = vmatprep.subr.bf16.mxu0 %v10390_v14  ;;  %v10042_v14 = vpack.c.bf16 %v6369_v11, %v6368_v10  ;;  %v10012_v15 = vpack.c.bf16 %v6321_v13, %v6320_v12 }
 0x48e   :  { %10013 = vmatpush3.bf16.msra.mxu1 %v10012_v15 }
 0x48f   :  { %6258 = vmatpush1.bf16.msra.mxu0 %v10388_v17  ;;  %v6353_v17 = vld [vmem:[%s13872_s5 + $0x268] sm:$0xff] }
 0x490   :  { %10019 = vmatprep.subr.bf16.mxu0 %v10018_v18  ;;  %v6338_v18 = vld [vmem:[%s13872_s5 + $0x1f0] sm:$0xff]  ;;  %v10044_v19 = vpack.c.bf16 %v6353_v17, %v6352_v16 }
 0x492   :  { %6260 = vmatmul.mubr.bf16.vlgmr.msra.gmra.mrb[8].mxu0 %v12846_v49  ;;  %v6363_v49 = vld [vmem:[%s13872_s5 + $0x2b8] sm:$0xff] }
 0x493   :  { %10021 = vmatpush3.bf16.msra.mxu0 %v10020_v23  ;;  %v10030_v36 = vpack.c.bf16 %v6363_v49, %v6362_v34  ;;  %v10014_v23 = vpack.c.bf16 %v6339_v20, %v6338_v18  ;;  %v6389_v34 = vld [vmem:[%s13872_s5 + $0x388] sm:$0xff] }
 0x494   :  { %10023 = vmatprep.subr.bf16.mxu0 %v10022_v24  ;;  %v10046_v24 = vpack.c.bf16 %v6371_v22, %v6370_v21  ;;  %v10050_v49 = vpack.c.bf16 %v6389_v34, %v6388_v33 }
 0x495   :  { %10015 = vmatprep.subr.bf16.mxu1 %v10014_v23 }
 0x496   :  { %10017 = vmatpush3.bf16.msra.mxu1 %v10016_v29 }
 0x497   :  { %10025 = vmatpush3.bf16.msra.mxu0 %v10024_v30  ;;  %v6355_v30 = vld [vmem:[%s13872_s5 + $0x278] sm:$0xff]  ;;  %10051 = vmatprep.subr.bf16.mxu1 %v10050_v49  ;;  %v6372_v49 = vld [vmem:[%s13872_s5 + $0x300] sm:$0xff] }
 0x498   :  { %10027 = vmatprep.subr.bf16.mxu0 %v10026_v31  ;;  %v10048_v31 = vpack.c.bf16 %v6355_v30, %v6354_v27 }
 0x49b   :  { %10029 = vmatpush3.bf16.msra.mxu0 %v10028_v35 }
 0x49c   :  { %10031 = vmatprep.subr.bf16.mxu0 %v10030_v36 }
 0x49f   :  { %10033 = vmatpush3.bf16.msra.mxu0 %v10032_v42 }
 0x4a0   :  { %10035 = vmatprep.subr.bf16.mxu0 %v10034_v51 }
 0x4a3   :  { %10037 = vmatpush3.bf16.msra.mxu0 %v10036_v56 }
 0x4a4   :  { %10039 = vmatprep.subr.bf16.mxu0 %v10038_v3 }
 0x4a7   :  { %10041 = vmatpush3.bf16.msra.mxu0 %v10040_v7 }
 0x4a8   :  { %10043 = vmatprep.subr.bf16.mxu0 %v10042_v14 }
 0x4ab   :  { %10045 = vmatpush3.bf16.msra.mxu0 %v10044_v19 }
 0x4ac   :  { %10047 = vmatprep.subr.bf16.mxu0 %v10046_v24 }
 0x4af   :  { %10049 = vmatpush3.bf16.msra.mxu0 %v10048_v31 }
 0x4b0   :  { %10082 = vmatprep.subr.bf16.mxu0 %v10535_v32 }
 0x525   :  { %v13183_v35 = vpop.f32.mrb[4].mxu0  ;;  %v13185_v36 = vpop.f32.mrb[8].mxu1 }
 0x526   :  { %v6417_v37 = vsel %vm5219_vm2, %v13183_v35, 0.0  ;;  %v6467_v38 = vmul.f32 %v13183_v35, %v13183_v35  ;;  %v6431_v39 = vsel %vm5219_vm2, %v13185_v36, 0.0  ;;  %v6469_v40 = vmul.f32 %v13185_v36, %v13185_v36  ;;  %v13195_v41 = vpop.f32.mrb[5].mxu0  ;;  %v13197_v42 = vpop.f32.mrb[9].mxu1 }
 0x527   :  { %v6418_v43 = vrot.slane %v6417_v37, 4  ;;  %v6432_v44 = vrot.slane %v6431_v39, 4  ;;  %v6424_v45 = vsel %vm5219_vm2, %v13195_v41, 0.0  ;;  %v6468_v46 = vmul.f32 %v13195_v41, %v13195_v41  ;;  %v6183_v47 = vpop.f32.mrb[6].mxu0  ;;  %v6224_v48 = vpop.f32.mrb[10].mxu1 }
 0x528   :  { %v6474_v50 = vsel %vm5219_vm2, %v6467_v38, 0.0  ;;  %v6488_v51 = vsel %vm5219_vm2, %v6469_v40, 0.0  ;;  %v6425_v53 = vrot.slane %v6424_v45, 4  ;;  %v6438_v54 = vsel %vm5219_vm2, %v13197_v42, 0.0  ;;  %v6184_v55 = vpop.f32.mrb[7].mxu0  ;;  %v6225_v56 = vpop.f32.mrb[11].mxu1 }
 0x529   :  { %v6419_v59 = vadd.f32 %v6418_v43, %v6417_v37  ;;  %v6475_v60 = vrot.slane %v6474_v50, 4  ;;  %v6433_v61 = vadd.f32 %v6432_v44, %v6431_v39  ;;  %v6489_v62 = vrot.slane %v6488_v51, 4  ;;  %v6373_v37 = vld [vmem:[%s13872_s5 + $0x308] sm:$0xff]  ;;  %v6390_v40 = vld [vmem:[%s13872_s5 + $0x390] sm:$0xff]  ;;  %v6391_v43 = vld [vmem:[%s13872_s5 + $0x398] sm:$0xff] }
 0x52a   :  { %v6426_v63 = vadd.f32 %v6425_v53, %v6424_v45  ;;  %v6481_v0 = vsel %vm5219_vm2, %v6468_v46, 0.0  ;;  %v6439_v2 = vrot.slane %v6438_v54, 4  ;;  %v6470_v3 = vmul.f32 %v13197_v42, %v13197_v42  ;;  %v6404_v47 = vld [vmem:[%s13872_s5 + $0x400] sm:$0xff]  ;;  %v6405_v48 = vld [vmem:[%s13872_s5 + $0x408] sm:$0xff] }
 0x52b   :  { %v6420_v4 = vrot.slane %v6419_v59, 2  ;;  %v6476_v5 = vadd.f32 %v6475_v60, %v6474_v50  ;;  %v6490_v6 = vadd.f32 %v6489_v62, %v6488_v51  ;;  %v6482_v8 = vrot.slane %v6481_v0, 4  ;;  %v6374_v60 = vld [vmem:[%s13872_s5 + $0x310] sm:$0xff] }
 0x52c   :  { %v6427_v7 = vrot.slane %v6426_v63, 2  ;;  %v6440_v9 = vadd.f32 %v6439_v2, %v6438_v54  ;;  %v6495_v10 = vsel %vm5219_vm2, %v6470_v3, 0.0  ;;  %v6434_v11 = vrot.slane %v6433_v61, 2  ;;  %v6392_v2 = vld [vmem:[%s13872_s5 + $0x3a0] sm:$0xff]  ;;  %v6393_v3 = vld [vmem:[%s13872_s5 + $0x3a8] sm:$0xff] }
 0x52d   :  { %v6477_v52 = vrot.slane %v6476_v5, 2  ;;  %v6491_v12 = vrot.slane %v6490_v6, 2  ;;  %v6483_v14 = vadd.f32 %v6482_v8, %v6481_v0  ;;  %v6496_v16 = vrot.slane %v6495_v10, 4 }
 0x52e   :  { %v6428_v13 = vadd.f32 %v6427_v7, %v6426_v63  ;;  %v6441_v15 = vrot.slane %v6440_v9, 2  ;;  %v6421_v17 = vadd.f32 %v6420_v4, %v6419_v59  ;;  %v6435_v23 = vadd.f32 %v6434_v11, %v6433_v61  ;;  %v6375_v61 = vld [vmem:[%s13872_s5 + $0x318] sm:$0xff] }
 0x52f   :  { %v6478_v18 = vadd.f32 %v6477_v52, %v6476_v5  ;;  %v6492_v19 = vadd.f32 %v6491_v12, %v6490_v6  ;;  %v6484_v20 = vrot.slane %v6483_v14, 2  ;;  %v6497_v22 = vadd.f32 %v6496_v16, %v6495_v10  ;;  %v6406_v5 = vld [vmem:[%s13872_s5 + $0x410] sm:$0xff]  ;;  %v6407_v6 = vld [vmem:[%s13872_s5 + $0x418] sm:$0xff]  ;;  %v6376_v10 = vld [vmem:[%s13872_s5 + $0x320] sm:$0xff] }
 0x530   :  { %v6442_v21 = vadd.f32 %v6441_v15, %v6440_v9  ;;  %v6429_v26 = vrot.slane %v6428_v13, 1  ;;  %v6422_v29 = vrot.slane %v6421_v17, 1  ;;  %v6436_v38 = vrot.slane %v6435_v23, 1  ;;  %v6377_v52 = vld [vmem:[%s13872_s5 + $0x328] sm:$0xff]  ;;  %v6394_v12 = vld [vmem:[%s13872_s5 + $0x3b0] sm:$0xff] }
 0x531   :  { %v6479_v24 = vrot.slane %v6478_v18, 1  ;;  %v6498_v25 = vrot.slane %v6497_v22, 2  ;;  %v6485_v27 = vadd.f32 %v6484_v20, %v6483_v14  ;;  %v6493_v30 = vrot.slane %v6492_v19, 1  ;;  %v6378_v16 = vld [vmem:[%s13872_s5 + $0x330] sm:$0xff] }
 0x532   :  { %v6443_v33 = vrot.slane %v6442_v21, 1  ;;  %v6430_v44 = vadd.f32 %v6429_v26, %v6428_v13  ;;  %v6423_v50 = vadd.f32 %v6422_v29, %v6421_v17  ;;  %v10052_v53 = vpack.c.bf16 %v6373_v37, %v6372_v49  ;;  %v6395_v13 = vld [vmem:[%s13872_s5 + $0x3b8] sm:$0xff]  ;;  %v6382_v49 = vld [vmem:[%s13872_s5 + $0x350] sm:$0xff] }
 0x533   :  { %v6486_v31 = vrot.slane %v6485_v27, 1  ;;  %v6499_v34 = vadd.f32 %v6498_v25, %v6497_v22  ;;  %v6480_v39 = vadd.f32 %v6479_v24, %v6478_v18  ;;  %v6494_v51 = vadd.f32 %v6493_v30, %v6492_v19  ;;  %v6379_v17 = vld [vmem:[%s13872_s5 + $0x338] sm:$0xff]  ;;  %v6396_v18 = vld [vmem:[%s13872_s5 + $0x3c0] sm:$0xff]  ;;  %v6397_v19 = vld [vmem:[%s13872_s5 + $0x3c8] sm:$0xff] }
 0x534   :  { %v6444_v55 = vadd.f32 %v6443_v33, %v6442_v21  ;;  %v10054_v59 = vpack.c.bf16 %v6391_v43, %v6390_v40  ;;  %v6437_v63 = vadd.f32 %v6436_v38, %v6435_v23  ;;  %v10083_v0 = vpack.c.bf16 %v6405_v48, %v6404_v47  ;;  %v6380_v22 = vld [vmem:[%s13872_s5 + $0x340] sm:$0xff]  ;;  %v6381_v23 = vld [vmem:[%s13872_s5 + $0x348] sm:$0xff]  ;;  %v6398_v25 = vld [vmem:[%s13872_s5 + $0x3d0] sm:$0xff] }
 0x535   :  { %v6487_v45 = vadd.f32 %v6486_v31, %v6485_v27  ;;  %v6500_v46 = vrot.slane %v6499_v34, 1  ;;  %v6523_v62 = vsel %vm5250_vm3, %v6423_v50, %v6480_v39  ;;  %v10056_v8 = vpack.c.bf16 %v6375_v61, %v6374_v60  ;;  %v6399_v26 = vld [vmem:[%s13872_s5 + $0x3d8] sm:$0xff]  ;;  %v6400_v40 = vld [vmem:[%s13872_s5 + $0x3e0] sm:$0xff]  ;;  %v6401_v43 = vld [vmem:[%s13872_s5 + $0x3e8] sm:$0xff] }
 0x536   :  { %v6525_v7 = vsel %vm5250_vm3, %v6437_v63, %v6494_v51  ;;  %v10058_v9 = vpack.c.bf16 %v6393_v3, %v6392_v2  ;;  %v10086_v11 = vpack.c.bf16 %v6407_v6, %v6406_v5  ;;  %v10060_v14 = vpack.c.bf16 %v6377_v52, %v6376_v10  ;;  %v6383_v37 = vld [vmem:[%s13872_s5 + $0x358] sm:$0xff]  ;;  %v6384_v51 = vld [vmem:[%s13872_s5 + $0x360] sm:$0xff] }
 0x537   :  { %v6524_v54 = vsel %vm5250_vm3, %v6430_v44, %v6487_v45  ;;  %v6501_v56 = vadd.f32 %v6500_v46, %v6499_v34  ;;  %v10062_v15 = vpack.c.bf16 %v6395_v13, %v6394_v12  ;;  %v10064_v20 = vpack.c.bf16 %v6379_v17, %v6378_v16  ;;  %v6387_v2 = vld [vmem:[%s13872_s5 + $0x378] sm:$0xff] }
 0x538   :  { %6598 = vmatprep.mubr.f32.mxu1 %v6524_v54  ;;  %v10066_v21 = vpack.c.bf16 %v6397_v19, %v6396_v18  ;;  %v10068_v31 = vpack.c.bf16 %v6381_v23, %v6380_v22  ;;  %v10070_v34 = vpack.c.bf16 %v6399_v26, %v6398_v25  ;;  %v10072_v46 = vpack.c.bf16 %v6383_v37, %v6382_v49  ;;  %v6402_v54 = vld [vmem:[%s13872_s5 + $0x3f0] sm:$0xff] }
 0x539   :  { %v6526_v4 = vsel %vm5250_vm3, %v6444_v55, %v6501_v56  ;;  %6599 = vmatmul.mubr.f32.vlgmr.msra.gmra.mrb[6].mxu1 %v6523_v62  ;;  %v10074_v50 = vpack.c.bf16 %v6401_v43, %v6400_v40  ;;  %v6403_v55 = vld [vmem:[%s13872_s5 + $0x3f8] sm:$0xff] }
 0x53a   :  { %6668 = vmatprep.mubr.f32.mxu0 %v6526_v4  ;;  %10053 = vmatpush3.bf16.msra.mxu1 %v10052_v53  ;;  %v6385_v53 = vld [vmem:[%s13872_s5 + $0x368] sm:$0xff]  ;;  %v10078_v63 = vpack.c.bf16 %v6403_v55, %v6402_v54  ;;  %v6408_v54 = vld [vmem:[%s13873_s6 + $0x10] sm:$0xff] }
 0x53b   :  { %6669 = vmatmul.mubr.f32.vlgmr.msra.gmra.mrb[2].mxu0 %v6525_v7  ;;  %10055 = vmatprep.subr.bf16.mxu1 %v10054_v59  ;;  %v10076_v60 = vpack.c.bf16 %v6385_v53, %v6384_v51  ;;  %v6409_v53 = vld [vmem:[%s13873_s6 + $0x18] sm:$0xff]  ;;  %v6411_v55 = vld [vmem:[%s13873_s6 + $0x28] sm:$0xff] }
 0x53c   :  { %10084 = vmatpush3.bf16.msra.mxu0 %v10083_v0  ;;  %9942 = vmatprep.mubr.msk.f32.mxu0 %vm10536_vm5, %v10534_v28  ;;  %v6386_v0 = vld [vmem:[%s13872_s5 + $0x370] sm:$0xff] }
 0x53d   :  { %10085 = vmatprep.subr.bf16.mxu0 %v10535_v32  ;;  %v10080_v5 = vpack.c.bf16 %v6387_v2, %v6386_v0 }
 0x53e   :  { %10057 = vmatpush3.bf16.msra.mxu1 %v10056_v8 }
 0x53f   :  { %10059 = vmatprep.subr.bf16.mxu1 %v10058_v9 }
 0x540   :  { %10087 = vmatpush3.bf16.msra.mxu0 %v10086_v11 }
 0x541   :  { %6837 = vmatprep.subr.mxu0 %v6409_v53 }
 0x542   :  { %10061 = vmatpush3.bf16.msra.mxu1 %v10060_v14 }
 0x543   :  { %10063 = vmatprep.subr.bf16.mxu1 %v10062_v15 }
 0x545   :  { %v9746_v24 = vpop.f32.mrb[12].mxu1 }
 0x546   :  { %v9747_v27 = vpop.f32.mrb[13].mxu1  ;;  %10065 = vmatpush3.bf16.msra.mxu1 %v10064_v20 }
 0x547   :  { %v13290_v29 = vadd.f32 %v9747_v27, %v9746_v24  ;;  %v9749_v30 = vpop.f32.mrb[14].mxu1  ;;  %10067 = vmatprep.subr.bf16.mxu1 %v10066_v21 }
 0x548   :  { %v9750_v33 = vpop.f32.mrb[15].mxu1 }
 0x549   :  { %v6460_v38 = vsel %vm6459_vm6, %v13290_v29, 0.0  ;;  %v6473_v39 = vmul.f32 %v13290_v29, %v13290_v29 }
 0x54a   :  { %v6461_v44 = vrot.slane %v6460_v38, 4  ;;  %10069 = vmatpush3.bf16.msra.mxu1 %v10068_v31 }
 0x54b   :  { %v6516_v45 = vsel %vm6459_vm6, %v6473_v39, 0.0  ;;  %10071 = vmatprep.subr.bf16.mxu1 %v10070_v34 }
 0x54c   :  { %v6462_v47 = vadd.f32 %v6461_v44, %v6460_v38  ;;  %v6517_v48 = vrot.slane %v6516_v45, 4 }
 0x54e   :  { %v6463_v56 = vrot.slane %v6462_v47, 2  ;;  %v6518_v59 = vadd.f32 %v6517_v48, %v6516_v45  ;;  %10073 = vmatpush3.bf16.msra.mxu1 %v10072_v46 }
 0x54f   :  { %10075 = vmatprep.subr.bf16.mxu1 %v10074_v50 }
 0x550   :  { %v6464_v61 = vadd.f32 %v6463_v56, %v6462_v47  ;;  %v6519_v62 = vrot.slane %v6518_v59, 2 }
 0x552   :  { %v6465_v3 = vrot.slane %v6464_v61, 1  ;;  %v6520_v4 = vadd.f32 %v6519_v62, %v6518_v59  ;;  %10077 = vmatpush3.bf16.msra.mxu1 %v10076_v60 }
 0x553   :  { %10079 = vmatprep.subr.bf16.mxu1 %v10078_v63 }
 0x554   :  { %v6521_v6 = vrot.slane %v6520_v4, 1  ;;  %v6466_v7 = vadd.f32 %v6465_v3, %v6464_v61 }
 0x556   :  { %v6522_v8 = vadd.f32 %v6521_v6, %v6520_v4  ;;  %10081 = vmatpush3.bf16.msra.mxu1 %v10080_v5 }
 0x558   :  { %v6529_v9 = vsel %vm5250_vm3, %v6466_v7, %v6522_v8 }
 0x559   :  { %9943 = vmatmul.mubr.msk.f32.vlgmr.msra.gmra.mrb[12].mxu0 %vm6530_vm7, %v6529_v9 }
 0x55a   :  { %6901 = vmatprep.mubr.f32.mxu0 %v10534_v28  ;;  %6838 = vmatpush1.msra.mxu0 %v6408_v54 }
 0x55b   :  { %6908 = vmatprep.subr.mxu0 %v6411_v55 }
 0x565   :  { %v13328_v10 = vpop.f32.mrb[8].mxu0 }
 0x566   :  { %v6445_v52 = vsel %vm5219_vm2, %v13328_v10, 0.0  ;;  %v6471_v11 = vmul.f32 %v13328_v10, %v13328_v10  ;;  %v13334_v12 = vpop.f32.mrb[9].mxu0 }
 0x567   :  { %v6446_v13 = vrot.slane %v6445_v52, 4  ;;  %v6452_v14 = vsel %vm5219_vm2, %v13334_v12, 0.0  ;;  %v6472_v15 = vmul.f32 %v13334_v12, %v13334_v12  ;;  %v6265_v16 = vpop.f32.mrb[10].mxu0 }
 0x568   :  { %v6502_v17 = vsel %vm5219_vm2, %v6471_v11, 0.0  ;;  %v6453_v18 = vrot.slane %v6452_v14, 4  ;;  %v6266_v19 = vpop.f32.mrb[11].mxu0 }
 0x569   :  { %v6447_v20 = vadd.f32 %v6446_v13, %v6445_v52  ;;  %v6503_v21 = vrot.slane %v6502_v17, 4  ;;  %v6509_v22 = vsel %vm5219_vm2, %v6472_v15, 0.0 }
 0x56a   :  { %v6454_v23 = vadd.f32 %v6453_v18, %v6452_v14  ;;  %v6510_v24 = vrot.slane %v6509_v22, 4 }
 0x56b   :  { %v6448_v25 = vrot.slane %v6447_v20, 2  ;;  %v6504_v26 = vadd.f32 %v6503_v21, %v6502_v17  ;;  %v6415_v17 = vld [vmem:[%s13874_s7 + $0x2] sm:$0x1] }
 0x56c   :  { %v6455_v27 = vrot.slane %v6454_v23, 2  ;;  %v6511_v30 = vadd.f32 %v6510_v24, %v6509_v22  ;;  %v6410_v24 = vld [vmem:[%s13873_s6 + $0x20] sm:$0xff] }
 0x56d   :  { %v6449_v31 = vadd.f32 %v6448_v25, %v6447_v20  ;;  %v6505_v33 = vrot.slane %v6504_v26, 2  ;;  %v6416_v20 = vld [vmem:[%s13874_s7 + $0x3] sm:$0x1] }
 0x56e   :  { %v6456_v34 = vadd.f32 %v6455_v27, %v6454_v23  ;;  %v6512_v49 = vrot.slane %v6511_v30, 2  ;;  %v6412_v27 = vld [vmem:[%s13873_s6 + $0x30] sm:$0xff] }
 0x56f   :  { %v6506_v37 = vadd.f32 %v6505_v33, %v6504_v26  ;;  %v6450_v40 = vrot.slane %v6449_v31, 1  ;;  %v6413_v26 = vld [vmem:[%s13873_s6 + $0x38] sm:$0xff] }
 0x570   :  { %v6457_v38 = vrot.slane %v6456_v34, 1  ;;  %v6513_v39 = vadd.f32 %v6512_v49, %v6511_v30  ;;  %v6414_v30 = vld [vmem:[%s13873_s6 + $0x40] sm:$0xff] }
 0x571   :  { %v6507_v43 = vrot.slane %v6506_v37, 1  ;;  %v6451_v48 = vadd.f32 %v6450_v40, %v6449_v31 }
 0x572   :  { %v6514_v44 = vrot.slane %v6513_v39, 1  ;;  %v6458_v46 = vadd.f32 %v6457_v38, %v6456_v34 }
 0x573   :  { %v6508_v45 = vadd.f32 %v6507_v43, %v6506_v37 }
 0x574   :  { %v6515_v47 = vadd.f32 %v6514_v44, %v6513_v39 }
 0x575   :  { %v6527_v51 = vsel %vm5250_vm3, %v6451_v48, %v6508_v45 }
 0x576   :  { %v6528_v50 = vsel %vm5250_vm3, %v6458_v46, %v6515_v47 }
 0x577   :  { %6738 = vmatprep.mubr.f32.mxu1 %v6528_v50 }
 0x578   :  { %6739 = vmatmul.mubr.f32.vlgmr.msra.gmra.mrb[16].mxu1 %v6527_v51 }
 0x60c   :  { %v9784_v56 = vpop.f32.mrb[6].mxu1 }
 0x60d   :  { %v9785_v59 = vpop.f32.mrb[7].mxu1 }
 0x60e   :  { %v9819_v60 = vpop.f32.mrb[2].mxu0  ;;  %v9786_v61 = vadd.f32 %v9785_v59, %v9784_v56 }
 0x60f   :  { %v9820_v62 = vpop.f32.mrb[3].mxu0 }
 0x610   :  { %v9821_v63 = vadd.f32 %v9820_v62, %v9819_v60 }
 0x612   :  { %v6671_v0 = vadd.f32 %v9821_v63, %v9786_v61 }
 0x62c   :  { %v6810_v2 = vpop.f32.mrb[12].mxu0 }
 0x62d   :  { %v9944_v3 = vpop.f32.mrb[13].mxu0 }
 0x64b   :  { %v9854_v4 = vpop.f32.mrb[16].mxu1 }
 0x64c   :  { %v9855_v5 = vpop.f32.mrb[17].mxu1 }
 0x64d   :  { %v9856_v6 = vadd.f32 %v9855_v5, %v9854_v4 }
 0x64f   :  { %v6741_v7 = vadd.f32 %v9856_v6, %v6671_v0 }
 0x651   :  { %v6811_v8 = vadd.f32 %v6810_v2, %v6741_v7 }
 0x653   :  { %v6814_v9 = vmul.f32 0.005, %v6811_v8 }
 0x655   :  { %v6815_v52 = vmul.f32 %v6814_v9, %v6814_v9 }
 0x657   :  { %v6817_v11 = vrot.slane %v6815_v52, 7 }
 0x659   :  { %v6819_v13 = vsub.f32 %v6814_v9, %v6817_v11 }
 0x65b   :  { %v6820_v14 = vmax.f32 %v6819_v13, 0.0 }
 0x65d   :  { %v6821_v15 = vadd.f32 1e-05, %v6820_v14 }
 0x65f   :  { %10393 = vrsqrt.f32 %v6821_v15 }
 0x669   :  { %v10394_v16 = vpop.eup %10393 }
 0x66a   :  { %v6824_v18 = vrot.slane %v10394_v16, 1 }
 0x66c   :  { %v6826_v19 = vmul.f32 %v6824_v18, %v6415_v17 }
 0x66e   :  { %v6827_v21 = vmul.f32 %v6826_v19, %v6814_v9 }
 0x670   :  { %v6828_v22 = vsub.f32 %v6416_v20, %v6827_v21 }
 0x672   :  { %v6830_v23 = vrot.slane %v6828_v22, 7 }
 0x674   :  { %v6832_v25 = vsel %vm5250_vm3, %v6826_v19, %v6830_v23 }
 0x675   :  { %9586 = vmatmul.mubr.msk.f32.vlgmr.msra.gmra.mrb[14].mxu0 %vm6833_vm8, %v6832_v25 }
 0x676   :  { %6909 = vmatpush1.msra.mxu0 %v6410_v24  ;;  %6972 = vmatprep.mubr.f32.mxu0 %v10534_v28 }
 0x677   :  { %6979 = vmatprep.subr.mxu0 %v6413_v26 }
 0x679   :  { %9587 = vmatmul.mubr.msk.f32.vlgmr.msra.gmra.mrb[16].mxu0 %vm6833_vm8, %v6832_v25 }
 0x67a   :  { %6980 = vmatpush1.msra.mxu0 %v6412_v27  ;;  %7043 = vmatprep.mubr.f32.mxu0 %v10534_v28 }
 0x67b   :  { %9945 = vmatprep.subr.mxu0 %v10534_v28 }
 0x67d   :  { %9588 = vmatmul.mubr.msk.f32.vlgmr.msra.gmra.mrb[18].mxu0 %vm6833_vm8, %v6832_v25 }
 0x67e   :  { %9946 = vmatpush3.msra.mxu0 %v6414_v30  ;;  %9947 = vmatprep.mubr.msk.f32.mxu0 %vm10536_vm5, %v10534_v28 }
 0x681   :  { %9948 = vmatmul.mubr.msk.f32.vlgmr.msra.gmra.mrb[20].mxu0 %vm6833_vm8, %v6832_v25 }
 0x748   :  { %v6903_v31 = vpop.f32.mrb[14].mxu0 }
 0x749   :  { %v7123_v33 = vrot.slane %v6903_v31, %v12830_v57  ;;  %v6905_v34 = vpop.f32.mrb[15].mxu0  ;;  %v7158_v38 = vrot.slane %v6903_v31, %v12832_v58 }
 0x74a   :  { %v7127_v49 = vrot.slane %v6905_v34, %v12830_v57  ;;  %v7162_v40 = vrot.slane %v6905_v34, %v12832_v58 }
 0x74b   :  { %v7148_v37 = vmul.f32 %v7123_v33, %v13183_v35 }
 0x74c   :  { %v7149_v39 = vmul.f32 %v7127_v49, %v13195_v41  ;;  %v6974_v43 = vpop.f32.mrb[16].mxu0 }
 0x74d   :  { %v13387_v44 = vadd.f32 %v7158_v38, %v7148_v37  ;;  %v7131_v45 = vrot.slane %v6974_v43, %v12830_v57  ;;  %v6976_v46 = vpop.f32.mrb[17].mxu0  ;;  %v7166_v35 = vrot.slane %v6974_v43, %v12832_v58 }
 0x74e   :  { %v7184_v47 = vadd.f32 %v7162_v40, %v7149_v39  ;;  %v7135_v48 = vrot.slane %v6976_v46, %v12830_v57  ;;  %v7170_v54 = vrot.slane %v6976_v46, %v12832_v58 }
 0x74f   :  { %v7190_v50 = vmax.f32 %v13387_v44, 0.0  ;;  %v7150_v51 = vmul.f32 %v7131_v45, %v13185_v36 }
 0x750   :  { %v7191_v53 = vmax.f32 %v7184_v47, 0.0  ;;  %v7151_v41 = vmul.f32 %v7135_v48, %v13197_v42  ;;  %v7045_v55 = vpop.f32.mrb[18].mxu0 }
 0x751   :  { %v13396_v56 = vadd.f32 %v7166_v35, %v7150_v51  ;;  %v7139_v59 = vrot.slane %v7045_v55, %v12830_v57  ;;  %v7047_v60 = vpop.f32.mrb[19].mxu0  ;;  %v7174_v0 = vrot.slane %v7045_v55, %v12832_v58 }
 0x752   :  { %v13399_v61 = vadd.f32 %v7170_v54, %v7151_v41  ;;  %v7143_v62 = vrot.slane %v7047_v60, %v12830_v57  ;;  %v7178_v3 = vrot.slane %v7047_v60, %v12832_v58 }
 0x753   :  { %v7192_v63 = vmax.f32 %v13396_v56, 0.0  ;;  %v7152_v36 = vmul.f32 %v7139_v59, %v13328_v10 }
 0x754   :  { %v7193_v42 = vmax.f32 %v13399_v61, 0.0  ;;  %v7153_v2 = vmul.f32 %v7143_v62, %v13334_v12  ;;  %v7116_v4 = vpop.f32.mrb[20].mxu0 }
 0x755   :  { %v13408_v5 = vadd.f32 %v7174_v0, %v7152_v36  ;;  %v7147_v6 = vrot.slane %v7116_v4, %v12830_v57  ;;  %v9949_v7 = vpop.f32.mrb[21].mxu0  ;;  %v7182_v52 = vrot.slane %v7116_v4, %v12832_v58 }
 0x756   :  { %v13411_v8 = vadd.f32 %v7178_v3, %v7153_v2 }
 0x757   :  { %v7194_v9 = vmax.f32 %v13408_v5, 0.0  ;;  %v7154_v10 = vmul.f32 %v13290_v29, %v7147_v6 }
 0x758   :  { %v7195_v11 = vmax.f32 %v13411_v8, 0.0 }
 0x759   :  { %v13417_v13 = vadd.f32 %v7182_v52, %v7154_v10 }
 0x75b   :  { %v7196_v12 = vmax.f32 %v13417_v13, 0.0 }
 0x75c   :  { %10529 = dma.done.wait [#allocation4], 38400 }
 0x75d   :  { %10530 = vsyncadd [#allocation4], 4294928896  ;;  %v13420_v14 = vpack.c.bf16 %v7191_v53, %v7191_v53  ;;  %v7202_v15 = vld [vmem:[#allocation2 + $0x8] sm:$0xff]  ;;  %v7201_v16 = vld [vmem:[#allocation2] sm:$0xff]  ;;  %vm8197_vm9 = vcmask 1043456   ;;  %vm8131_vm10 = vcmask 287744  }
 0x75e   :  { %v7208_v17 = vld [vmem:[#allocation2 + $0x38] sm:$0xff]  ;;  %7511 = vmatprep.subr.bf16.mxu1 %v7202_v15  ;;  %v7207_v18 = vld [vmem:[#allocation2 + $0x30] sm:$0xff]  ;;  %v7214_v20 = vld [vmem:[#allocation2 + $0x68] sm:$0xff]  ;;  %vm8193_vm11 = vcmask 293888   ;;  %vm8430_vm12 = vcmask 31744  }
 0x75f   :  { %7543 = vmatprep.mubr.bf16.mxu1 %v13420_v14  ;;  %7707 = vmatprep.mubr.bf16.mxu0 %v13420_v14  ;;  %v7204_v29 = vld [vmem:[#allocation2 + $0x18] sm:$0xff]  ;;  %v7203_v19 = vld [vmem:[#allocation2 + $0x10] sm:$0xff]  ;;  %v7210_v21 = vld [vmem:[#allocation2 + $0x48] sm:$0xff] }
 0x760   :  { %7512 = vmatpush1.bf16.msra.mxu1 %v7201_v16  ;;  %7675 = vmatprep.subr.bf16.mxu0 %v7204_v29  ;;  %v7209_v22 = vld [vmem:[#allocation2 + $0x40] sm:$0xff]  ;;  %v7216_v23 = vld [vmem:[#allocation2 + $0x78] sm:$0xff]  ;;  %v7215_v26 = vld [vmem:[#allocation2 + $0x70] sm:$0xff] }
 0x761   :  { %7513 = vmatprep.subr.bf16.mxu1 %v7208_v17  ;;  %7676 = vmatpush1.bf16.msra.mxu0 %v7203_v19  ;;  %v7213_v24 = vld [vmem:[#allocation2 + $0x60] sm:$0xff]  ;;  %v7220_v25 = vld [vmem:[#allocation2 + $0x98] sm:$0xff]  ;;  %v7222_v27 = vld [vmem:[#allocation2 + $0xa8] sm:$0xff] }
 0x762   :  { %7677 = vmatprep.subr.bf16.mxu0 %v7210_v21  ;;  %v7219_v30 = vld [vmem:[#allocation2 + $0x90] sm:$0xff]  ;;  %v7226_v31 = vld [vmem:[#allocation2 + $0xc8] sm:$0xff]  ;;  %v7221_v33 = vld [vmem:[#allocation2 + $0xa0] sm:$0xff] }
 0x763   :  { %v7228_v34 = vld [vmem:[#allocation2 + $0xd8] sm:$0xff]  ;;  %v7225_v49 = vld [vmem:[#allocation2 + $0xc0] sm:$0xff]  ;;  %v7227_v38 = vld [vmem:[#allocation2 + $0xd0] sm:$0xff] }
 0x764   :  { %7514 = vmatpush1.bf16.msra.mxu1 %v7207_v18  ;;  %v7232_v37 = vld [vmem:[#allocation2 + $0xf8] sm:$0xff]  ;;  %v7234_v39 = vld [vmem:[#allocation2 + $0x108] sm:$0xff]  ;;  %v7231_v40 = vld [vmem:[#allocation2 + $0xf0] sm:$0xff] }
 0x765   :  { %7515 = vmatprep.subr.bf16.mxu1 %v7214_v20  ;;  %7678 = vmatpush1.bf16.msra.mxu0 %v7209_v22  ;;  %v7238_v43 = vld [vmem:[#allocation2 + $0x128] sm:$0xff]  ;;  %v7233_v45 = vld [vmem:[#allocation2 + $0x100] sm:$0xff]  ;;  %v7240_v46 = vld [vmem:[#allocation2 + $0x138] sm:$0xff] }
 0x766   :  { %7679 = vmatprep.subr.bf16.mxu0 %v7216_v23  ;;  %v7237_v47 = vld [vmem:[#allocation2 + $0x120] sm:$0xff]  ;;  %v7244_v48 = vld [vmem:[#allocation2 + $0x158] sm:$0xff]  ;;  %v7239_v51 = vld [vmem:[#allocation2 + $0x130] sm:$0xff] }
 0x767   :  { %v7246_v35 = vld [vmem:[#allocation2 + $0x168] sm:$0xff]  ;;  %v7243_v53 = vld [vmem:[#allocation2 + $0x150] sm:$0xff]  ;;  %v7245_v54 = vld [vmem:[#allocation2 + $0x160] sm:$0xff] }
 0x768   :  { %7516 = vmatpush1.bf16.msra.mxu1 %v7213_v24  ;;  %v7250_v41 = vld [vmem:[#allocation2 + $0x188] sm:$0xff]  ;;  %v7252_v55 = vld [vmem:[#allocation2 + $0x198] sm:$0xff]  ;;  %v7249_v59 = vld [vmem:[#allocation2 + $0x180] sm:$0xff] }
 0x769   :  { %7517 = vmatprep.subr.bf16.mxu1 %v7220_v25  ;;  %7680 = vmatpush1.bf16.msra.mxu0 %v7215_v26  ;;  %v7256_v60 = vld [vmem:[#allocation2 + $0x1b8] sm:$0xff]  ;;  %v7251_v62 = vld [vmem:[#allocation2 + $0x190] sm:$0xff]  ;;  %v7258_v36 = vld [vmem:[#allocation2 + $0x1c8] sm:$0xff] }
 0x76a   :  { %7681 = vmatprep.subr.bf16.mxu0 %v7222_v27  ;;  %v7255_v0 = vld [vmem:[#allocation2 + $0x1b0] sm:$0xff]  ;;  %v7262_v2 = vld [vmem:[#allocation2 + $0x1e8] sm:$0xff]  ;;  %v7257_v3 = vld [vmem:[#allocation2 + $0x1c0] sm:$0xff] }
 0x76b   :  { %v7264_v4 = vld [vmem:[#allocation2 + $0x1f8] sm:$0xff]  ;;  %v7261_v6 = vld [vmem:[#allocation2 + $0x1e0] sm:$0xff]  ;;  %v7263_v10 = vld [vmem:[#allocation2 + $0x1f0] sm:$0xff] }
 0x76c   :  { %7518 = vmatpush1.bf16.msra.mxu1 %v7219_v30  ;;  %v7268_v7 = vld [vmem:[#allocation2 + $0x218] sm:$0xff]  ;;  %v7270_v52 = vld [vmem:[#allocation2 + $0x228] sm:$0xff]  ;;  %v7267_v15 = vld [vmem:[#allocation2 + $0x210] sm:$0xff] }
 0x76d   :  { %7519 = vmatprep.subr.bf16.mxu1 %v7226_v31  ;;  %7682 = vmatpush1.bf16.msra.mxu0 %v7221_v33  ;;  %v7274_v16 = vld [vmem:[#allocation2 + $0x248] sm:$0xff]  ;;  %v7269_v17 = vld [vmem:[#allocation2 + $0x220] sm:$0xff]  ;;  %v7276_v29 = vld [vmem:[#allocation2 + $0x258] sm:$0xff] }
 0x76e   :  { %7683 = vmatprep.subr.bf16.mxu0 %v7228_v34  ;;  %v7273_v18 = vld [vmem:[#allocation2 + $0x240] sm:$0xff]  ;;  %v7280_v19 = vld [vmem:[#allocation2 + $0x278] sm:$0xff]  ;;  %v7275_v20 = vld [vmem:[#allocation2 + $0x250] sm:$0xff] }
 0x76f   :  { %v7282_v21 = vld [vmem:[#allocation2 + $0x288] sm:$0xff]  ;;  %v7279_v22 = vld [vmem:[#allocation2 + $0x270] sm:$0xff]  ;;  %v7281_v24 = vld [vmem:[#allocation2 + $0x280] sm:$0xff] }
 0x770   :  { %7520 = vmatpush1.bf16.msra.mxu1 %v7225_v49  ;;  %v7286_v23 = vld [vmem:[#allocation2 + $0x2a8] sm:$0xff]  ;;  %v7288_v25 = vld [vmem:[#allocation2 + $0x2b8] sm:$0xff]  ;;  %v7285_v26 = vld [vmem:[#allocation2 + $0x2a0] sm:$0xff]  ;;  %v13427_v49 = vpack.c.bf16 %v7190_v50, %v7190_v50 }
 0x771   :  { %7521 = vmatprep.subr.bf16.mxu1 %v7232_v37  ;;  %7684 = vmatpush1.bf16.msra.mxu0 %v7227_v38  ;;  %v7292_v27 = vld [vmem:[#allocation2 + $0x2d8] sm:$0xff]  ;;  %v7287_v30 = vld [vmem:[#allocation2 + $0x2b0] sm:$0xff]  ;;  %v7294_v31 = vld [vmem:[#allocation2 + $0x2e8] sm:$0xff] }
 0x772   :  { %7685 = vmatprep.subr.bf16.mxu0 %v7234_v39  ;;  %v7291_v33 = vld [vmem:[#allocation2 + $0x2d0] sm:$0xff]  ;;  %v7298_v34 = vld [vmem:[#allocation2 + $0x308] sm:$0xff]  ;;  %v7293_v37 = vld [vmem:[#allocation2 + $0x2e0] sm:$0xff]  ;;  %v13432_v39 = vpack.c.bf16 %v7193_v42, %v7193_v42 }
 0x773   :  { %v7300_v38 = vld [vmem:[#allocation2 + $0x318] sm:$0xff]  ;;  %v7299_v44 = vld [vmem:[#allocation2 + $0x310] sm:$0xff]  ;;  %v7306_v50 = vld [vmem:[#allocation2 + $0x348] sm:$0xff] }
 0x774   :  { %7522 = vmatpush1.bf16.msra.mxu1 %v7231_v40  ;;  %v7297_v40 = vld [vmem:[#allocation2 + $0x300] sm:$0xff]  ;;  %v7310_v61 = vld [vmem:[#allocation2 + $0x368] sm:$0xff]  ;;  %v7395_v56 = vld [vmem:[#allocation2 + $0x610] sm:$0xff] }
 0x775   :  { %7523 = vmatprep.subr.bf16.mxu1 %v7238_v43  ;;  %7686 = vmatpush1.bf16.msra.mxu0 %v7233_v45  ;;  %v7304_v43 = vld [vmem:[#allocation2 + $0x338] sm:$0xff]  ;;  %v7303_v45 = vld [vmem:[#allocation2 + $0x330] sm:$0xff]  ;;  %v7305_v42 = vld [vmem:[#allocation2 + $0x340] sm:$0xff] }
 0x776   :  { %7687 = vmatprep.subr.bf16.mxu0 %v7240_v46  ;;  %v7312_v46 = vld [vmem:[#allocation2 + $0x378] sm:$0xff]  ;;  %v7406_v8 = vld [vmem:[#allocation2 + $0x668] sm:$0xff]  ;;  %v7495_v5 = vld [vmem:[#allocation2 + $0x930] sm:$0xff] }
 0x777   :  { %v7217_v13 = vld [vmem:[#allocation2 + $0x80] sm:$0xff] }
 0x778   :  { %7524 = vmatpush1.bf16.msra.mxu1 %v7237_v47  ;;  %v7309_v47 = vld [vmem:[#allocation2 + $0x360] sm:$0xff] }
 0x779   :  { %7525 = vmatprep.subr.bf16.mxu1 %v7244_v48  ;;  %7688 = vmatpush1.bf16.msra.mxu0 %v7239_v51  ;;  %v7316_v48 = vld [vmem:[#allocation2 + $0x398] sm:$0xff]  ;;  %v7311_v51 = vld [vmem:[#allocation2 + $0x370] sm:$0xff] }
 0x77a   :  { %7689 = vmatprep.subr.bf16.mxu0 %v7246_v35  ;;  %v7318_v35 = vld [vmem:[#allocation2 + $0x3a8] sm:$0xff] }
 0x77c   :  { %7526 = vmatpush1.bf16.msra.mxu1 %v7243_v53  ;;  %v7315_v53 = vld [vmem:[#allocation2 + $0x390] sm:$0xff] }
 0x77d   :  { %7527 = vmatprep.subr.bf16.mxu1 %v7250_v41  ;;  %7690 = vmatpush1.bf16.msra.mxu0 %v7245_v54  ;;  %v7322_v41 = vld [vmem:[#allocation2 + $0x3c8] sm:$0xff]  ;;  %v7317_v54 = vld [vmem:[#allocation2 + $0x3a0] sm:$0xff] }
 0x77e   :  { %7691 = vmatprep.subr.bf16.mxu0 %v7252_v55  ;;  %v7324_v55 = vld [vmem:[#allocation2 + $0x3d8] sm:$0xff] }
 0x780   :  { %7528 = vmatpush1.bf16.msra.mxu1 %v7249_v59  ;;  %v7321_v59 = vld [vmem:[#allocation2 + $0x3c0] sm:$0xff] }
 0x781   :  { %7529 = vmatprep.subr.bf16.mxu1 %v7256_v60  ;;  %7692 = vmatpush1.bf16.msra.mxu0 %v7251_v62  ;;  %v7328_v60 = vld [vmem:[#allocation2 + $0x3f8] sm:$0xff]  ;;  %v7323_v62 = vld [vmem:[#allocation2 + $0x3d0] sm:$0xff] }
 0x782   :  { %7693 = vmatprep.subr.bf16.mxu0 %v7258_v36  ;;  %v7330_v36 = vld [vmem:[#allocation2 + $0x408] sm:$0xff] }
 0x784   :  { %7530 = vmatpush1.bf16.msra.mxu1 %v7255_v0  ;;  %v7327_v0 = vld [vmem:[#allocation2 + $0x3f0] sm:$0xff] }
 0x785   :  { %7531 = vmatprep.subr.bf16.mxu1 %v7262_v2  ;;  %7694 = vmatpush1.bf16.msra.mxu0 %v7257_v3  ;;  %v7334_v2 = vld [vmem:[#allocation2 + $0x428] sm:$0xff]  ;;  %v7329_v3 = vld [vmem:[#allocation2 + $0x400] sm:$0xff] }
 0x786   :  { %7695 = vmatprep.subr.bf16.mxu0 %v7264_v4  ;;  %v7336_v4 = vld [vmem:[#allocation2 + $0x438] sm:$0xff] }
 0x788   :  { %7532 = vmatpush1.bf16.msra.mxu1 %v7261_v6  ;;  %v7333_v6 = vld [vmem:[#allocation2 + $0x420] sm:$0xff] }
 0x789   :  { %7533 = vmatprep.subr.bf16.mxu1 %v7268_v7  ;;  %7696 = vmatpush1.bf16.msra.mxu0 %v7263_v10  ;;  %v7340_v7 = vld [vmem:[#allocation2 + $0x458] sm:$0xff]  ;;  %v7335_v10 = vld [vmem:[#allocation2 + $0x430] sm:$0xff] }
 0x78a   :  { %7697 = vmatprep.subr.bf16.mxu0 %v7270_v52  ;;  %v7342_v52 = vld [vmem:[#allocation2 + $0x468] sm:$0xff] }
 0x78c   :  { %7534 = vmatpush1.bf16.msra.mxu1 %v7267_v15  ;;  %v7339_v15 = vld [vmem:[#allocation2 + $0x450] sm:$0xff] }
 0x78d   :  { %7535 = vmatprep.subr.bf16.mxu1 %v7274_v16  ;;  %7698 = vmatpush1.bf16.msra.mxu0 %v7269_v17  ;;  %v7346_v16 = vld [vmem:[#allocation2 + $0x488] sm:$0xff]  ;;  %v7341_v17 = vld [vmem:[#allocation2 + $0x460] sm:$0xff] }
 0x78e   :  { %7699 = vmatprep.subr.bf16.mxu0 %v7276_v29  ;;  %v7348_v29 = vld [vmem:[#allocation2 + $0x498] sm:$0xff] }
 0x790   :  { %7536 = vmatpush1.bf16.msra.mxu1 %v7273_v18  ;;  %v7345_v18 = vld [vmem:[#allocation2 + $0x480] sm:$0xff] }
 0x791   :  { %7537 = vmatprep.subr.bf16.mxu1 %v7280_v19  ;;  %7700 = vmatpush1.bf16.msra.mxu0 %v7275_v20  ;;  %v7352_v19 = vld [vmem:[#allocation2 + $0x4b8] sm:$0xff]  ;;  %v7347_v20 = vld [vmem:[#allocation2 + $0x490] sm:$0xff] }
 0x792   :  { %7701 = vmatprep.subr.bf16.mxu0 %v7282_v21  ;;  %v7354_v21 = vld [vmem:[#allocation2 + $0x4c8] sm:$0xff] }
 0x794   :  { %7538 = vmatpush1.bf16.msra.mxu1 %v7279_v22  ;;  %v7351_v22 = vld [vmem:[#allocation2 + $0x4b0] sm:$0xff] }
 0x795   :  { %7539 = vmatprep.subr.bf16.mxu1 %v7286_v23  ;;  %7702 = vmatpush1.bf16.msra.mxu0 %v7281_v24  ;;  %v7358_v23 = vld [vmem:[#allocation2 + $0x4e8] sm:$0xff]  ;;  %v7353_v24 = vld [vmem:[#allocation2 + $0x4c0] sm:$0xff] }
 0x796   :  { %7703 = vmatprep.subr.bf16.mxu0 %v7288_v25  ;;  %v7360_v25 = vld [vmem:[#allocation2 + $0x4f8] sm:$0xff] }
 0x798   :  { %7540 = vmatpush1.bf16.msra.mxu1 %v7285_v26  ;;  %v7357_v26 = vld [vmem:[#allocation2 + $0x4e0] sm:$0xff] }
 0x799   :  { %7541 = vmatprep.subr.bf16.mxu1 %v7292_v27  ;;  %7704 = vmatpush1.bf16.msra.mxu0 %v7287_v30  ;;  %v7364_v27 = vld [vmem:[#allocation2 + $0x518] sm:$0xff]  ;;  %v7359_v30 = vld [vmem:[#allocation2 + $0x4f0] sm:$0xff] }
 0x79a   :  { %7705 = vmatprep.subr.bf16.mxu0 %v7294_v31  ;;  %v7366_v31 = vld [vmem:[#allocation2 + $0x528] sm:$0xff] }
 0x79c   :  { %7542 = vmatpush1.bf16.msra.mxu1 %v7291_v33  ;;  %v7363_v33 = vld [vmem:[#allocation2 + $0x510] sm:$0xff] }
 0x79d   :  { %7552 = vmatprep.subr.bf16.mxu1 %v7298_v34  ;;  %7706 = vmatpush1.bf16.msra.mxu0 %v7293_v37  ;;  %v7370_v34 = vld [vmem:[#allocation2 + $0x548] sm:$0xff]  ;;  %v7365_v37 = vld [vmem:[#allocation2 + $0x520] sm:$0xff] }
 0x79e   :  { %7716 = vmatprep.subr.bf16.mxu0 %v7300_v38  ;;  %v7372_v38 = vld [vmem:[#allocation2 + $0x558] sm:$0xff] }
 0x79f   :  { %7544 = vmatmul.mubr.bf16.vlgmr.msra.gmra.mrb[20].mxu1 %v13427_v49 }
 0x7a0   :  { %7553 = vmatpush1.bf16.msra.mxu1 %v7297_v40  ;;  %7584 = vmatprep.mubr.bf16.mxu1 %v13432_v39  ;;  %v7369_v40 = vld [vmem:[#allocation2 + $0x540] sm:$0xff] }
 0x7a1   :  { %7554 = vmatprep.subr.bf16.mxu1 %v7304_v43  ;;  %7708 = vmatmul.mubr.bf16.vlgmr.msra.gmra.mrb[24].mxu0 %v13427_v49  ;;  %v7376_v43 = vld [vmem:[#allocation2 + $0x578] sm:$0xff] }
 0x7a2   :  { %7717 = vmatpush1.bf16.msra.mxu0 %v7299_v44  ;;  %7748 = vmatprep.mubr.bf16.mxu0 %v13432_v39  ;;  %v7371_v44 = vld [vmem:[#allocation2 + $0x550] sm:$0xff] }
 0x7a3   :  { %7718 = vmatprep.subr.bf16.mxu0 %v7306_v50  ;;  %v7378_v50 = vld [vmem:[#allocation2 + $0x588] sm:$0xff] }
 0x7a4   :  { %7555 = vmatpush1.bf16.msra.mxu1 %v7303_v45  ;;  %v7375_v45 = vld [vmem:[#allocation2 + $0x570] sm:$0xff] }
 0x7a5   :  { %7556 = vmatprep.subr.bf16.mxu1 %v7310_v61  ;;  %v7382_v61 = vld [vmem:[#allocation2 + $0x5a8] sm:$0xff] }
 0x7a6   :  { %7719 = vmatpush1.bf16.msra.mxu0 %v7305_v42  ;;  %v7377_v42 = vld [vmem:[#allocation2 + $0x580] sm:$0xff] }
 0x7a7   :  { %7720 = vmatprep.subr.bf16.mxu0 %v7312_v46  ;;  %v7384_v46 = vld [vmem:[#allocation2 + $0x5b8] sm:$0xff] }
 0x7a8   :  { %7557 = vmatpush1.bf16.msra.mxu1 %v7309_v47  ;;  %v7381_v47 = vld [vmem:[#allocation2 + $0x5a0] sm:$0xff] }
 0x7a9   :  { %7558 = vmatprep.subr.bf16.mxu1 %v7316_v48  ;;  %v7388_v48 = vld [vmem:[#allocation2 + $0x5d8] sm:$0xff] }
 0x7aa   :  { %7721 = vmatpush1.bf16.msra.mxu0 %v7311_v51  ;;  %v7383_v51 = vld [vmem:[#allocation2 + $0x5b0] sm:$0xff] }
 0x7ab   :  { %7722 = vmatprep.subr.bf16.mxu0 %v7318_v35  ;;  %v7390_v35 = vld [vmem:[#allocation2 + $0x5e8] sm:$0xff] }
 0x7ac   :  { %7559 = vmatpush1.bf16.msra.mxu1 %v7315_v53  ;;  %v7387_v53 = vld [vmem:[#allocation2 + $0x5d0] sm:$0xff] }
 0x7ad   :  { %7560 = vmatprep.subr.bf16.mxu1 %v7322_v41  ;;  %v7394_v41 = vld [vmem:[#allocation2 + $0x608] sm:$0xff] }
 0x7ae   :  { %7723 = vmatpush1.bf16.msra.mxu0 %v7317_v54  ;;  %v13441_v54 = vpack.c.bf16 %v7192_v63, %v7192_v63  ;;  %v7402_v63 = vld [vmem:[#allocation2 + $0x648] sm:$0xff] }
 0x7af   :  { %7724 = vmatprep.subr.bf16.mxu0 %v7324_v55  ;;  %v7389_v55 = vld [vmem:[#allocation2 + $0x5e0] sm:$0xff] }
 0x7b0   :  { %7561 = vmatpush1.bf16.msra.mxu1 %v7321_v59  ;;  %v7396_v59 = vld [vmem:[#allocation2 + $0x618] sm:$0xff] }
 0x7b1   :  { %7562 = vmatprep.subr.bf16.mxu1 %v7328_v60  ;;  %v13446_v60 = vpack.c.bf16 %v7195_v11, %v7195_v11  ;;  %v7401_v11 = vld [vmem:[#allocation2 + $0x640] sm:$0xff] }
 0x7b2   :  { %7725 = vmatpush1.bf16.msra.mxu0 %v7323_v62  ;;  %v7393_v62 = vld [vmem:[#allocation2 + $0x600] sm:$0xff] }
 0x7b3   :  { %7726 = vmatprep.subr.bf16.mxu0 %v7330_v36  ;;  %v7400_v36 = vld [vmem:[#allocation2 + $0x638] sm:$0xff] }
 0x7b4   :  { %7563 = vmatpush1.bf16.msra.mxu1 %v7327_v0  ;;  %v7399_v0 = vld [vmem:[#allocation2 + $0x630] sm:$0xff] }
 0x7b5   :  { %7564 = vmatprep.subr.bf16.mxu1 %v7334_v2  ;;  %v7408_v2 = vld [vmem:[#allocation2 + $0x678] sm:$0xff] }
 0x7b6   :  { %7727 = vmatpush1.bf16.msra.mxu0 %v7329_v3  ;;  %v7405_v3 = vld [vmem:[#allocation2 + $0x660] sm:$0xff] }
 0x7b7   :  { %7728 = vmatprep.subr.bf16.mxu0 %v7336_v4  ;;  %v7412_v4 = vld [vmem:[#allocation2 + $0x698] sm:$0xff] }
 0x7b8   :  { %7565 = vmatpush1.bf16.msra.mxu1 %v7333_v6  ;;  %v7407_v6 = vld [vmem:[#allocation2 + $0x670] sm:$0xff] }
 0x7b9   :  { %7566 = vmatprep.subr.bf16.mxu1 %v7340_v7  ;;  %v7414_v7 = vld [vmem:[#allocation2 + $0x6a8] sm:$0xff] }
 0x7ba   :  { %7729 = vmatpush1.bf16.msra.mxu0 %v7335_v10  ;;  %v7411_v10 = vld [vmem:[#allocation2 + $0x690] sm:$0xff] }
 0x7bb   :  { %7730 = vmatprep.subr.bf16.mxu0 %v7342_v52  ;;  %v7418_v52 = vld [vmem:[#allocation2 + $0x6c8] sm:$0xff] }
 0x7bc   :  { %7567 = vmatpush1.bf16.msra.mxu1 %v7339_v15  ;;  %v7413_v15 = vld [vmem:[#allocation2 + $0x6a0] sm:$0xff] }
 0x7bd   :  { %7568 = vmatprep.subr.bf16.mxu1 %v7346_v16  ;;  %v7420_v16 = vld [vmem:[#allocation2 + $0x6d8] sm:$0xff] }
 0x7be   :  { %7731 = vmatpush1.bf16.msra.mxu0 %v7341_v17  ;;  %v7417_v17 = vld [vmem:[#allocation2 + $0x6c0] sm:$0xff] }
 0x7bf   :  { %7732 = vmatprep.subr.bf16.mxu0 %v7348_v29  ;;  %v7424_v29 = vld [vmem:[#allocation2 + $0x6f8] sm:$0xff] }
 0x7c0   :  { %7569 = vmatpush1.bf16.msra.mxu1 %v7345_v18  ;;  %v7419_v18 = vld [vmem:[#allocation2 + $0x6d0] sm:$0xff] }
 0x7c1   :  { %7570 = vmatprep.subr.bf16.mxu1 %v7352_v19  ;;  %v7426_v19 = vld [vmem:[#allocation2 + $0x708] sm:$0xff] }
 0x7c2   :  { %7733 = vmatpush1.bf16.msra.mxu0 %v7347_v20  ;;  %v7423_v20 = vld [vmem:[#allocation2 + $0x6f0] sm:$0xff] }
 0x7c3   :  { %7734 = vmatprep.subr.bf16.mxu0 %v7354_v21  ;;  %v7430_v21 = vld [vmem:[#allocation2 + $0x728] sm:$0xff] }
 0x7c4   :  { %7571 = vmatpush1.bf16.msra.mxu1 %v7351_v22  ;;  %v7425_v22 = vld [vmem:[#allocation2 + $0x700] sm:$0xff] }
 0x7c5   :  { %7572 = vmatprep.subr.bf16.mxu1 %v7358_v23  ;;  %v7432_v23 = vld [vmem:[#allocation2 + $0x738] sm:$0xff] }
 0x7c6   :  { %7735 = vmatpush1.bf16.msra.mxu0 %v7353_v24  ;;  %v7429_v24 = vld [vmem:[#allocation2 + $0x720] sm:$0xff] }
 0x7c7   :  { %7736 = vmatprep.subr.bf16.mxu0 %v7360_v25  ;;  %v7436_v25 = vld [vmem:[#allocation2 + $0x758] sm:$0xff] }
 0x7c8   :  { %7573 = vmatpush1.bf16.msra.mxu1 %v7357_v26  ;;  %v7431_v26 = vld [vmem:[#allocation2 + $0x730] sm:$0xff] }
 0x7c9   :  { %7574 = vmatprep.subr.bf16.mxu1 %v7364_v27  ;;  %v7438_v27 = vld [vmem:[#allocation2 + $0x768] sm:$0xff] }
 0x7ca   :  { %7737 = vmatpush1.bf16.msra.mxu0 %v7359_v30  ;;  %v7435_v30 = vld [vmem:[#allocation2 + $0x750] sm:$0xff] }
 0x7cb   :  { %7738 = vmatprep.subr.bf16.mxu0 %v7366_v31  ;;  %v7442_v31 = vld [vmem:[#allocation2 + $0x788] sm:$0xff] }
 0x7cc   :  { %7575 = vmatpush1.bf16.msra.mxu1 %v7363_v33  ;;  %v7437_v33 = vld [vmem:[#allocation2 + $0x760] sm:$0xff] }
 0x7cd   :  { %7576 = vmatprep.subr.bf16.mxu1 %v7370_v34  ;;  %v7444_v34 = vld [vmem:[#allocation2 + $0x798] sm:$0xff] }
 0x7ce   :  { %7739 = vmatpush1.bf16.msra.mxu0 %v7365_v37  ;;  %v7441_v37 = vld [vmem:[#allocation2 + $0x780] sm:$0xff] }
 0x7cf   :  { %7740 = vmatprep.subr.bf16.mxu0 %v7372_v38  ;;  %v7448_v38 = vld [vmem:[#allocation2 + $0x7b8] sm:$0xff] }
 0x7d0   :  { %7577 = vmatpush1.bf16.msra.mxu1 %v7369_v40  ;;  %v7443_v40 = vld [vmem:[#allocation2 + $0x790] sm:$0xff] }
 0x7d1   :  { %7578 = vmatprep.subr.bf16.mxu1 %v7376_v43  ;;  %v7450_v43 = vld [vmem:[#allocation2 + $0x7c8] sm:$0xff] }
 0x7d2   :  { %7741 = vmatpush1.bf16.msra.mxu0 %v7371_v44  ;;  %v7447_v44 = vld [vmem:[#allocation2 + $0x7b0] sm:$0xff] }
 0x7d3   :  { %7742 = vmatprep.subr.bf16.mxu0 %v7378_v50  ;;  %v7454_v50 = vld [vmem:[#allocation2 + $0x7e8] sm:$0xff] }
 0x7d4   :  { %7579 = vmatpush1.bf16.msra.mxu1 %v7375_v45  ;;  %v7449_v45 = vld [vmem:[#allocation2 + $0x7c0] sm:$0xff] }
 0x7d5   :  { %7580 = vmatprep.subr.bf16.mxu1 %v7382_v61  ;;  %v7456_v61 = vld [vmem:[#allocation2 + $0x7f8] sm:$0xff] }
 0x7d6   :  { %7743 = vmatpush1.bf16.msra.mxu0 %v7377_v42  ;;  %v7453_v42 = vld [vmem:[#allocation2 + $0x7e0] sm:$0xff] }
 0x7d7   :  { %7744 = vmatprep.subr.bf16.mxu0 %v7384_v46  ;;  %v7460_v46 = vld [vmem:[#allocation2 + $0x818] sm:$0xff] }
 0x7d8   :  { %7581 = vmatpush1.bf16.msra.mxu1 %v7381_v47  ;;  %v7455_v47 = vld [vmem:[#allocation2 + $0x7f0] sm:$0xff] }
 0x7d9   :  { %7582 = vmatprep.subr.bf16.mxu1 %v7388_v48  ;;  %v7462_v48 = vld [vmem:[#allocation2 + $0x828] sm:$0xff] }
 0x7da   :  { %7745 = vmatpush1.bf16.msra.mxu0 %v7383_v51  ;;  %v7459_v51 = vld [vmem:[#allocation2 + $0x810] sm:$0xff] }
 0x7db   :  { %7746 = vmatprep.subr.bf16.mxu0 %v7390_v35  ;;  %v7466_v35 = vld [vmem:[#allocation2 + $0x848] sm:$0xff] }
 0x7dc   :  { %7583 = vmatpush1.bf16.msra.mxu1 %v7387_v53  ;;  %v7461_v53 = vld [vmem:[#allocation2 + $0x820] sm:$0xff] }
 0x7dd   :  { %7593 = vmatprep.subr.bf16.mxu1 %v7394_v41  ;;  %v7468_v41 = vld [vmem:[#allocation2 + $0x858] sm:$0xff] }
 0x7de   :  { %7747 = vmatpush1.bf16.msra.mxu0 %v7389_v55  ;;  %v7465_v55 = vld [vmem:[#allocation2 + $0x840] sm:$0xff] }
 0x7df   :  { %7585 = vmatmul.mubr.bf16.vlgmr.msra.gmra.mrb[20].mxu1 %v13441_v54  ;;  %7757 = vmatprep.subr.bf16.mxu0 %v7396_v59  ;;  %v7472_v59 = vld [vmem:[#allocation2 + $0x878] sm:$0xff] }
 0x7e0   :  { %7594 = vmatpush1.bf16.msra.mxu1 %v7393_v62  ;;  %7625 = vmatprep.mubr.bf16.mxu1 %v13446_v60  ;;  %v7467_v62 = vld [vmem:[#allocation2 + $0x850] sm:$0xff] }
 0x7e1   :  { %7595 = vmatprep.subr.bf16.mxu1 %v7400_v36  ;;  %7749 = vmatmul.mubr.bf16.vlgmr.msra.gmra.mrb[24].mxu0 %v13441_v54  ;;  %v7474_v36 = vld [vmem:[#allocation2 + $0x888] sm:$0xff] }
 0x7e2   :  { %7758 = vmatpush1.bf16.msra.mxu0 %v7395_v56  ;;  %7789 = vmatprep.mubr.bf16.mxu0 %v13446_v60  ;;  %v7471_v56 = vld [vmem:[#allocation2 + $0x870] sm:$0xff] }
 0x7e3   :  { %7759 = vmatprep.subr.bf16.mxu0 %v7402_v63  ;;  %v7478_v63 = vld [vmem:[#allocation2 + $0x8a8] sm:$0xff] }
 0x7e4   :  { %7596 = vmatpush1.bf16.msra.mxu1 %v7399_v0  ;;  %v7473_v0 = vld [vmem:[#allocation2 + $0x880] sm:$0xff] }
 0x7e5   :  { %7597 = vmatprep.subr.bf16.mxu1 %v7406_v8  ;;  %v7480_v8 = vld [vmem:[#allocation2 + $0x8b8] sm:$0xff] }
 0x7e6   :  { %7760 = vmatpush1.bf16.msra.mxu0 %v7401_v11  ;;  %v7477_v11 = vld [vmem:[#allocation2 + $0x8a0] sm:$0xff] }
 0x7e7   :  { %7761 = vmatprep.subr.bf16.mxu0 %v7408_v2  ;;  %v7484_v2 = vld [vmem:[#allocation2 + $0x8d8] sm:$0xff] }
 0x7e8   :  { %7598 = vmatpush1.bf16.msra.mxu1 %v7405_v3  ;;  %v7479_v3 = vld [vmem:[#allocation2 + $0x8b0] sm:$0xff] }
 0x7e9   :  { %7599 = vmatprep.subr.bf16.mxu1 %v7412_v4  ;;  %v7486_v4 = vld [vmem:[#allocation2 + $0x8e8] sm:$0xff] }
 0x7ea   :  { %7762 = vmatpush1.bf16.msra.mxu0 %v7407_v6  ;;  %v7483_v6 = vld [vmem:[#allocation2 + $0x8d0] sm:$0xff] }
 0x7eb   :  { %7763 = vmatprep.subr.bf16.mxu0 %v7414_v7  ;;  %v7490_v7 = vld [vmem:[#allocation2 + $0x908] sm:$0xff] }
 0x7ec   :  { %7600 = vmatpush1.bf16.msra.mxu1 %v7411_v10  ;;  %v13455_v10 = vpack.c.bf16 %v7194_v9, %v7194_v9  ;;  %v7206_v9 = vld [vmem:[#allocation2 + $0x28] sm:$0xff] }
 0x7ed   :  { %7601 = vmatprep.subr.bf16.mxu1 %v7418_v52  ;;  %v7485_v52 = vld [vmem:[#allocation2 + $0x8e0] sm:$0xff] }
 0x7ee   :  { %7764 = vmatpush1.bf16.msra.mxu0 %v7413_v15  ;;  %v7492_v15 = vld [vmem:[#allocation2 + $0x918] sm:$0xff] }
 0x7ef   :  { %7765 = vmatprep.subr.bf16.mxu0 %v7420_v16  ;;  %v7489_v16 = vld [vmem:[#allocation2 + $0x900] sm:$0xff] }
 0x7f0   :  { %7602 = vmatpush1.bf16.msra.mxu1 %v7417_v17  ;;  %v7496_v17 = vld [vmem:[#allocation2 + $0x938] sm:$0xff] }
 0x7f1   :  { %7603 = vmatprep.subr.bf16.mxu1 %v7424_v29  ;;  %v7491_v29 = vld [vmem:[#allocation2 + $0x910] sm:$0xff] }
 0x7f2   :  { %7766 = vmatpush1.bf16.msra.mxu0 %v7419_v18  ;;  %v7498_v18 = vld [vmem:[#allocation2 + $0x948] sm:$0xff] }
 0x7f3   :  { %7767 = vmatprep.subr.bf16.mxu0 %v7426_v19  ;;  %v7497_v19 = vld [vmem:[#allocation2 + $0x940] sm:$0xff] }
 0x7f4   :  { %7604 = vmatpush1.bf16.msra.mxu1 %v7423_v20  ;;  %v13464_v20 = vpack.c.bf16 %v7196_v12, %v7196_v12  ;;  %v7223_v12 = vld [vmem:[#allocation2 + $0xb0] sm:$0xff] }
 0x7f5   :  { %7605 = vmatprep.subr.bf16.mxu1 %v7430_v21  ;;  %v7205_v21 = vld [vmem:[#allocation2 + $0x20] sm:$0xff] }
 0x7f6   :  { %7768 = vmatpush1.bf16.msra.mxu0 %v7425_v22  ;;  %v7212_v22 = vld [vmem:[#allocation2 + $0x58] sm:$0xff] }
 0x7f7   :  { %7769 = vmatprep.subr.bf16.mxu0 %v7432_v23  ;;  %v7211_v23 = vld [vmem:[#allocation2 + $0x50] sm:$0xff] }
 0x7f8   :  { %7606 = vmatpush1.bf16.msra.mxu1 %v7429_v24  ;;  %v7218_v24 = vld [vmem:[#allocation2 + $0x88] sm:$0xff] }
 0x7f9   :  { %7607 = vmatprep.subr.bf16.mxu1 %v7436_v25  ;;  %v7224_v25 = vld [vmem:[#allocation2 + $0xb8] sm:$0xff] }
 0x7fa   :  { %7770 = vmatpush1.bf16.msra.mxu0 %v7431_v26  ;;  %v7230_v26 = vld [vmem:[#allocation2 + $0xe8] sm:$0xff] }
 0x7fb   :  { %7771 = vmatprep.subr.bf16.mxu0 %v7438_v27  ;;  %v7229_v27 = vld [vmem:[#allocation2 + $0xe0] sm:$0xff] }
 0x7fc   :  { %7608 = vmatpush1.bf16.msra.mxu1 %v7435_v30  ;;  %v7236_v30 = vld [vmem:[#allocation2 + $0x118] sm:$0xff] }
 0x7fd   :  { %7609 = vmatprep.subr.bf16.mxu1 %v7442_v31  ;;  %v7242_v31 = vld [vmem:[#allocation2 + $0x148] sm:$0xff] }
 0x7fe   :  { %7772 = vmatpush1.bf16.msra.mxu0 %v7437_v33  ;;  %v7241_v33 = vld [vmem:[#allocation2 + $0x140] sm:$0xff] }
 0x7ff   :  { %7773 = vmatprep.subr.bf16.mxu0 %v7444_v34  ;;  %v7248_v34 = vld [vmem:[#allocation2 + $0x178] sm:$0xff] }
 0x800   :  { %7610 = vmatpush1.bf16.msra.mxu1 %v7441_v37  ;;  %v7247_v37 = vld [vmem:[#allocation2 + $0x170] sm:$0xff] }
 0x801   :  { %7611 = vmatprep.subr.bf16.mxu1 %v7448_v38  ;;  %v7254_v38 = vld [vmem:[#allocation2 + $0x1a8] sm:$0xff] }
 0x802   :  { %7774 = vmatpush1.bf16.msra.mxu0 %v7443_v40  ;;  %v7253_v40 = vld [vmem:[#allocation2 + $0x1a0] sm:$0xff] }
 0x803   :  { %7775 = vmatprep.subr.bf16.mxu0 %v7450_v43  ;;  %v7260_v43 = vld [vmem:[#allocation2 + $0x1d8] sm:$0xff] }
 0x804   :  { %7612 = vmatpush1.bf16.msra.mxu1 %v7447_v44  ;;  %v7259_v44 = vld [vmem:[#allocation2 + $0x1d0] sm:$0xff] }
 0x805   :  { %7613 = vmatprep.subr.bf16.mxu1 %v7454_v50  ;;  %v7266_v50 = vld [vmem:[#allocation2 + $0x208] sm:$0xff] }
 0x806   :  { %7776 = vmatpush1.bf16.msra.mxu0 %v7449_v45  ;;  %v7265_v45 = vld [vmem:[#allocation2 + $0x200] sm:$0xff] }
 0x807   :  { %7777 = vmatprep.subr.bf16.mxu0 %v7456_v61  ;;  %v7272_v61 = vld [vmem:[#allocation2 + $0x238] sm:$0xff] }
 0x808   :  { %7614 = vmatpush1.bf16.msra.mxu1 %v7453_v42  ;;  %v7271_v42 = vld [vmem:[#allocation2 + $0x230] sm:$0xff] }
 0x809   :  { %7615 = vmatprep.subr.bf16.mxu1 %v7460_v46  ;;  %v7278_v46 = vld [vmem:[#allocation2 + $0x268] sm:$0xff] }
 0x80a   :  { %7778 = vmatpush1.bf16.msra.mxu0 %v7455_v47  ;;  %v7277_v47 = vld [vmem:[#allocation2 + $0x260] sm:$0xff] }
 0x80b   :  { %7779 = vmatprep.subr.bf16.mxu0 %v7462_v48  ;;  %v7284_v48 = vld [vmem:[#allocation2 + $0x298] sm:$0xff] }
 0x80c   :  { %7616 = vmatpush1.bf16.msra.mxu1 %v7459_v51  ;;  %v7283_v51 = vld [vmem:[#allocation2 + $0x290] sm:$0xff] }
 0x80d   :  { %7617 = vmatprep.subr.bf16.mxu1 %v7466_v35  ;;  %v7290_v35 = vld [vmem:[#allocation2 + $0x2c8] sm:$0xff] }
 0x80e   :  { %7780 = vmatpush1.bf16.msra.mxu0 %v7461_v53  ;;  %v7289_v53 = vld [vmem:[#allocation2 + $0x2c0] sm:$0xff] }
 0x80f   :  { %7781 = vmatprep.subr.bf16.mxu0 %v7468_v41  ;;  %v7296_v41 = vld [vmem:[#allocation2 + $0x2f8] sm:$0xff] }
 0x810   :  { %7618 = vmatpush1.bf16.msra.mxu1 %v7465_v55  ;;  %v7295_v55 = vld [vmem:[#allocation2 + $0x2f0] sm:$0xff] }
 0x811   :  { %7619 = vmatprep.subr.bf16.mxu1 %v7472_v59  ;;  %v7302_v59 = vld [vmem:[#allocation2 + $0x328] sm:$0xff] }
 0x812   :  { %7782 = vmatpush1.bf16.msra.mxu0 %v7467_v62  ;;  %v7301_v62 = vld [vmem:[#allocation2 + $0x320] sm:$0xff] }
 0x813   :  { %7783 = vmatprep.subr.bf16.mxu0 %v7474_v36  ;;  %v7308_v36 = vld [vmem:[#allocation2 + $0x358] sm:$0xff] }
 0x814   :  { %7620 = vmatpush1.bf16.msra.mxu1 %v7471_v56  ;;  %v7307_v56 = vld [vmem:[#allocation2 + $0x350] sm:$0xff] }
 0x815   :  { %7621 = vmatprep.subr.bf16.mxu1 %v7478_v63  ;;  %v8019_v63 = vld [vmem:[%s13872_s5 + $0x4a0] sm:$0xff] }
 0x816   :  { %7784 = vmatpush1.bf16.msra.mxu0 %v7473_v0  ;;  %v8020_v0 = vld [vmem:[%s13872_s5 + $0x4a8] sm:$0xff] }
 0x817   :  { %7785 = vmatprep.subr.bf16.mxu0 %v7480_v8  ;;  %v7314_v8 = vld [vmem:[#allocation2 + $0x388] sm:$0xff] }
 0x818   :  { %7622 = vmatpush1.bf16.msra.mxu1 %v7477_v11  ;;  %v10088_v11 = vpack.c.bf16 %v8020_v0, %v8019_v63  ;;  %v7349_v63 = vld [vmem:[#allocation2 + $0x4a0] sm:$0xff]  ;;  %v7356_v0 = vld [vmem:[#allocation2 + $0x4d8] sm:$0xff] }
 0x819   :  { %7623 = vmatprep.subr.bf16.mxu1 %v7484_v2  ;;  %v8003_v2 = vld [vmem:[%s13872_s5 + $0x420] sm:$0xff] }
 0x81a   :  { %7786 = vmatpush1.bf16.msra.mxu0 %v7479_v3  ;;  %v8021_v3 = vld [vmem:[%s13872_s5 + $0x4b0] sm:$0xff] }
 0x81b   :  { %7787 = vmatprep.subr.bf16.mxu0 %v7486_v4  ;;  %v8022_v4 = vld [vmem:[%s13872_s5 + $0x4b8] sm:$0xff] }
 0x81c   :  { %7624 = vmatpush1.bf16.msra.mxu1 %v7483_v6  ;;  %v8005_v6 = vld [vmem:[%s13872_s5 + $0x430] sm:$0xff] }
 0x81d   :  { %7634 = vmatprep.subr.bf16.mxu1 %v7490_v7  ;;  %v7313_v7 = vld [vmem:[#allocation2 + $0x380] sm:$0xff] }
 0x81e   :  { %7788 = vmatpush1.bf16.msra.mxu0 %v7485_v52  ;;  %v10092_v52 = vpack.c.bf16 %v8022_v4, %v8021_v3  ;;  %v7355_v4 = vld [vmem:[#allocation2 + $0x4d0] sm:$0xff] }
 0x81f   :  { %7626 = vmatmul.mubr.bf16.vlgmr.msra.gmra.mrb[20].mxu1 %v13455_v10  ;;  %7798 = vmatprep.subr.bf16.mxu0 %v7492_v15  ;;  %v8006_v15 = vld [vmem:[%s13872_s5 + $0x438] sm:$0xff] }
 0x820   :  { %7635 = vmatpush1.bf16.msra.mxu1 %v7489_v16  ;;  %7666 = vmatprep.mubr.bf16.mxu1 %v10533_v1  ;;  %v7320_v16 = vld [vmem:[#allocation2 + $0x3b8] sm:$0xff] }
 0x821   :  { %7636 = vmatprep.subr.bf16.mxu1 %v7496_v17  ;;  %7790 = vmatmul.mubr.bf16.vlgmr.msra.gmra.mrb[24].mxu0 %v13455_v10  ;;  %v10094_v17 = vpack.c.bf16 %v8006_v15, %v8005_v6  ;;  %v7362_v6 = vld [vmem:[#allocation2 + $0x508] sm:$0xff] }
 0x822   :  { %7799 = vmatpush1.bf16.msra.mxu0 %v7491_v29  ;;  %7830 = vmatprep.mubr.bf16.mxu0 %v10533_v1  ;;  %v7319_v29 = vld [vmem:[#allocation2 + $0x3b0] sm:$0xff] }
 0x823   :  { %7800 = vmatprep.subr.bf16.mxu0 %v7498_v18  ;;  %v7326_v18 = vld [vmem:[#allocation2 + $0x3e8] sm:$0xff] }
 0x824   :  { %7637 = vmatpush1.bf16.msra.mxu1 %v7495_v5  ;;  %v8023_v5 = vld [vmem:[%s13872_s5 + $0x4c0] sm:$0xff] }
 0x825   :  { %7839 = vmatprep.subr.bf16.mxu1 %v7206_v9  ;;  %v8024_v9 = vld [vmem:[%s13872_s5 + $0x4c8] sm:$0xff] }
 0x826   :  { %7801 = vmatpush1.bf16.msra.mxu0 %v7497_v19  ;;  %v10096_v19 = vpack.c.bf16 %v8024_v9, %v8023_v5  ;;  %v7373_v5 = vld [vmem:[#allocation2 + $0x560] sm:$0xff]  ;;  %v7380_v9 = vld [vmem:[#allocation2 + $0x598] sm:$0xff] }
 0x827   :  { %10089 = vmatprep.subr.bf16.mxu0 %v10088_v11  ;;  %v8034_v11 = vld [vmem:[%s13872_s5 + $0x518] sm:$0xff] }
 0x82b   :  { %9590 = vmatmul.mubr.msk.bf16.vlgmr.msra.gmra.mrb[20].mxu1 %vm6530_vm7, %v13464_v20 }
 0x82c   :  { %7840 = vmatpush1.bf16.msra.mxu1 %v7205_v21  ;;  %7871 = vmatprep.mubr.bf16.mxu1 %v13420_v14  ;;  %v7235_v14 = vld [vmem:[#allocation2 + $0x110] sm:$0xff] }
 0x82d   :  { %7841 = vmatprep.subr.bf16.mxu1 %v7212_v22  ;;  %9591 = vmatmul.mubr.msk.bf16.vlgmr.msra.gmra.mrb[24].mxu0 %vm6530_vm7, %v13464_v20  ;;  %v8007_v21 = vld [vmem:[%s13872_s5 + $0x440] sm:$0xff]  ;;  %v8008_v22 = vld [vmem:[%s13872_s5 + $0x448] sm:$0xff] }
 0x830   :  { %7842 = vmatpush1.bf16.msra.mxu1 %v7211_v23  ;;  %v8025_v23 = vld [vmem:[%s13872_s5 + $0x4d0] sm:$0xff] }
 0x831   :  { %7843 = vmatprep.subr.bf16.mxu1 %v7218_v24  ;;  %v10098_v24 = vpack.c.bf16 %v8008_v22, %v8007_v21  ;;  %v7386_v21 = vld [vmem:[#allocation2 + $0x5c8] sm:$0xff]  ;;  %v7385_v22 = vld [vmem:[#allocation2 + $0x5c0] sm:$0xff] }
 0x834   :  { %7844 = vmatpush1.bf16.msra.mxu1 %v7217_v13  ;;  %v8026_v13 = vld [vmem:[%s13872_s5 + $0x4d8] sm:$0xff] }
 0x835   :  { %7845 = vmatprep.subr.bf16.mxu1 %v7224_v25  ;;  %v8009_v25 = vld [vmem:[%s13872_s5 + $0x450] sm:$0xff] }
 0x838   :  { %7846 = vmatpush1.bf16.msra.mxu1 %v7223_v12  ;;  %v8010_v12 = vld [vmem:[%s13872_s5 + $0x458] sm:$0xff] }
 0x839   :  { %7847 = vmatprep.subr.bf16.mxu1 %v7230_v26  ;;  %v7325_v26 = vld [vmem:[#allocation2 + $0x3e0] sm:$0xff] }
 0x83c   :  { %7848 = vmatpush1.bf16.msra.mxu1 %v7229_v27  ;;  %v10100_v27 = vpack.c.bf16 %v8026_v13, %v8025_v23  ;;  %v7392_v23 = vld [vmem:[#allocation2 + $0x5f8] sm:$0xff]  ;;  %v7398_v13 = vld [vmem:[#allocation2 + $0x628] sm:$0xff] }
 0x83d   :  { %7849 = vmatprep.subr.bf16.mxu1 %v7236_v30  ;;  %v7332_v30 = vld [vmem:[#allocation2 + $0x418] sm:$0xff] }
 0x840   :  { %7850 = vmatpush1.bf16.msra.mxu1 %v7235_v14  ;;  %v10102_v14 = vpack.c.bf16 %v8010_v12, %v8009_v25  ;;  %v7397_v25 = vld [vmem:[#allocation2 + $0x620] sm:$0xff]  ;;  %v7404_v12 = vld [vmem:[#allocation2 + $0x658] sm:$0xff] }
 0x841   :  { %7851 = vmatprep.subr.bf16.mxu1 %v7242_v31  ;;  %v7331_v31 = vld [vmem:[#allocation2 + $0x410] sm:$0xff] }
 0x844   :  { %7852 = vmatpush1.bf16.msra.mxu1 %v7241_v33  ;;  %v7338_v33 = vld [vmem:[#allocation2 + $0x448] sm:$0xff] }
 0x845   :  { %7853 = vmatprep.subr.bf16.mxu1 %v7248_v34  ;;  %v8027_v34 = vld [vmem:[%s13872_s5 + $0x4e0] sm:$0xff] }
 0x848   :  { %7854 = vmatpush1.bf16.msra.mxu1 %v7247_v37  ;;  %v8028_v37 = vld [vmem:[%s13872_s5 + $0x4e8] sm:$0xff] }
 0x849   :  { %7855 = vmatprep.subr.bf16.mxu1 %v7254_v38  ;;  %v10104_v38 = vpack.c.bf16 %v8028_v37, %v8027_v34  ;;  %v7421_v34 = vld [vmem:[#allocation2 + $0x6e0] sm:$0xff]  ;;  %v7428_v37 = vld [vmem:[#allocation2 + $0x718] sm:$0xff] }
 0x84c   :  { %7856 = vmatpush1.bf16.msra.mxu1 %v7253_v40  ;;  %v8011_v40 = vld [vmem:[%s13872_s5 + $0x460] sm:$0xff] }
 0x84d   :  { %7857 = vmatprep.subr.bf16.mxu1 %v7260_v43  ;;  %v8012_v43 = vld [vmem:[%s13872_s5 + $0x468] sm:$0xff] }
 0x850   :  { %7858 = vmatpush1.bf16.msra.mxu1 %v7259_v44  ;;  %v10106_v44 = vpack.c.bf16 %v8012_v43, %v8011_v40  ;;  %v7440_v40 = vld [vmem:[#allocation2 + $0x778] sm:$0xff]  ;;  %v7439_v43 = vld [vmem:[#allocation2 + $0x770] sm:$0xff] }
 0x851   :  { %7859 = vmatprep.subr.bf16.mxu1 %v7266_v50  ;;  %v7337_v50 = vld [vmem:[#allocation2 + $0x440] sm:$0xff] }
 0x854   :  { %7860 = vmatpush1.bf16.msra.mxu1 %v7265_v45  ;;  %v7344_v45 = vld [vmem:[#allocation2 + $0x478] sm:$0xff] }
 0x855   :  { %7861 = vmatprep.subr.bf16.mxu1 %v7272_v61  ;;  %v8029_v61 = vld [vmem:[%s13872_s5 + $0x4f0] sm:$0xff] }
 0x858   :  { %7862 = vmatpush1.bf16.msra.mxu1 %v7271_v42  ;;  %v8030_v42 = vld [vmem:[%s13872_s5 + $0x4f8] sm:$0xff] }
 0x859   :  { %7863 = vmatprep.subr.bf16.mxu1 %v7278_v46  ;;  %v10108_v46 = vpack.c.bf16 %v8030_v42, %v8029_v61  ;;  %v7451_v61 = vld [vmem:[#allocation2 + $0x7d0] sm:$0xff]  ;;  %v7458_v42 = vld [vmem:[#allocation2 + $0x808] sm:$0xff] }
 0x85c   :  { %7864 = vmatpush1.bf16.msra.mxu1 %v7277_v47  ;;  %v8013_v47 = vld [vmem:[%s13872_s5 + $0x470] sm:$0xff] }
 0x85d   :  { %7865 = vmatprep.subr.bf16.mxu1 %v7284_v48  ;;  %v8014_v48 = vld [vmem:[%s13872_s5 + $0x478] sm:$0xff] }
 0x860   :  { %7866 = vmatpush1.bf16.msra.mxu1 %v7283_v51  ;;  %v10110_v51 = vpack.c.bf16 %v8014_v48, %v8013_v47  ;;  %v7464_v47 = vld [vmem:[#allocation2 + $0x838] sm:$0xff]  ;;  %v7463_v48 = vld [vmem:[#allocation2 + $0x830] sm:$0xff] }
 0x861   :  { %7867 = vmatprep.subr.bf16.mxu1 %v7290_v35  ;;  %v7343_v35 = vld [vmem:[#allocation2 + $0x470] sm:$0xff] }
 0x864   :  { %7868 = vmatpush1.bf16.msra.mxu1 %v7289_v53  ;;  %v7350_v53 = vld [vmem:[#allocation2 + $0x4a8] sm:$0xff] }
 0x865   :  { %7869 = vmatprep.subr.bf16.mxu1 %v7296_v41  ;;  %v8031_v41 = vld [vmem:[%s13872_s5 + $0x500] sm:$0xff] }
 0x868   :  { %7870 = vmatpush1.bf16.msra.mxu1 %v7295_v55  ;;  %v8032_v55 = vld [vmem:[%s13872_s5 + $0x508] sm:$0xff] }
 0x869   :  { %7880 = vmatprep.subr.bf16.mxu1 %v7302_v59  ;;  %v10112_v59 = vpack.c.bf16 %v8032_v55, %v8031_v41  ;;  %v7475_v41 = vld [vmem:[#allocation2 + $0x890] sm:$0xff]  ;;  %v7482_v55 = vld [vmem:[#allocation2 + $0x8c8] sm:$0xff] }
 0x86b   :  { %7872 = vmatmul.mubr.bf16.vlgmr.msra.gmra.mrb[24].mxu1 %v13427_v49  ;;  %v8004_v49 = vld [vmem:[%s13872_s5 + $0x428] sm:$0xff] }
 0x86c   :  { %7881 = vmatpush1.bf16.msra.mxu1 %v7301_v62  ;;  %7912 = vmatprep.mubr.bf16.mxu1 %v13432_v39  ;;  %v10090_v39 = vpack.c.bf16 %v8004_v49, %v8003_v2  ;;  %v8015_v62 = vld [vmem:[%s13872_s5 + $0x480] sm:$0xff]  ;;  %v8017_v49 = vld [vmem:[%s13872_s5 + $0x490] sm:$0xff] }
 0x86d   :  { %7882 = vmatprep.subr.bf16.mxu1 %v7308_v36  ;;  %v8016_v36 = vld [vmem:[%s13872_s5 + $0x488] sm:$0xff] }
 0x86e   :  { %10091 = vmatpush3.bf16.msra.mxu0 %v10090_v39  ;;  %v8018_v39 = vld [vmem:[%s13872_s5 + $0x498] sm:$0xff] }
 0x86f   :  { %10093 = vmatprep.subr.bf16.mxu0 %v10092_v52  ;;  %v10118_v3 = vpack.c.bf16 %v8018_v39, %v8017_v49  ;;  %v8052_v52 = vld [vmem:[%s13872_s5 + $0x5a8] sm:$0xff] }
 0x870   :  { %7883 = vmatpush1.bf16.msra.mxu1 %v7307_v56  ;;  %v10114_v56 = vpack.c.bf16 %v8016_v36, %v8015_v62  ;;  %v7488_v62 = vld [vmem:[#allocation2 + $0x8f8] sm:$0xff]  ;;  %v7487_v36 = vld [vmem:[#allocation2 + $0x8f0] sm:$0xff] }
 0x871   :  { %7884 = vmatprep.subr.bf16.mxu1 %v7314_v8  ;;  %v8033_v8 = vld [vmem:[%s13872_s5 + $0x510] sm:$0xff] }
 0x872   :  { %10095 = vmatpush3.bf16.msra.mxu0 %v10094_v17  ;;  %v10116_v2 = vpack.c.bf16 %v8034_v11, %v8033_v8  ;;  %v7368_v17 = vld [vmem:[#allocation2 + $0x538] sm:$0xff]  ;;  %v7499_v8 = vld [vmem:[#allocation2 + $0x950] sm:$0xff] }
 0x873   :  { %10097 = vmatprep.subr.bf16.mxu0 %v10096_v19  ;;  %v7379_v19 = vld [vmem:[#allocation2 + $0x590] sm:$0xff] }
 0x874   :  { %7885 = vmatpush1.bf16.msra.mxu1 %v7313_v7  ;;  %v8051_v7 = vld [vmem:[%s13872_s5 + $0x5a0] sm:$0xff] }
 0x875   :  { %7886 = vmatprep.subr.bf16.mxu1 %v7320_v16  ;;  %v10120_v15 = vpack.c.bf16 %v8052_v52, %v8051_v7  ;;  %v7361_v16 = vld [vmem:[#allocation2 + $0x500] sm:$0xff] }
 0x876   :  { %10099 = vmatpush3.bf16.msra.mxu0 %v10098_v24  ;;  %v7391_v24 = vld [vmem:[#allocation2 + $0x5f0] sm:$0xff] }
 0x877   :  { %10101 = vmatprep.subr.bf16.mxu0 %v10100_v27  ;;  %v7410_v27 = vld [vmem:[#allocation2 + $0x688] sm:$0xff] }
 0x878   :  { %7887 = vmatpush1.bf16.msra.mxu1 %v7319_v29  ;;  %v7367_v29 = vld [vmem:[#allocation2 + $0x530] sm:$0xff] }
 0x879   :  { %7888 = vmatprep.subr.bf16.mxu1 %v7326_v18  ;;  %v7374_v18 = vld [vmem:[#allocation2 + $0x568] sm:$0xff] }
 0x87a   :  { %10103 = vmatpush3.bf16.msra.mxu0 %v10102_v14  ;;  %v7416_v14 = vld [vmem:[#allocation2 + $0x6b8] sm:$0xff] }
 0x87b   :  { %10105 = vmatprep.subr.bf16.mxu0 %v10104_v38  ;;  %v7434_v38 = vld [vmem:[#allocation2 + $0x748] sm:$0xff] }
 0x87c   :  { %7889 = vmatpush1.bf16.msra.mxu1 %v7325_v26  ;;  %v7403_v26 = vld [vmem:[#allocation2 + $0x650] sm:$0xff] }
 0x87d   :  { %7890 = vmatprep.subr.bf16.mxu1 %v7332_v30  ;;  %v7409_v30 = vld [vmem:[#allocation2 + $0x680] sm:$0xff] }
 0x87e   :  { %10107 = vmatpush3.bf16.msra.mxu0 %v10106_v44  ;;  %v7446_v44 = vld [vmem:[#allocation2 + $0x7a8] sm:$0xff] }
 0x87f   :  { %10109 = vmatprep.subr.bf16.mxu0 %v10108_v46  ;;  %v7457_v46 = vld [vmem:[#allocation2 + $0x800] sm:$0xff] }
 0x880   :  { %7891 = vmatpush1.bf16.msra.mxu1 %v7331_v31  ;;  %v7415_v31 = vld [vmem:[#allocation2 + $0x6b0] sm:$0xff] }
 0x881   :  { %7892 = vmatprep.subr.bf16.mxu1 %v7338_v33  ;;  %v7422_v33 = vld [vmem:[#allocation2 + $0x6e8] sm:$0xff] }
 0x882   :  { %10111 = vmatpush3.bf16.msra.mxu0 %v10110_v51  ;;  %v7470_v51 = vld [vmem:[#allocation2 + $0x868] sm:$0xff] }
 0x883   :  { %10113 = vmatprep.subr.bf16.mxu0 %v10112_v59  ;;  %v7481_v59 = vld [vmem:[#allocation2 + $0x8c0] sm:$0xff] }
 0x884   :  { %7893 = vmatpush1.bf16.msra.mxu1 %v7337_v50  ;;  %v7445_v50 = vld [vmem:[#allocation2 + $0x7a0] sm:$0xff] }
 0x885   :  { %7894 = vmatprep.subr.bf16.mxu1 %v7344_v45  ;;  %v7452_v45 = vld [vmem:[#allocation2 + $0x7d8] sm:$0xff] }
 0x886   :  { %10115 = vmatpush3.bf16.msra.mxu0 %v10114_v56  ;;  %v7494_v56 = vld [vmem:[#allocation2 + $0x928] sm:$0xff] }
 0x887   :  { %10117 = vmatprep.subr.bf16.mxu0 %v10116_v2 }
 0x888   :  { %7895 = vmatpush1.bf16.msra.mxu1 %v7343_v35  ;;  %v7469_v35 = vld [vmem:[#allocation2 + $0x860] sm:$0xff] }
 0x889   :  { %7896 = vmatprep.subr.bf16.mxu1 %v7350_v53  ;;  %v7476_v53 = vld [vmem:[#allocation2 + $0x898] sm:$0xff] }
 0x88a   :  { %10119 = vmatpush3.bf16.msra.mxu0 %v10118_v3 }
 0x88b   :  { %10121 = vmatprep.subr.bf16.mxu0 %v10120_v15 }
 0x88c   :  { %7897 = vmatpush1.bf16.msra.mxu1 %v7349_v63  ;;  %v7493_v63 = vld [vmem:[#allocation2 + $0x920] sm:$0xff] }
 0x88d   :  { %7898 = vmatprep.subr.bf16.mxu1 %v7356_v0  ;;  %v7500_v0 = vld [vmem:[#allocation2 + $0x958] sm:$0xff] }
 0x890   :  { %7899 = vmatpush1.bf16.msra.mxu1 %v7355_v4 }
 0x891   :  { %7900 = vmatprep.subr.bf16.mxu1 %v7362_v6 }
 0x894   :  { %7901 = vmatpush1.bf16.msra.mxu1 %v7361_v16 }
 0x895   :  { %7902 = vmatprep.subr.bf16.mxu1 %v7368_v17 }
 0x898   :  { %7903 = vmatpush1.bf16.msra.mxu1 %v7367_v29 }
 0x899   :  { %7904 = vmatprep.subr.bf16.mxu1 %v7374_v18 }
 0x89c   :  { %7905 = vmatpush1.bf16.msra.mxu1 %v7373_v5 }
 0x89d   :  { %7906 = vmatprep.subr.bf16.mxu1 %v7380_v9 }
 0x8a0   :  { %7907 = vmatpush1.bf16.msra.mxu1 %v7379_v19 }
 0x8a1   :  { %7908 = vmatprep.subr.bf16.mxu1 %v7386_v21 }
 0x8a4   :  { %7909 = vmatpush1.bf16.msra.mxu1 %v7385_v22 }
 0x8a5   :  { %7910 = vmatprep.subr.bf16.mxu1 %v7392_v23 }
 0x8a8   :  { %7911 = vmatpush1.bf16.msra.mxu1 %v7391_v24 }
 0x8a9   :  { %7921 = vmatprep.subr.bf16.mxu1 %v7398_v13 }
 0x8ab   :  { %7913 = vmatmul.mubr.bf16.vlgmr.msra.gmra.mrb[24].mxu1 %v13441_v54  ;;  %v7427_v54 = vld [vmem:[#allocation2 + $0x710] sm:$0xff] }
 0x8ac   :  { %7922 = vmatpush1.bf16.msra.mxu1 %v7397_v25  ;;  %7953 = vmatprep.mubr.bf16.mxu1 %v13446_v60  ;;  %v7433_v60 = vld [vmem:[#allocation2 + $0x740] sm:$0xff] }
 0x8ad   :  { %7923 = vmatprep.subr.bf16.mxu1 %v7404_v12 }
 0x8b0   :  { %7924 = vmatpush1.bf16.msra.mxu1 %v7403_v26 }
 0x8b1   :  { %7925 = vmatprep.subr.bf16.mxu1 %v7410_v27 }
 0x8b4   :  { %7926 = vmatpush1.bf16.msra.mxu1 %v7409_v30 }
 0x8b5   :  { %7927 = vmatprep.subr.bf16.mxu1 %v7416_v14 }
 0x8b8   :  { %7928 = vmatpush1.bf16.msra.mxu1 %v7415_v31 }
 0x8b9   :  { %7929 = vmatprep.subr.bf16.mxu1 %v7422_v33 }
 0x8bc   :  { %7930 = vmatpush1.bf16.msra.mxu1 %v7421_v34 }
 0x8bd   :  { %7931 = vmatprep.subr.bf16.mxu1 %v7428_v37 }
 0x8c0   :  { %7932 = vmatpush1.bf16.msra.mxu1 %v7427_v54 }
 0x8c1   :  { %7933 = vmatprep.subr.bf16.mxu1 %v7434_v38 }
 0x8c4   :  { %7934 = vmatpush1.bf16.msra.mxu1 %v7433_v60 }
 0x8c5   :  { %7935 = vmatprep.subr.bf16.mxu1 %v7440_v40 }
 0x8c8   :  { %7936 = vmatpush1.bf16.msra.mxu1 %v7439_v43 }
 0x8c9   :  { %7937 = vmatprep.subr.bf16.mxu1 %v7446_v44 }
 0x8cc   :  { %7938 = vmatpush1.bf16.msra.mxu1 %v7445_v50 }
 0x8cd   :  { %7939 = vmatprep.subr.bf16.mxu1 %v7452_v45  ;;  %v8035_v45 = vld [vmem:[%s13872_s5 + $0x520] sm:$0xff] }
 0x8d0   :  { %7940 = vmatpush1.bf16.msra.mxu1 %v7451_v61  ;;  %v8036_v61 = vld [vmem:[%s13872_s5 + $0x528] sm:$0xff] }
 0x8d1   :  { %7941 = vmatprep.subr.bf16.mxu1 %v7458_v42 }
 0x8d4   :  { %7942 = vmatpush1.bf16.msra.mxu1 %v7457_v46 }
 0x8d5   :  { %7943 = vmatprep.subr.bf16.mxu1 %v7464_v47 }
 0x8d8   :  { %7944 = vmatpush1.bf16.msra.mxu1 %v7463_v48  ;;  %v8053_v48 = vld [vmem:[%s13872_s5 + $0x5b0] sm:$0xff] }
 0x8d9   :  { %7945 = vmatprep.subr.bf16.mxu1 %v7470_v51  ;;  %v8054_v51 = vld [vmem:[%s13872_s5 + $0x5b8] sm:$0xff] }
 0x8dc   :  { %7946 = vmatpush1.bf16.msra.mxu1 %v7469_v35 }
 0x8dd   :  { %7947 = vmatprep.subr.bf16.mxu1 %v7476_v53 }
 0x8e0   :  { %7948 = vmatpush1.bf16.msra.mxu1 %v7475_v41 }
 0x8e1   :  { %7949 = vmatprep.subr.bf16.mxu1 %v7482_v55 }
 0x8e4   :  { %7950 = vmatpush1.bf16.msra.mxu1 %v7481_v59  ;;  %v10122_v59 = vpack.c.bf16 %v8036_v61, %v8035_v45  ;;  %v8064_v45 = vld [vmem:[%s13872_s5 + $0x608] sm:$0xff] }
 0x8e5   :  { %7951 = vmatprep.subr.bf16.mxu1 %v7488_v62 }
 0x8e8   :  { %7952 = vmatpush1.bf16.msra.mxu1 %v7487_v36 }
 0x8e9   :  { %7962 = vmatprep.subr.bf16.mxu1 %v7494_v56  ;;  %v10124_v56 = vpack.c.bf16 %v8054_v51, %v8053_v48 }
 0x8eb   :  { %7954 = vmatmul.mubr.bf16.vlgmr.msra.gmra.mrb[24].mxu1 %v13455_v10 }
 0x8ec   :  { %7963 = vmatpush1.bf16.msra.mxu1 %v7493_v63  ;;  %7994 = vmatprep.mubr.bf16.mxu1 %v10533_v1  ;;  %v8037_v63 = vld [vmem:[%s13872_s5 + $0x530] sm:$0xff] }
 0x8ed   :  { %7964 = vmatprep.subr.bf16.mxu1 %v7500_v0  ;;  %v8038_v0 = vld [vmem:[%s13872_s5 + $0x538] sm:$0xff] }
 0x8f0   :  { %7965 = vmatpush1.bf16.msra.mxu1 %v7499_v8 }
 0x8f7   :  { %9592 = vmatmul.mubr.msk.bf16.vlgmr.msra.gmra.mrb[24].mxu1 %vm6530_vm7, %v13464_v20 }
 0x8fe   :  { %v13581_v11 = vpop.f32.mrb[20].mxu1 }
 0x8ff   :  { %v8096_v2 = vsel %vm5219_vm2, %v13581_v11, 0.0  ;;  %v8139_v49 = vmul.f32 %v13581_v11, %v13581_v11  ;;  %v13587_v39 = vpop.f32.mrb[21].mxu1 }
 0x900   :  { %v8097_v10 = vrot.slane %v8096_v2, 4  ;;  %v8103_v1 = vsel %vm5219_vm2, %v13587_v39, 0.0  ;;  %v8140_v3 = vmul.f32 %v13587_v39, %v13587_v39  ;;  %v7672_v4 = vpop.f32.mrb[22].mxu1  ;;  %v13593_v6 = vpop.f32.mrb[24].mxu0 }
 0x901   :  { %v8145_v20 = vsel %vm5219_vm2, %v8139_v49, 0.0  ;;  %v8104_v7 = vrot.slane %v8103_v1, 4  ;;  %v7673_v52 = vpop.f32.mrb[23].mxu1  ;;  %v13596_v15 = vpop.f32.mrb[25].mxu0  ;;  %v8056_v49 = vld [vmem:[%s13872_s5 + $0x5c8] sm:$0xff]  ;;  %v10126_v4 = vpack.c.bf16 %v8038_v0, %v8037_v63  ;;  %v8067_v0 = vld [vmem:[%s13872_s5 + $0x620] sm:$0xff] }
 0x902   :  { %v8098_v16 = vadd.f32 %v8097_v10, %v8096_v2  ;;  %v8146_v17 = vrot.slane %v8145_v20, 4  ;;  %v8152_v29 = vsel %vm5219_vm2, %v8140_v3, 0.0  ;;  %v7836_v18 = vpop.f32.mrb[26].mxu0  ;;  %v8117_v19 = vsel %vm5219_vm2, %v13596_v15, 0.0  ;;  %v8055_v2 = vld [vmem:[%s13872_s5 + $0x5c0] sm:$0xff] }
 0x903   :  { %v8105_v5 = vadd.f32 %v8104_v7, %v8103_v1  ;;  %v8153_v9 = vrot.slane %v8152_v29, 4  ;;  %v7837_v21 = vpop.f32.mrb[27].mxu0  ;;  %v8118_v25 = vrot.slane %v8117_v19, 4  ;;  %v8142_v12 = vmul.f32 %v13596_v15, %v13596_v15  ;;  %v8039_v52 = vld [vmem:[%s13872_s5 + $0x540] sm:$0xff] }
 0x904   :  { %v8099_v22 = vrot.slane %v8098_v16, 2  ;;  %v8147_v23 = vadd.f32 %v8146_v17, %v8145_v20  ;;  %v8141_v3 = vmul.f32 %v13593_v6, %v13593_v6  ;;  %v10128_v7 = vpack.c.bf16 %v8056_v49, %v8055_v2  ;;  %v8057_v17 = vld [vmem:[%s13872_s5 + $0x5d0] sm:$0xff] }
 0x905   :  { %v8106_v24 = vrot.slane %v8105_v5, 2  ;;  %v8154_v13 = vadd.f32 %v8153_v9, %v8152_v29  ;;  %v8119_v14 = vadd.f32 %v8118_v25, %v8117_v19  ;;  %v8166_v31 = vsel %vm5219_vm2, %v8142_v12, 0.0  ;;  %v8058_v29 = vld [vmem:[%s13872_s5 + $0x5d8] sm:$0xff]  ;;  %v8059_v25 = vld [vmem:[%s13872_s5 + $0x5e0] sm:$0xff]  ;;  %v8060_v12 = vld [vmem:[%s13872_s5 + $0x5e8] sm:$0xff] }
 0x906   :  { %v8100_v26 = vadd.f32 %v8099_v22, %v8098_v16  ;;  %v8148_v27 = vrot.slane %v8147_v23, 2  ;;  %v8167_v37 = vrot.slane %v8166_v31, 4  ;;  %v8040_v16 = vld [vmem:[%s13872_s5 + $0x548] sm:$0xff]  ;;  %v8159_v9 = vsel %vm5219_vm2, %v8141_v3, 0.0  ;;  %v8041_v22 = vld [vmem:[%s13872_s5 + $0x550] sm:$0xff]  ;;  %v8070_v3 = vld [vmem:[%s13872_s5 + $0x638] sm:$0xff] }
 0x907   :  { %v8155_v30 = vrot.slane %v8154_v13, 2  ;;  %v8107_v33 = vadd.f32 %v8106_v24, %v8105_v5  ;;  %v8120_v54 = vrot.slane %v8119_v14, 2  ;;  %v8110_v5 = vsel %vm5219_vm2, %v13593_v6, 0.0 }
 0x908   :  { %v8149_v34 = vadd.f32 %v8148_v27, %v8147_v23  ;;  %v8168_v40 = vadd.f32 %v8167_v37, %v8166_v31  ;;  %v8101_v43 = vrot.slane %v8100_v26, 1  ;;  %v10130_v19 = vpack.c.bf16 %v8040_v16, %v8039_v52  ;;  %v8042_v23 = vld [vmem:[%s13872_s5 + $0x558] sm:$0xff]  ;;  %v8072_v52 = vld [vmem:[%s13872_s5 + $0x648] sm:$0xff] }
 0x909   :  { %v8108_v38 = vrot.slane %v8107_v33, 1  ;;  %v8156_v60 = vadd.f32 %v8155_v30, %v8154_v13  ;;  %v8121_v42 = vadd.f32 %v8120_v54, %v8119_v14  ;;  %v10132_v21 = vpack.c.bf16 %v8058_v29, %v8057_v17  ;;  %v8043_v30 = vld [vmem:[%s13872_s5 + $0x560] sm:$0xff]  ;;  %v8044_v14 = vld [vmem:[%s13872_s5 + $0x568] sm:$0xff]  ;;  %v8062_v37 = vld [vmem:[%s13872_s5 + $0x5f8] sm:$0xff] }
 0x90a   :  { %v8150_v44 = vrot.slane %v8149_v34, 1  ;;  %v8169_v46 = vrot.slane %v8168_v40, 2  ;;  %v8102_v55 = vadd.f32 %v8101_v43, %v8100_v26  ;;  %v8111_v24 = vrot.slane %v8110_v5, 4  ;;  %v8073_v17 = vld [vmem:[%s13872_s5 + $0x650] sm:$0xff]  ;;  %v8074_v29 = vld [vmem:[%s13872_s5 + $0x658] sm:$0xff] }
 0x90b   :  { %v8157_v50 = vrot.slane %v8156_v60, 1  ;;  %v8109_v35 = vadd.f32 %v8108_v38, %v8107_v33  ;;  %v8122_v41 = vrot.slane %v8121_v42, 1  ;;  %v8160_v13 = vrot.slane %v8159_v9, 4 }
 0x90c   :  { %v8151_v47 = vadd.f32 %v8150_v44, %v8149_v34  ;;  %v8170_v62 = vadd.f32 %v8169_v46, %v8168_v40  ;;  %v10134_v26 = vpack.c.bf16 %v8042_v23, %v8041_v22  ;;  %v10136_v27 = vpack.c.bf16 %v8060_v12, %v8059_v25  ;;  %v8061_v34 = vld [vmem:[%s13872_s5 + $0x5f0] sm:$0xff]  ;;  %v8046_v40 = vld [vmem:[%s13872_s5 + $0x578] sm:$0xff]  ;;  %v8047_v46 = vld [vmem:[%s13872_s5 + $0x580] sm:$0xff] }
 0x90d   :  { %v8158_v53 = vadd.f32 %v8157_v50, %v8156_v60  ;;  %v8123_v10 = vadd.f32 %v8122_v41, %v8121_v42  ;;  %v8112_v31 = vadd.f32 %v8111_v24, %v8110_v5  ;;  %v8161_v33 = vadd.f32 %v8160_v13, %v8159_v9  ;;  %v8045_v60 = vld [vmem:[%s13872_s5 + $0x570] sm:$0xff]  ;;  %v8063_v50 = vld [vmem:[%s13872_s5 + $0x600] sm:$0xff]  ;;  %v8076_v9 = vld [vmem:[%s13872_s5 + $0x668] sm:$0xff] }
 0x90e   :  { %v8187_v8 = vsel %vm5250_vm3, %v8102_v55, %v8151_v47  ;;  %v8171_v1 = vrot.slane %v8170_v62, 1  ;;  %v10138_v54 = vpack.c.bf16 %v8044_v14, %v8043_v30  ;;  %v10140_v38 = vpack.c.bf16 %v8062_v37, %v8061_v34  ;;  %v8048_v47 = vld [vmem:[%s13872_s5 + $0x588] sm:$0xff]  ;;  %v8075_v5 = vld [vmem:[%s13872_s5 + $0x660] sm:$0xff]  ;;  %v8078_v22 = vld [vmem:[%s13872_s5 + $0x678] sm:$0xff] }
 0x90f   :  { %v8188_v36 = vsel %vm5250_vm3, %v8109_v35, %v8158_v53  ;;  %v8113_v43 = vrot.slane %v8112_v31, 2  ;;  %v8162_v44 = vrot.slane %v8161_v33, 2  ;;  %v10142_v61 = vpack.c.bf16 %v8046_v40, %v8045_v60  ;;  %v8065_v35 = vld [vmem:[%s13872_s5 + $0x610] sm:$0xff]  ;;  %v8066_v53 = vld [vmem:[%s13872_s5 + $0x618] sm:$0xff]  ;;  %v8079_v24 = vld [vmem:[%s13872_s5 + $0x680] sm:$0xff] }
 0x910   :  { %8265 = vmatprep.mubr.f32.mxu0 %v8188_v36  ;;  %v8172_v20 = vadd.f32 %v8171_v1, %v8170_v62  ;;  %v10144_v42 = vpack.c.bf16 %v8064_v45, %v8063_v50  ;;  %v10146_v41 = vpack.c.bf16 %v8048_v47, %v8047_v46  ;;  %v10148_v55 = vpack.c.bf16 %v8066_v53, %v8065_v35  ;;  %v8050_v62 = vld [vmem:[%s13872_s5 + $0x598] sm:$0xff]  ;;  %v8069_v1 = vld [vmem:[%s13872_s5 + $0x630] sm:$0xff]  ;;  %v8080_v13 = vld [vmem:[%s13872_s5 + $0x688] sm:$0xff] }
 0x911   :  { %8266 = vmatmul.mubr.f32.vlgmr.msra.gmra.mrb[22].mxu0 %v8187_v8  ;;  %v8114_v48 = vadd.f32 %v8113_v43, %v8112_v31  ;;  %v8163_v51 = vadd.f32 %v8162_v44, %v8161_v33  ;;  %v8068_v8 = vld [vmem:[%s13872_s5 + $0x628] sm:$0xff]  ;;  %v10171_v25 = vpack.c.bf16 %v8080_v13, %v8079_v24  ;;  %v8081_v12 = vld [vmem:[%s13872_s5 + $0x690] sm:$0xff]  ;;  %v8083_v30 = vld [vmem:[%s13872_s5 + $0x6a0] sm:$0xff] }
 0x912   :  { %10123 = vmatpush3.bf16.msra.mxu0 %v10122_v59  ;;  %v8190_v18 = vsel %vm5250_vm3, %v8123_v10, %v8172_v20  ;;  %v8049_v59 = vld [vmem:[%s13872_s5 + $0x590] sm:$0xff]  ;;  %v10153_v10 = vpack.c.bf16 %v8068_v8, %v8067_v0  ;;  %v10156_v20 = vpack.c.bf16 %v8070_v3, %v8069_v1  ;;  %v8084_v14 = vld [vmem:[%s13872_s5 + $0x6a8] sm:$0xff]  ;;  %v8086_v34 = vld [vmem:[%s13872_s5 + $0x6b8] sm:$0xff] }
 0x913   :  { %10125 = vmatprep.subr.bf16.mxu0 %v10124_v56  ;;  %8335 = vmatprep.mubr.f32.mxu0 %v8190_v18  ;;  %v8115_v36 = vrot.slane %v8114_v48, 1  ;;  %v8164_v56 = vrot.slane %v8163_v51, 1  ;;  %v10150_v63 = vpack.c.bf16 %v8050_v62, %v8049_v59  ;;  %v10162_v18 = vpack.c.bf16 %v8074_v29, %v8073_v17  ;;  %v8085_v33 = vld [vmem:[%s13872_s5 + $0x6b0] sm:$0xff]  ;;  %v8088_v24 = vld [vmem:[%s13873_s6 + $0x48] sm:$0xf] }
 0x914   :  { %v10177_v31 = vpack.c.bf16 %v8084_v14, %v8083_v30  ;;  %v10180_v37 = vpack.c.bf16 %v8086_v34, %v8085_v33  ;;  %v8091_v13 = vld [vmem:[%s13873_s6 + $0x60] sm:$0xf] }
 0x915   :  { %v8116_v2 = vadd.f32 %v8115_v36, %v8114_v48  ;;  %v8165_v49 = vadd.f32 %v8164_v56, %v8163_v51 }
 0x916   :  { %10127 = vmatpush3.bf16.msra.mxu0 %v10126_v4 }
 0x917   :  { %10129 = vmatprep.subr.bf16.mxu0 %v10128_v7  ;;  %v8189_v4 = vsel %vm5250_vm3, %v8116_v2, %v8165_v49  ;;  %v8071_v7 = vld [vmem:[%s13872_s5 + $0x640] sm:$0xff] }
 0x918   :  { %v10159_v16 = vpack.c.bf16 %v8072_v52, %v8071_v7 }
 0x91a   :  { %10131 = vmatpush3.bf16.msra.mxu0 %v10130_v19  ;;  %v10165_v19 = vpack.c.bf16 %v8076_v9, %v8075_v5 }
 0x91b   :  { %10133 = vmatprep.subr.bf16.mxu0 %v10132_v21  ;;  %v8077_v21 = vld [vmem:[%s13872_s5 + $0x670] sm:$0xff] }
 0x91c   :  { %v10168_v23 = vpack.c.bf16 %v8078_v22, %v8077_v21 }
 0x91e   :  { %10135 = vmatpush3.bf16.msra.mxu0 %v10134_v26  ;;  %v8082_v26 = vld [vmem:[%s13872_s5 + $0x698] sm:$0xff] }
 0x91f   :  { %10137 = vmatprep.subr.bf16.mxu0 %v10136_v27  ;;  %v10174_v27 = vpack.c.bf16 %v8082_v26, %v8081_v12 }
 0x922   :  { %10139 = vmatpush3.bf16.msra.mxu0 %v10138_v54  ;;  %v8087_v54 = vld [vmem:[%s13872_s5 + $0x6c0] sm:$0xf] }
 0x923   :  { %10141 = vmatprep.subr.bf16.mxu0 %v10140_v38 }
 0x926   :  { %10143 = vmatpush3.bf16.msra.mxu0 %v10142_v61 }
 0x927   :  { %10145 = vmatprep.subr.bf16.mxu0 %v10144_v42 }
 0x92a   :  { %10147 = vmatpush3.bf16.msra.mxu0 %v10146_v41 }
 0x92b   :  { %10149 = vmatprep.subr.bf16.mxu0 %v10148_v55 }
 0x92e   :  { %10151 = vmatpush3.bf16.msra.mxu0 %v10150_v63 }
 0x92f   :  { %10152 = vmatprep.subr.bf16.mxu0 %v10535_v32 }
 0x931   :  { %8336 = vmatmul.mubr.f32.vlgmr.msra.gmra.mrb[28].mxu0 %v8189_v4 }
 0x932   :  { %10154 = vmatpush1.bf16.msra.mxu0 %v10153_v10 }
 0x933   :  { %10155 = vmatprep.subr.bf16.mxu0 %v10535_v32 }
 0x936   :  { %10157 = vmatpush1.bf16.msra.mxu0 %v10156_v20 }
 0x937   :  { %10158 = vmatprep.subr.bf16.mxu0 %v10535_v32 }
 0x93a   :  { %10160 = vmatpush1.bf16.msra.mxu0 %v10159_v16 }
 0x93b   :  { %10161 = vmatprep.subr.bf16.mxu0 %v10535_v32 }
 0x93e   :  { %10163 = vmatpush1.bf16.msra.mxu0 %v10162_v18 }
 0x93f   :  { %10164 = vmatprep.subr.bf16.mxu0 %v10535_v32 }
 0x942   :  { %10166 = vmatpush1.bf16.msra.mxu0 %v10165_v19 }
 0x943   :  { %10167 = vmatprep.subr.bf16.mxu0 %v10535_v32 }
 0x946   :  { %10169 = vmatpush1.bf16.msra.mxu0 %v10168_v23  ;;  %v8089_v23 = vld [vmem:[%s13873_s6 + $0x50] sm:$0xf] }
 0x947   :  { %10170 = vmatprep.subr.bf16.mxu0 %v10535_v32 }
 0x94a   :  { %10172 = vmatpush1.bf16.msra.mxu0 %v10171_v25 }
 0x94b   :  { %10173 = vmatprep.subr.bf16.mxu0 %v10535_v32 }
 0x94e   :  { %10175 = vmatpush1.bf16.msra.mxu0 %v10174_v27 }
 0x94f   :  { %10176 = vmatprep.subr.bf16.mxu0 %v10535_v32 }
 0x952   :  { %10178 = vmatpush1.bf16.msra.mxu0 %v10177_v31 }
 0x953   :  { %10179 = vmatprep.subr.bf16.mxu0 %v10535_v32 }
 0x956   :  { %10181 = vmatpush1.bf16.msra.mxu0 %v10180_v37 }
 0x957   :  { %8381 = vmatprep.subr.mxu0 %v10534_v28 }
 0x95a   :  { %9593 = vmatpush1.msk.msra.mxu0 %vm8197_vm9, %v8087_v54  ;;  %v8094_v54 = vld [vmem:[%s13874_s7 + $0x4] sm:$0x1] }
 0x95b   :  { %9595 = vmatprep.subr.msk.mxu0 %vm8197_vm9, %v8089_v23 }
 0x9ca   :  { %v13778_v38 = vpop.f32.mrb[24].mxu1 }
 0x9cb   :  { %v8124_v60 = vsel %vm5219_vm2, %v13778_v38, 0.0  ;;  %v8143_v32 = vmul.f32 %v13778_v38, %v13778_v38  ;;  %v13784_v40 = vpop.f32.mrb[25].mxu1 }
 0x9cc   :  { %v8125_v43 = vrot.slane %v8124_v60, 4  ;;  %v8132_v44 = vsel %vm8131_vm10, %v13784_v40, 0.0  ;;  %v8144_v50 = vmul.f32 %v13784_v40, %v13784_v40  ;;  %v8000_v45 = vpop.f32.mrb[26].mxu1 }
 0x9cd   :  { %v8173_v61 = vsel %vm5219_vm2, %v8143_v32, 0.0  ;;  %v8133_v42 = vrot.slane %v8132_v44, 4  ;;  %v8001_v46 = vpop.f32.mrb[27].mxu1 }
 0x9ce   :  { %v8126_v47 = vadd.f32 %v8125_v43, %v8124_v60  ;;  %v8174_v48 = vrot.slane %v8173_v61, 4  ;;  %v8180_v51 = vsel %vm8131_vm10, %v8144_v50, 0.0  ;;  %v8095_v43 = vld [vmem:[%s13874_s7 + $0x5] sm:$0x1]  ;;  %v8093_v46 = vld [vmem:[%s13873_s6 + $0x70] sm:$0xf] }
 0x9cf   :  { %v8134_v35 = vadd.f32 %v8133_v42, %v8132_v44  ;;  %v8181_v53 = vrot.slane %v8180_v51, 4 }
 0x9d0   :  { %v8127_v41 = vrot.slane %v8126_v47, 2  ;;  %v8175_v55 = vadd.f32 %v8174_v48, %v8173_v61  ;;  %v8090_v61 = vld [vmem:[%s13873_s6 + $0x58] sm:$0xf] }
 0x9d1   :  { %v8135_v59 = vrot.slane %v8134_v35, 2  ;;  %v8182_v62 = vadd.f32 %v8181_v53, %v8180_v51 }
 0x9d2   :  { %v8128_v36 = vadd.f32 %v8127_v41, %v8126_v47  ;;  %v8176_v56 = vrot.slane %v8175_v55, 2  ;;  %v8092_v47 = vld [vmem:[%s13873_s6 + $0x68] sm:$0xf] }
 0x9d3   :  { %v8136_v63 = vadd.f32 %v8135_v59, %v8134_v35  ;;  %v8183_v0 = vrot.slane %v8182_v62, 2 }
 0x9d4   :  { %v8177_v8 = vadd.f32 %v8176_v56, %v8175_v55  ;;  %v8129_v10 = vrot.slane %v8128_v36, 1 }
 0x9d5   :  { %v8137_v2 = vrot.slane %v8136_v63, 1  ;;  %v8184_v49 = vadd.f32 %v8183_v0, %v8182_v62 }
 0x9d6   :  { %v8178_v1 = vrot.slane %v8177_v8, 1  ;;  %v8130_v52 = vadd.f32 %v8129_v10, %v8128_v36 }
 0x9d7   :  { %v8185_v3 = vrot.slane %v8184_v49, 1  ;;  %v8138_v20 = vadd.f32 %v8137_v2, %v8136_v63 }
 0x9d8   :  { %v8179_v4 = vadd.f32 %v8178_v1, %v8177_v8 }
 0x9d9   :  { %v8186_v7 = vadd.f32 %v8185_v3, %v8184_v49 }
 0x9da   :  { %v8191_v17 = vsel %vm5250_vm3, %v8130_v52, %v8179_v4 }
 0x9db   :  { %v8192_v16 = vsel %vm5250_vm3, %v8138_v20, %v8186_v7 }
 0x9dc   :  { %9594 = vmatprep.mubr.msk.f32.mxu0 %vm8193_vm11, %v8192_v16 }
 0x9dd   :  { %8406 = vmatmul.mubr.f32.vlgmr.msra.gmra.mrb[30].mxu0 %v8191_v17 }
 0x9de   :  { %8516 = vmatprep.mubr.f32.mxu0 %v10534_v28  ;;  %9596 = vmatpush1.msk.msra.mxu0 %vm8197_vm9, %v8088_v24 }
 0x9df   :  { %9598 = vmatprep.subr.msk.mxu0 %vm8197_vm9, %v8091_v13 }
 0x9e4   :  { %v9896_v29 = vpop.f32.mrb[22].mxu0 }
 0x9e5   :  { %v9897_v18 = vpop.f32.mrb[23].mxu0 }
 0x9e6   :  { %v9898_v5 = vadd.f32 %v9897_v18, %v9896_v29 }
 0xa04   :  { %v9931_v9 = vpop.f32.mrb[28].mxu0 }
 0xa05   :  { %v9932_v19 = vpop.f32.mrb[29].mxu0 }
 0xa06   :  { %v9933_v21 = vadd.f32 %v9932_v19, %v9931_v9 }
 0xa08   :  { %v8338_v22 = vadd.f32 %v9933_v21, %v9898_v5 }
 0xab0   :  { %v8407_v25 = vpop.f32.mrb[30].mxu0 }
 0xab1   :  { %v8408_v12 = vadd.f32 %v8407_v25, %v8338_v22  ;;  %v8409_v26 = vpop.f32.mrb[31].mxu0 }
 0xab3   :  { %v8411_v27 = vmul.f32 0.00295858, %v8408_v12 }
 0xab5   :  { %v8412_v30 = vmul.f32 %v8411_v27, %v8411_v27 }
 0xab7   :  { %v8414_v14 = vrot.slane %v8412_v30, 7 }
 0xab9   :  { %v8416_v31 = vsub.f32 %v8411_v27, %v8414_v14 }
 0xabb   :  { %v8417_v33 = vmax.f32 %v8416_v31, 0.0 }
 0xabd   :  { %v8418_v34 = vadd.f32 1e-05, %v8417_v33 }
 0xabf   :  { %10395 = vrsqrt.f32 %v8418_v34 }
 0xac9   :  { %v10396_v37 = vpop.eup %10395 }
 0xaca   :  { %v8421_v60 = vrot.slane %v10396_v37, 1 }
 0xacc   :  { %v8423_v32 = vmul.f32 %v8421_v60, %v8094_v54 }
 0xace   :  { %v8424_v44 = vmul.f32 %v8423_v32, %v8411_v27 }
 0xad0   :  { %v8425_v50 = vsub.f32 %v8095_v43, %v8424_v44 }
 0xad2   :  { %v8427_v45 = vrot.slane %v8425_v50, 7 }
 0xad4   :  { %v8429_v42 = vsel %vm5250_vm3, %v8423_v32, %v8427_v45 }
 0xad5   :  { %9597 = vmatmul.mubr.msk.f32.vlgmr.msra.gmra.mrb[32].mxu0 %vm8430_vm12, %v8429_v42 }
 0xad6   :  { %9599 = vmatpush1.msk.msra.mxu0 %vm8197_vm9, %v8090_v61  ;;  %8587 = vmatprep.mubr.f32.mxu0 %v10534_v28 }
 0xad7   :  { %9601 = vmatprep.subr.msk.mxu0 %vm8197_vm9, %v8093_v46 }
 0xad9   :  { %9600 = vmatmul.mubr.msk.f32.vlgmr.msra.gmra.mrb[34].mxu0 %vm8430_vm12, %v8429_v42 }
 0xada   :  { %9602 = vmatpush1.msk.msra.mxu0 %vm8197_vm9, %v8092_v47  ;;  %8658 = vmatprep.mubr.f32.mxu0 %v10534_v28 }
 0xadd   :  { %9603 = vmatmul.mubr.msk.f32.vlgmr.msra.gmra.mrb[36].mxu0 %vm8430_vm12, %v8429_v42 }
 0xba8   :  { %v8518_v48 = vpop.f32.mrb[32].mxu0 }
 0xba9   :  { %v8668_v51 = vrot.slane %v8518_v48, %v12830_v57  ;;  %v8520_v35 = vpop.f32.mrb[33].mxu0  ;;  %v8698_v55 = vrot.slane %v8518_v48, %v12832_v58 }
 0xbaa   :  { %v8672_v53 = vrot.slane %v8520_v35, %v12830_v57  ;;  %v8702_v62 = vrot.slane %v8520_v35, %v12832_v58 }
 0xbab   :  { %v8689_v41 = vmul.f32 %v8668_v51, %v13581_v11 }
 0xbac   :  { %v8690_v59 = vmul.f32 %v8672_v53, %v13587_v39  ;;  %v8589_v36 = vpop.f32.mrb[34].mxu0 }
 0xbad   :  { %v13833_v56 = vadd.f32 %v8698_v55, %v8689_v41  ;;  %v8676_v28 = vrot.slane %v8589_v36, %v12830_v57  ;;  %v8591_v63 = vpop.f32.mrb[35].mxu0  ;;  %v8706_v49 = vrot.slane %v8589_v36, %v12832_v58 }
 0xbae   :  { %v8720_v0 = vadd.f32 %v8702_v62, %v8690_v59  ;;  %v8680_v8 = vrot.slane %v8591_v63, %v12830_v57  ;;  %v8710_v10 = vrot.slane %v8591_v63, %v12832_v58 }
 0xbaf   :  { %v8691_v2 = vmul.f32 %v8676_v28, %v13593_v6 }
 0xbb0   :  { %v8692_v11 = vmul.f32 %v8680_v8, %v13596_v15  ;;  %v8660_v39 = vpop.f32.mrb[36].mxu0 }
 0xbb1   :  { %v13841_v1 = vadd.f32 %v8706_v49, %v8691_v2  ;;  %v8684_v3 = vrot.slane %v8660_v39, %v12830_v57  ;;  %v8662_v4 = vpop.f32.mrb[37].mxu0  ;;  %v8714_v6 = vrot.slane %v8660_v39, %v12832_v58 }
 0xbb2   :  { %v13844_v20 = vadd.f32 %v8710_v10, %v8692_v11  ;;  %v8688_v7 = vrot.slane %v8662_v4, %v12830_v57  ;;  %v8718_v15 = vrot.slane %v8662_v4, %v12832_v58 }
 0xbb3   :  { %v8693_v52 = vmul.f32 %v8684_v3, %v13778_v38 }
 0xbb4   :  { %v8694_v16 = vmul.f32 %v8688_v7, %v13784_v40 }
 0xbb5   :  { %v13851_v17 = vadd.f32 %v8714_v6, %v8693_v52 }
 0xbb6   :  { %v8724_v29 = vadd.f32 %v8718_v15, %v8694_v16 }
 0xbb7   :  { %10531 = dma.done.wait [#allocation4 + $0x1], 10880 }
 0xbb8   :  { %10532 = vsyncadd [#allocation4 + $0x1], 4294956416  ;;  %v8815_v18 = vpack.c.bf16 %v8720_v0, %v8720_v0  ;;  %v8819_v5 = vpack.c.bf16 %v8724_v29, %v8724_v29  ;;  %v10397_v9 = vld [vmem:[#allocation3 + $0x4] ss:$8 sps:$4 sm:$0xff]   ;;  %v10399_v57 = vld [vmem:[#allocation3] ss:$8 sps:$4 sm:$0xff]   ;;  %v8814_v52 = vpack.c.bf16 %v13833_v56, %v13833_v56 }
 0xbb9   :  { %9254 = vmatprep.subr.bf16.mxu0 %v10397_v9  ;;  %v10400_v38 = vld [vmem:[#allocation3 + $0x14] ss:$8 sps:$4 sm:$0xff]   ;;  %v10402_v19 = vld [vmem:[#allocation3 + $0x10] ss:$8 sps:$4 sm:$0xff]   ;;  %v10403_v40 = vld [vmem:[#allocation3 + $0x24] ss:$8 sps:$4 sm:$0xff]  }
 0xbba   :  { %9286 = vmatprep.mubr.bf16.mxu0 %v8815_v18  ;;  %9691 = vmatprep.mubr.msk.bf16.mxu1 %vm8193_vm11, %v8819_v5  ;;  %v10405_v58 = vld [vmem:[#allocation3 + $0x20] ss:$8 sps:$4 sm:$0xff]   ;;  %v10406_v21 = vld [vmem:[#allocation3 + $0x34] ss:$8 sps:$4 sm:$0xff]   ;;  %v10408_v22 = vld [vmem:[#allocation3 + $0x30] ss:$8 sps:$4 sm:$0xff]   ;;  %v8817_v5 = vpack.c.bf16 %v13844_v20, %v13844_v20 }
 0xbbb   :  { %9255 = vmatpush1.bf16.msra.mxu0 %v10399_v57  ;;  %v10409_v23 = vld [vmem:[#allocation3 + $0x44] ss:$8 sps:$4 sm:$0xff]   ;;  %v10411_v24 = vld [vmem:[#allocation3 + $0x40] ss:$8 sps:$4 sm:$0xff]   ;;  %v10412_v13 = vld [vmem:[#allocation3 + $0x54] ss:$8 sps:$4 sm:$0xff]  }
 0xbbc   :  { %9256 = vmatprep.subr.bf16.mxu0 %v10400_v38  ;;  %v10414_v25 = vld [vmem:[#allocation3 + $0x50] ss:$8 sps:$4 sm:$0xff]   ;;  %v10415_v12 = vld [vmem:[#allocation3 + $0x64] ss:$8 sps:$4 sm:$0xff]   ;;  %v10417_v26 = vld [vmem:[#allocation3 + $0x60] ss:$8 sps:$4 sm:$0xff]   ;;  %v8818_v38 = vpack.c.bf16 %v13851_v17, %v13851_v17 }
 0xbbd   :  { %v10418_v27 = vld [vmem:[#allocation3 + $0x74] ss:$8 sps:$4 sm:$0xff]   ;;  %v10420_v30 = vld [vmem:[#allocation3 + $0x70] ss:$8 sps:$4 sm:$0xff]   ;;  %v10421_v14 = vld [vmem:[#allocation3 + $0x84] ss:$8 sps:$4 sm:$0xff]  }
 0xbbe   :  { %v10460_v31 = vld [vmem:[#allocation3 + $0x204] ss:$8 sps:$4 sm:$0xff]   ;;  %v10462_v33 = vld [vmem:[#allocation3 + $0x200] ss:$8 sps:$4 sm:$0xff]   ;;  %v10466_v37 = vld [vmem:[#allocation3 + $0x214] ss:$8 sps:$4 sm:$0xff]  }
 0xbbf   :  { %9257 = vmatpush1.bf16.msra.mxu0 %v10402_v19  ;;  %v10423_v34 = vld [vmem:[#allocation3 + $0x80] ss:$8 sps:$4 sm:$0xff]   ;;  %9336 = vmatprep.subr.bf16.mxu1 %v10460_v31  ;;  %v10468_v54 = vld [vmem:[#allocation3 + $0x210] ss:$8 sps:$4 sm:$0xff]   ;;  %v10424_v60 = vld [vmem:[#allocation3 + $0x94] ss:$8 sps:$4 sm:$0xff]  }
 0xbc0   :  { %9258 = vmatprep.subr.bf16.mxu0 %v10403_v40  ;;  %9337 = vmatpush1.bf16.msra.mxu1 %v10462_v33  ;;  %v10426_v32 = vld [vmem:[#allocation3 + $0x90] ss:$8 sps:$4 sm:$0xff]   ;;  %v10472_v43 = vld [vmem:[#allocation3 + $0x224] ss:$8 sps:$4 sm:$0xff]   ;;  %v10474_v50 = vld [vmem:[#allocation3 + $0x220] ss:$8 sps:$4 sm:$0xff]  }
 0xbc1   :  { %9338 = vmatprep.subr.bf16.mxu1 %v10466_v37  ;;  %v10427_v44 = vld [vmem:[#allocation3 + $0xa4] ss:$8 sps:$4 sm:$0xff]   ;;  %v10478_v45 = vld [vmem:[#allocation3 + $0x234] ss:$8 sps:$4 sm:$0xff]   ;;  %v10429_v61 = vld [vmem:[#allocation3 + $0xa0] ss:$8 sps:$4 sm:$0xff]  }
 0xbc2   :  { %v10430_v42 = vld [vmem:[#allocation3 + $0xb4] ss:$8 sps:$4 sm:$0xff]   ;;  %v10480_v46 = vld [vmem:[#allocation3 + $0x230] ss:$8 sps:$4 sm:$0xff]   ;;  %v10484_v47 = vld [vmem:[#allocation3 + $0x244] ss:$8 sps:$4 sm:$0xff]  }
 0xbc3   :  { %9259 = vmatpush1.bf16.msra.mxu0 %v10405_v58  ;;  %v10432_v48 = vld [vmem:[#allocation3 + $0xb0] ss:$8 sps:$4 sm:$0xff]   ;;  %v10433_v51 = vld [vmem:[#allocation3 + $0xc4] ss:$8 sps:$4 sm:$0xff]   ;;  %v10486_v35 = vld [vmem:[#allocation3 + $0x240] ss:$8 sps:$4 sm:$0xff]  }
 0xbc4   :  { %9260 = vmatprep.subr.bf16.mxu0 %v10406_v21  ;;  %9339 = vmatpush1.bf16.msra.mxu1 %v10468_v54  ;;  %v10490_v53 = vld [vmem:[#allocation3 + $0x254] ss:$8 sps:$4 sm:$0xff]   ;;  %v10435_v41 = vld [vmem:[#allocation3 + $0xc0] ss:$8 sps:$4 sm:$0xff]   ;;  %v10492_v59 = vld [vmem:[#allocation3 + $0x250] ss:$8 sps:$4 sm:$0xff]  }
 0xbc5   :  { %9340 = vmatprep.subr.bf16.mxu1 %v10472_v43  ;;  %v10436_v55 = vld [vmem:[#allocation3 + $0xd4] ss:$8 sps:$4 sm:$0xff]   ;;  %v10496_v62 = vld [vmem:[#allocation3 + $0x264] ss:$8 sps:$4 sm:$0xff]   ;;  %v10438_v36 = vld [vmem:[#allocation3 + $0xd0] ss:$8 sps:$4 sm:$0xff]  }
 0xbc6   :  { %v10439_v28 = vld [vmem:[#allocation3 + $0xe4] ss:$8 sps:$4 sm:$0xff]   ;;  %v10498_v63 = vld [vmem:[#allocation3 + $0x260] ss:$8 sps:$4 sm:$0xff]   ;;  %v10502_v0 = vld [vmem:[#allocation3 + $0x274] ss:$8 sps:$4 sm:$0xff]  }
 0xbc7   :  { %9261 = vmatpush1.bf16.msra.mxu0 %v10408_v22  ;;  %v10441_v8 = vld [vmem:[#allocation3 + $0xe0] ss:$8 sps:$4 sm:$0xff]   ;;  %v10504_v2 = vld [vmem:[#allocation3 + $0x270] ss:$8 sps:$4 sm:$0xff]   ;;  %v10442_v49 = vld [vmem:[#allocation3 + $0xf4] ss:$8 sps:$4 sm:$0xff]  }
 0xbc8   :  { %9262 = vmatprep.subr.bf16.mxu0 %v10409_v23  ;;  %9341 = vmatpush1.bf16.msra.mxu1 %v10474_v50  ;;  %v10508_v11 = vld [vmem:[#allocation3 + $0x284] ss:$8 sps:$4 sm:$0xff]   ;;  %v10444_v10 = vld [vmem:[#allocation3 + $0xf0] ss:$8 sps:$4 sm:$0xff]   ;;  %v10510_v39 = vld [vmem:[#allocation3 + $0x280] ss:$8 sps:$4 sm:$0xff]  }
 0xbc9   :  { %9342 = vmatprep.subr.bf16.mxu1 %v10478_v45  ;;  %v10447_v3 = vld [vmem:[#allocation3 + $0x104] ss:$8 sps:$4 sm:$0xff]   ;;  %v10514_v4 = vld [vmem:[#allocation3 + $0x294] ss:$8 sps:$4 sm:$0xff]   ;;  %v10445_v6 = vld [vmem:[#allocation3 + $0x100] ss:$8 sps:$4 sm:$0xff]  }
 0xbca   :  { %v8813_v7 = vld [vmem:[#allocation3 + $0x2a0] sm:$0x33]  ;;  %v10516_v16 = vld [vmem:[#allocation3 + $0x290] ss:$8 sps:$4 sm:$0xff]   ;;  %v10450_v15 = vld [vmem:[#allocation3 + $0x114] ss:$8 sps:$4 sm:$0xff]  }
 0xbcb   :  { %9263 = vmatpush1.bf16.msra.mxu0 %v10411_v24  ;;  %v9689_v29 = vcombine.high %v8813_v7, %v8813_v7  ;;  %v9688_v18 = vcombine.low %v8813_v7, %v8813_v7  ;;  %v10448_v9 = vld [vmem:[#allocation3 + $0x110] ss:$8 sps:$4 sm:$0xff]   ;;  %v10453_v57 = vld [vmem:[#allocation3 + $0x124] ss:$8 sps:$4 sm:$0xff]   ;;  %v10451_v19 = vld [vmem:[#allocation3 + $0x120] ss:$8 sps:$4 sm:$0xff]  }
 0xbcc   :  { %9264 = vmatprep.subr.bf16.mxu0 %v10412_v13  ;;  %9343 = vmatpush1.bf16.msra.mxu1 %v10480_v46  ;;  %v10456_v40 = vld [vmem:[#allocation3 + $0x134] ss:$8 sps:$4 sm:$0xff]   ;;  %v10454_v20 = vld [vmem:[#allocation3 + $0x130] ss:$8 sps:$4 sm:$0xff]   ;;  %v10459_v58 = vld [vmem:[#allocation3 + $0x144] ss:$8 sps:$4 sm:$0xff]  }
 0xbcd   :  { %9344 = vmatprep.subr.bf16.mxu1 %v10484_v47  ;;  %v9249_v56 = vsel %vm5219_vm2, %v9688_v18, 0  ;;  %v10457_v21 = vld [vmem:[#allocation3 + $0x140] ss:$8 sps:$4 sm:$0xff]   ;;  %v10465_v22 = vld [vmem:[#allocation3 + $0x154] ss:$8 sps:$4 sm:$0xff]  }
 0xbce   :  { %v10463_v23 = vld [vmem:[#allocation3 + $0x150] ss:$8 sps:$4 sm:$0xff]   ;;  %v10471_v24 = vld [vmem:[#allocation3 + $0x164] ss:$8 sps:$4 sm:$0xff]   ;;  %v10469_v17 = vld [vmem:[#allocation3 + $0x160] ss:$8 sps:$4 sm:$0xff]  }
 0xbcf   :  { %9265 = vmatpush1.bf16.msra.mxu0 %v10414_v25  ;;  %v10477_v13 = vld [vmem:[#allocation3 + $0x174] ss:$8 sps:$4 sm:$0xff]   ;;  %v10475_v25 = vld [vmem:[#allocation3 + $0x170] ss:$8 sps:$4 sm:$0xff]   ;;  %v10493_v31 = vld [vmem:[#allocation3 + $0x1a0] ss:$8 sps:$4 sm:$0xff]  }
 0xbd0   :  { %9266 = vmatprep.subr.bf16.mxu0 %v10415_v12  ;;  %9345 = vmatpush1.bf16.msra.mxu1 %v10486_v35  ;;  %v10483_v12 = vld [vmem:[#allocation3 + $0x184] ss:$8 sps:$4 sm:$0xff]   ;;  %v10501_v33 = vld [vmem:[#allocation3 + $0x1b4] ss:$8 sps:$4 sm:$0xff]   ;;  %v10505_v54 = vld [vmem:[#allocation3 + $0x1c0] ss:$8 sps:$4 sm:$0xff]  }
 0xbd1   :  { %9346 = vmatprep.subr.bf16.mxu1 %v10490_v53  ;;  %v10507_v37 = vld [vmem:[#allocation3 + $0x1c4] ss:$8 sps:$4 sm:$0xff]   ;;  %v10524_v50 = vld [vmem:[#allocation3 + $0x1f4] ss:$8 sps:$4 sm:$0xff]   ;;  %v10522_v45 = vld [vmem:[#allocation3 + $0x1f0] ss:$8 sps:$4 sm:$0xff]  }
 0xbd2   :  { %v10519_v43 = vld [vmem:[#allocation3 + $0x1e4] ss:$8 sps:$4 sm:$0xff]  }
 0xbd3   :  { %9267 = vmatpush1.bf16.msra.mxu0 %v10417_v26  ;;  %v10481_v26 = vld [vmem:[#allocation3 + $0x180] ss:$8 sps:$4 sm:$0xff]  }
 0xbd4   :  { %9268 = vmatprep.subr.bf16.mxu0 %v10418_v27  ;;  %9347 = vmatpush1.bf16.msra.mxu1 %v10492_v59  ;;  %v10489_v27 = vld [vmem:[#allocation3 + $0x194] ss:$8 sps:$4 sm:$0xff]  }
 0xbd5   :  { %9348 = vmatprep.subr.bf16.mxu1 %v10496_v62 }
 0xbd7   :  { %9269 = vmatpush1.bf16.msra.mxu0 %v10420_v30  ;;  %v10487_v30 = vld [vmem:[#allocation3 + $0x190] ss:$8 sps:$4 sm:$0xff]  }
 0xbd8   :  { %9270 = vmatprep.subr.bf16.mxu0 %v10421_v14  ;;  %9349 = vmatpush1.bf16.msra.mxu1 %v10498_v63  ;;  %v10495_v14 = vld [vmem:[#allocation3 + $0x1a4] ss:$8 sps:$4 sm:$0xff]  }
 0xbd9   :  { %9350 = vmatprep.subr.bf16.mxu1 %v10502_v0 }
 0xbdb   :  { %9271 = vmatpush1.bf16.msra.mxu0 %v10423_v34  ;;  %v10499_v34 = vld [vmem:[#allocation3 + $0x1b0] ss:$8 sps:$4 sm:$0xff]  }
 0xbdc   :  { %9272 = vmatprep.subr.bf16.mxu0 %v10424_v60  ;;  %9351 = vmatpush1.bf16.msra.mxu1 %v10504_v2  ;;  %v10513_v60 = vld [vmem:[#allocation3 + $0x1d4] ss:$8 sps:$4 sm:$0xff]  }
 0xbdd   :  { %9352 = vmatprep.subr.bf16.mxu1 %v10508_v11 }
 0xbdf   :  { %9273 = vmatpush1.bf16.msra.mxu0 %v10426_v32  ;;  %v10511_v32 = vld [vmem:[#allocation3 + $0x1d0] ss:$8 sps:$4 sm:$0xff]  }
 0xbe0   :  { %9274 = vmatprep.subr.bf16.mxu0 %v10427_v44  ;;  %9353 = vmatpush1.bf16.msra.mxu1 %v10510_v39  ;;  %v10517_v44 = vld [vmem:[#allocation3 + $0x1e0] ss:$8 sps:$4 sm:$0xff]  }
 0xbe1   :  { %9354 = vmatprep.subr.bf16.mxu1 %v10514_v4 }
 0xbe3   :  { %9275 = vmatpush1.bf16.msra.mxu0 %v10429_v61  ;;  %v8816_v61 = vpack.c.bf16 %v13841_v1, %v13841_v1 }
 0xbe4   :  { %9276 = vmatprep.subr.bf16.mxu0 %v10430_v42  ;;  %9355 = vmatpush1.bf16.msra.mxu1 %v10516_v16 }
 0xbe5   :  { %9690 = vmatprep.subr.msk.bf16.mxu1 %vm5219_vm2, %v9689_v29 }
 0xbe7   :  { %9277 = vmatpush1.bf16.msra.mxu0 %v10432_v48 }
 0xbe8   :  { %9278 = vmatprep.subr.bf16.mxu0 %v10433_v51  ;;  %9357 = vmatpush1.bf16.msra.mxu1 %v9249_v56 }
 0xbeb   :  { %9279 = vmatpush1.bf16.msra.mxu0 %v10435_v41  ;;  %9369 = vmatmul.mubr.bf16.vlgmr.msra.gmra.mrb[28].mxu1 %v8818_v38 }
 0xbec   :  { %9280 = vmatprep.subr.bf16.mxu0 %v10436_v55 }
 0xbef   :  { %9281 = vmatpush1.bf16.msra.mxu0 %v10438_v36 }
 0xbf0   :  { %9282 = vmatprep.subr.bf16.mxu0 %v10439_v28 }
 0xbf3   :  { %9283 = vmatpush1.bf16.msra.mxu0 %v10441_v8 }
 0xbf4   :  { %9284 = vmatprep.subr.bf16.mxu0 %v10442_v49 }
 0xbf7   :  { %9285 = vmatpush1.bf16.msra.mxu0 %v10444_v10 }
 0xbf8   :  { %9295 = vmatprep.subr.bf16.mxu0 %v10447_v3 }
 0xbfa   :  { %9287 = vmatmul.mubr.bf16.vlgmr.msra.gmra.mrb[40].mxu0 %v8814_v52 }
 0xbfb   :  { %9296 = vmatpush1.bf16.msra.mxu0 %v10445_v6  ;;  %9327 = vmatprep.mubr.bf16.mxu0 %v8817_v5 }
 0xbfc   :  { %9297 = vmatprep.subr.bf16.mxu0 %v10450_v15 }
 0xbff   :  { %9298 = vmatpush1.bf16.msra.mxu0 %v10448_v9 }
 0xc00   :  { %9299 = vmatprep.subr.bf16.mxu0 %v10453_v57 }
 0xc03   :  { %9300 = vmatpush1.bf16.msra.mxu0 %v10451_v19 }
 0xc04   :  { %9301 = vmatprep.subr.bf16.mxu0 %v10456_v40 }
 0xc07   :  { %9302 = vmatpush1.bf16.msra.mxu0 %v10454_v20 }
 0xc08   :  { %9303 = vmatprep.subr.bf16.mxu0 %v10459_v58 }
 0xc0b   :  { %9304 = vmatpush1.bf16.msra.mxu0 %v10457_v21 }
 0xc0c   :  { %9305 = vmatprep.subr.bf16.mxu0 %v10465_v22 }
 0xc0f   :  { %9306 = vmatpush1.bf16.msra.mxu0 %v10463_v23 }
 0xc10   :  { %9307 = vmatprep.subr.bf16.mxu0 %v10471_v24 }
 0xc13   :  { %9308 = vmatpush1.bf16.msra.mxu0 %v10469_v17 }
 0xc14   :  { %9309 = vmatprep.subr.bf16.mxu0 %v10477_v13 }
 0xc17   :  { %9310 = vmatpush1.bf16.msra.mxu0 %v10475_v25 }
 0xc18   :  { %9311 = vmatprep.subr.bf16.mxu0 %v10483_v12 }
 0xc1b   :  { %9312 = vmatpush1.bf16.msra.mxu0 %v10481_v26 }
 0xc1c   :  { %9313 = vmatprep.subr.bf16.mxu0 %v10489_v27 }
 0xc1f   :  { %9314 = vmatpush1.bf16.msra.mxu0 %v10487_v30 }
 0xc20   :  { %9315 = vmatprep.subr.bf16.mxu0 %v10495_v14 }
 0xc23   :  { %9316 = vmatpush1.bf16.msra.mxu0 %v10493_v31 }
 0xc24   :  { %9317 = vmatprep.subr.bf16.mxu0 %v10501_v33 }
 0xc27   :  { %9318 = vmatpush1.bf16.msra.mxu0 %v10499_v34 }
 0xc28   :  { %9319 = vmatprep.subr.bf16.mxu0 %v10507_v37 }
 0xc2b   :  { %9320 = vmatpush1.bf16.msra.mxu0 %v10505_v54 }
 0xc2c   :  { %9321 = vmatprep.subr.bf16.mxu0 %v10513_v60 }
 0xc2f   :  { %9322 = vmatpush1.bf16.msra.mxu0 %v10511_v32 }
 0xc30   :  { %9323 = vmatprep.subr.bf16.mxu0 %v10519_v43 }
 0xc33   :  { %9324 = vmatpush1.bf16.msra.mxu0 %v10517_v44 }
 0xc34   :  { %9325 = vmatprep.subr.bf16.mxu0 %v10524_v50 }
 0xc37   :  { %9326 = vmatpush1.bf16.msra.mxu0 %v10522_v45 }
 0xc3a   :  { %9328 = vmatmul.mubr.bf16.vlgmr.msra.gmra.mrb[40].mxu0 %v8816_v61 }
 0xcbe   :  { %v9370_v42 = vpop.f32.mrb[28].mxu1 }
 0xcbf   :  { %v9372_v46 = vpop.f32.mrb[29].mxu1 }
 0xcc0   :  { %v9374_v47 = vpop.f32.mrb[30].mxu1 }
 0xcc1   :  { %v9375_v48 = vpop.f32.mrb[31].mxu1 }
 0xd0d   :  { %v9329_v51 = vpop.f32.mrb[40].mxu0 }
 0xd0e   :  { %v10182_v35 = vadd.f32 %v9370_v42, %v9329_v51  ;;  %v9331_v53 = vpop.f32.mrb[41].mxu0 }
 0xd0f   :  { %v10183_v41 = vadd.f32 %v9372_v46, %v9331_v53  ;;  %v9333_v55 = vpop.f32.mrb[42].mxu0 }
 0xd10   :  { %v9377_v59 = vmax.f32 %v10182_v35, 0.0  ;;  %v9334_v62 = vpop.f32.mrb[43].mxu0 }
 0xd11   :  { %v9378_v36 = vmax.f32 %v10183_v41, 0.0 }
 0xd12   :  { %10525 = vtanh.f32 %v9377_v59 }
 0xd13   :  { %10527 = vtanh.f32 %v9378_v36 }
 0xd1c   :  { %v10526_v28 = vpop.eup %10525 }
 0xd1d   :  { %v10528_v63 = vpop.eup %10527 }
 0xd1e   :  { %v9383_v0 = vcombine.low %v10526_v28, %v10528_v63 }
 0xd20   :  { %9692 = vst.sshfl [vmem:[%s13875_s8] sm:$0x33 pattern:$0x76325410] %v9383_v0 }
 0xd21   :  { %9397 = vsyncmov [#allocation4] }
 0xd24   :  { %s9398_s10 = vpop.sfrf %9397 }
 0xd25   :  { %p9693_p0 = scmp.ne.s32.totalorder %s9398_s10, 0 }
 0xd27   :  { %9402 = shalt.err (%p9693_p0)  }
 0xd28   :  { %9404 = vsyncmov [#allocation4 + $0x1] }
 0xd2b   :  { %s9405_s11 = vpop.sfrf %9404 }
 0xd2c   :  { %p9694_p1 = scmp.ne.s32.totalorder %s9405_s11, 0 }
 0xd2e   :  { %9409 = shalt.err (%p9694_p1)  }

</bundles_post_ra>
